<compile_context>
chip_gen: v5e
topology: v5e:2x2
jax: 0.10.0
libtpu: 0.0.40
codegen_flags: <defaults>
</compile_context>

<pallas_src>
import functools

import jax
import jax.numpy as jnp
from jax.experimental import pallas as pl
from jax.experimental.pallas import tpu as pltpu

BN_EPS = 1e-5


# ----------------------------------------------------------------------------
# Fused kernel: conv1+bn1+relu+pool -> conv2+... -> conv3+... -> fc1+relu+fc2
# ----------------------------------------------------------------------------
def _fused_cnn_kernel(x_ref, w1_ref, b1_ref, w2_ref, b2_ref, w3_ref, b3_ref,
                      fc1w_ref, fc1b_ref, fc2w_ref, fc2b_ref, o_ref,
                      *, K1, L1, P1, K2, L2, P2, K3, L3, P3):
    # x_ref   : (1, L, 1)        one batch element, NLC
    # w1_ref  : (K1, 128)        conv1 weights (BN-folded), tap-major
    # w2_ref  : (K2*128, 256)    conv2 weights, im2col rows = k*C_in + ci
    # w3_ref  : (K3*256, 256)    conv3 weights, im2col rows
    # b*_ref  : (1, C_out)       folded BN bias (includes conv bias)
    # fc1w_ref: (P3*256, 128)    fc1 weight, rows permuted to NLC flatten order
    # fc2w_ref: (128, 128)       fc2 weight zero-padded to 128 output lanes
    # o_ref   : (1, 1, 128)      padded logits
    x = x_ref[0]                                  # (L, 1)
    w1 = w1_ref[...]                              # (K1, 128)

    # ---- layer 1: C_in == 1 -> VPU broadcast multiply-accumulate (no MXU) ----
    acc = jnp.zeros((L1, w1.shape[1]), jnp.float32)
    for k in range(K1):
        acc = acc + x[k:k + L1, :] * w1[k:k + 1, :]      # (L1,1)*(1,128)
    h = jnp.maximum(acc + b1_ref[...], 0.0)              # folded BN + ReLU
    h = jnp.max(h.reshape(P1, 2, h.shape[1]), axis=1)    # MaxPool1d(2) -> (P1,128)

    # ---- layer 2: im2col -> one (L2, K2*128) @ (K2*128, 256) matmul ----------
    cols = jnp.concatenate([h[k:k + L2, :] for k in range(K2)], axis=1)
    h = jnp.maximum(
        jnp.dot(cols, w2_ref[...], preferred_element_type=jnp.float32)
        + b2_ref[...], 0.0)
    h = jnp.max(h.reshape(P2, 2, h.shape[1]), axis=1)    # (P2, 256)

    # ---- layer 3: im2col -> one (L3, K3*256) @ (K3*256, 256) matmul ----------
    cols = jnp.concatenate([h[k:k + L3, :] for k in range(K3)], axis=1)
    h = jnp.maximum(
        jnp.dot(cols, w3_ref[...], preferred_element_type=jnp.float32)
        + b3_ref[...], 0.0)
    h = jnp.max(h.reshape(P3, 2, h.shape[1]), axis=1)    # (P3, 256)

    # ---- MLP head ------------------------------------------------------------
    # Flatten (P3, 256) -> (1, P3*256) row-major via a lane-aligned concat; the
    # fc1 weight rows were pre-permuted to the same (l*256 + c) ordering.
    hf = jnp.concatenate([h[l:l + 1, :] for l in range(P3)], axis=1)
    z = jnp.maximum(
        jnp.dot(hf, fc1w_ref[...], preferred_element_type=jnp.float32)
        + fc1b_ref[...], 0.0)
    out = jnp.dot(z, fc2w_ref[...], preferred_element_type=jnp.float32) \
        + fc2b_ref[...]                                  # (1, 128), lane-dense
    o_ref[0] = out.astype(o_ref.dtype)


# ----------------------------------------------------------------------------
# Wrapper: weight preparation (BN fold, im2col layout, fc permutation/padding)
# ----------------------------------------------------------------------------
@jax.jit
def forward_pallas(x_ncl, p):
    N, C_in, L = x_ncl.shape
    x = jnp.transpose(x_ncl, (0, 2, 1)).astype(jnp.float32)   # (N, L, C_in)

    def fold(conv_w, conv_b, bn):
        gamma, beta, mean, var = bn
        scale = gamma / jnp.sqrt(var + BN_EPS)
        w = jnp.transpose(conv_w, (2, 1, 0)) * scale           # (K, C_in, C_out)
        b = beta + (conv_b - mean) * scale
        return w, b.reshape(1, -1)

    w1, b1 = fold(p["conv1_w"], p["conv1_b"], p["bn1"])        # (5, 1, 128)
    w2, b2 = fold(p["conv2_w"], p["conv2_b"], p["bn2"])        # (3, 128, 256)
    w3, b3 = fold(p["conv3_w"], p["conv3_b"], p["bn3"])        # (3, 256, 256)

    K1, K2, K3 = 5, 3, 3
    w1 = w1.reshape(K1, 128)                 # C_in == 1: drop the unit axis
    w2 = w2.reshape(K2 * 128, 256)           # im2col rows = k*C_in + ci
    w3 = w3.reshape(K3 * 256, 256)

    # spatial bookkeeping identical to the PyTorch module
    L1 = L - K1 + 1; P1 = L1 // 2
    L2 = P1 - K2 + 1; P2 = L2 // 2
    L3 = P2 - K3 + 1; P3 = L3 // 2
    flat = 256 * P3

    # fc1: permute input index from PyTorch channel-major (c*P3 + l) to the
    # NLC flatten order (l*256 + c) so the kernel flattens NLC directly.
    fc1w = jnp.transpose(p["fc1_w"].reshape(128, 256, P3), (2, 1, 0)) \
              .reshape(flat, 128)
    fc1b = p["fc1_b"].reshape(1, 128)
    # fc2: zero-pad output channels to 128 for a lane-dense store.
    nc = p["fc2_w"].shape[0]
    fc2w = jnp.zeros((128, 128), jnp.float32).at[:, :nc].set(p["fc2_w"].T)
    fc2b = jnp.zeros((1, 128), jnp.float32).at[0, :nc].set(p["fc2_b"])

    kernel = functools.partial(
        _fused_cnn_kernel,
        K1=K1, L1=L1, P1=P1, K2=K2, L2=L2, P2=P2, K3=K3, L3=L3, P3=P3)

    out = pl.pallas_call(
        kernel,
        out_shape=jax.ShapeDtypeStruct((N, 1, 128), jnp.float32),
        grid=(N,),
        in_specs=[
            pl.BlockSpec((1, L, C_in), lambda n: (n, 0, 0)),
            pl.BlockSpec(w1.shape, lambda n: (0, 0)),
            pl.BlockSpec(b1.shape, lambda n: (0, 0)),
            pl.BlockSpec(w2.shape, lambda n: (0, 0)),
            pl.BlockSpec(b2.shape, lambda n: (0, 0)),
            pl.BlockSpec(w3.shape, lambda n: (0, 0)),
            pl.BlockSpec(b3.shape, lambda n: (0, 0)),
            pl.BlockSpec(fc1w.shape, lambda n: (0, 0)),
            pl.BlockSpec(fc1b.shape, lambda n: (0, 0)),
            pl.BlockSpec(fc2w.shape, lambda n: (0, 0)),
            pl.BlockSpec(fc2b.shape, lambda n: (0, 0)),
        ],
        out_specs=pl.BlockSpec((1, 1, 128), lambda n: (n, 0, 0)),
        compiler_params=pltpu.CompilerParams(
            dimension_semantics=("parallel",)),
    )(x, w1, b1, w2, b2, w3, b3, fc1w, fc1b, fc2w, fc2b)

    return out[:, 0, :nc]                                      # (N, num_classes)


# ----------------------------------------------------------------------------
# Parameter construction (deterministic, synthetic).
# ----------------------------------------------------------------------------
class _KeyGen:
    """Draws fresh subkeys on demand (avoids fixed-size split exhaustion)."""

    def __init__(self, key):
        self._key = key

    def __call__(self):
        self._key, sub = jax.random.split(self._key)
        return sub


def make_params(key, input_dim, input_channel=1, num_classes=2):
    kg = _KeyGen(key)

    def nrm(shape, s=0.1):
        return jax.random.normal(kg(), shape, jnp.float32) * s

    def bn_params(c):
        gamma = 1.0 + nrm((c,), 0.05)
        beta = nrm((c,), 0.05)
        mean = nrm((c,), 0.05)
        var = jnp.abs(nrm((c,), 0.2)) + 0.5
        return gamma, beta, mean, var

    p = {}
    # conv weights in PyTorch layout (C_out, C_in, K)
    p["conv1_w"] = nrm((128, input_channel, 5))
    p["conv1_b"] = nrm((128,))
    p["bn1"] = bn_params(128)
    p["conv2_w"] = nrm((256, 128, 3), 0.03)
    p["conv2_b"] = nrm((256,))
    p["bn2"] = bn_params(256)
    p["conv3_w"] = nrm((256, 256, 3), 0.03)
    p["conv3_b"] = nrm((256,))
    p["bn3"] = bn_params(256)

    d = input_dim
    d = (d - 5) + 1; d = d // 2
    d = (d - 3) + 1; d = d // 2
    d = (d - 3) + 1; d = d // 2
    flat_dim = 256 * d

    p["fc1_w"] = nrm((128, flat_dim), 0.03)   # PyTorch layout (out, in)
    p["fc1_b"] = nrm((128,))
    p["fc2_w"] = nrm((num_classes, 128), 0.05)
    p["fc2_b"] = nrm((num_classes,))
    return p


# ----------------------------------------------------------------------------
# Pure-JAX reference (eval-mode BN) for a numerical sanity check.
# ----------------------------------------------------------------------------
def forward_ref(x_ncl, p):
    def conv1d(x, w, b):
        y = jax.lax.conv_general_dilated(
            x, w, window_strides=(1,), padding="VALID",
            dimension_numbers=("NCH", "OIH", "NCH"))
        return y + b[None, :, None]

    def bn(x, gamma, beta, mean, var):
        return ((x - mean[None, :, None]) / jnp.sqrt(var[None, :, None] + BN_EPS)
                * gamma[None, :, None] + beta[None, :, None])

    def pool(x):
        N, C, L = x.shape
        Lp = L // 2
        return x[:, :, :2 * Lp].reshape(N, C, Lp, 2).max(-1)

    x = x_ncl
    for i in (1, 2, 3):
        x = conv1d(x, p[f"conv{i}_w"], p[f"conv{i}_b"])
        x = bn(x, *p[f"bn{i}"])
        x = jnp.maximum(x, 0.0)
        x = pool(x)
    x = x.reshape(x.shape[0], -1)
    x = jnp.maximum(x @ p["fc1_w"].T + p["fc1_b"], 0.0)
    return x @ p["fc2_w"].T + p["fc2_b"]


if __name__ == "__main__":
    key = jax.random.PRNGKey(0)
    k_x, k_p = jax.random.split(key)

    N, C_IN, L, NUM_CLASSES = 2, 1, 64, 2
    x = jax.random.normal(k_x, (N, C_IN, L), jnp.float32)
    params = make_params(k_p, input_dim=L, input_channel=C_IN,
                         num_classes=NUM_CLASSES)

    out = jax.block_until_ready(forward_pallas(x, params))
    ref = jax.block_until_ready(forward_ref(x, params))

    assert out.shape == (N, NUM_CLASSES), out.shape
    assert jnp.allclose(out, ref, rtol=1e-3, atol=1e-3), (out, ref)
    print("KERNEL_OK")
</pallas_src>

<mosaic_0001>
module attributes {stable_mosaic.version = 11 : i64} {
  func.func @_fused_cnn_kernel(%arg0: i32, %arg1: memref<1x64x1xf32, #tpu.memory_space<vmem>>, %arg2: memref<5x128xf32, #tpu.memory_space<vmem>>, %arg3: memref<1x128xf32, #tpu.memory_space<vmem>>, %arg4: memref<384x256xf32, #tpu.memory_space<vmem>>, %arg5: memref<1x256xf32, #tpu.memory_space<vmem>>, %arg6: memref<768x256xf32, #tpu.memory_space<vmem>>, %arg7: memref<1x256xf32, #tpu.memory_space<vmem>>, %arg8: memref<1536x128xf32, #tpu.memory_space<vmem>>, %arg9: memref<1x128xf32, #tpu.memory_space<vmem>>, %arg10: memref<128x128xf32, #tpu.memory_space<vmem>>, %arg11: memref<1x128xf32, #tpu.memory_space<vmem>>, %arg12: memref<1x1x128xf32, #tpu.memory_space<vmem>>) attributes {dimension_semantics = [#tpu.dimension_semantics<parallel>], iteration_bounds = array<i64: 2>, scalar_prefetch = 0 : i64, scratch_operands = 0 : i64, tpu.core_type = #tpu.core_type<tc>, window_params = [{transform_indices = @transform_0, window_bounds = array<i64: 1, 64, 1>}, {pipeline_mode = #tpu.pipeline_mode<synchronous>, transform_indices = @transform_1, window_bounds = array<i64: 5, 128>}, {pipeline_mode = #tpu.pipeline_mode<synchronous>, transform_indices = @transform_2, window_bounds = array<i64: 1, 128>}, {pipeline_mode = #tpu.pipeline_mode<synchronous>, transform_indices = @transform_3, window_bounds = array<i64: 384, 256>}, {pipeline_mode = #tpu.pipeline_mode<synchronous>, transform_indices = @transform_4, window_bounds = array<i64: 1, 256>}, {pipeline_mode = #tpu.pipeline_mode<synchronous>, transform_indices = @transform_5, window_bounds = array<i64: 768, 256>}, {pipeline_mode = #tpu.pipeline_mode<synchronous>, transform_indices = @transform_6, window_bounds = array<i64: 1, 256>}, {pipeline_mode = #tpu.pipeline_mode<synchronous>, transform_indices = @transform_7, window_bounds = array<i64: 1536, 128>}, {pipeline_mode = #tpu.pipeline_mode<synchronous>, transform_indices = @transform_8, window_bounds = array<i64: 1, 128>}, {pipeline_mode = #tpu.pipeline_mode<synchronous>, transform_indices = @transform_9, window_bounds = array<i64: 128, 128>}, {pipeline_mode = #tpu.pipeline_mode<synchronous>, transform_indices = @transform_10, window_bounds = array<i64: 1, 128>}, {transform_indices = @transform_11, window_bounds = array<i64: 1, 1, 128>}]} {
    %c0 = arith.constant 0 : index
    %c0_0 = arith.constant 0 : index
    %c0_1 = arith.constant 0 : index
    %0 = vector.load %arg1[%c0, %c0_0, %c0_1] : memref<1x64x1xf32, #tpu.memory_space<vmem>>, vector<1x64x1xf32>
    %1 = vector.shape_cast %0 : vector<1x64x1xf32> to vector<64x1xf32>
    %c0_2 = arith.constant 0 : index
    %c0_3 = arith.constant 0 : index
    %2 = vector.load %arg2[%c0_2, %c0_3] : memref<5x128xf32, #tpu.memory_space<vmem>>, vector<5x128xf32>
    %cst = arith.constant 0.000000e+00 : f32
    %3 = vector.broadcast %cst : f32 to vector<60x128xf32>
    %4 = vector.extract_strided_slice %1 {offsets = [0, 0], sizes = [60, 1], strides = [1, 1]} : vector<64x1xf32> to vector<60x1xf32>
    %5 = vector.extract_strided_slice %2 {offsets = [0, 0], sizes = [1, 128], strides = [1, 1]} : vector<5x128xf32> to vector<1x128xf32>
    %6 = vector.broadcast %4 : vector<60x1xf32> to vector<60x128xf32>
    %7 = vector.broadcast %5 : vector<1x128xf32> to vector<60x128xf32>
    %8 = arith.mulf %6, %7 : vector<60x128xf32>
    %9 = arith.addf %3, %8 : vector<60x128xf32>
    %10 = vector.extract_strided_slice %1 {offsets = [1, 0], sizes = [60, 1], strides = [1, 1]} : vector<64x1xf32> to vector<60x1xf32>
    %11 = vector.extract_strided_slice %2 {offsets = [1, 0], sizes = [1, 128], strides = [1, 1]} : vector<5x128xf32> to vector<1x128xf32>
    %12 = vector.broadcast %10 : vector<60x1xf32> to vector<60x128xf32>
    %13 = vector.broadcast %11 : vector<1x128xf32> to vector<60x128xf32>
    %14 = arith.mulf %12, %13 : vector<60x128xf32>
    %15 = arith.addf %9, %14 : vector<60x128xf32>
    %16 = vector.extract_strided_slice %1 {offsets = [2, 0], sizes = [60, 1], strides = [1, 1]} : vector<64x1xf32> to vector<60x1xf32>
    %17 = vector.extract_strided_slice %2 {offsets = [2, 0], sizes = [1, 128], strides = [1, 1]} : vector<5x128xf32> to vector<1x128xf32>
    %18 = vector.broadcast %16 : vector<60x1xf32> to vector<60x128xf32>
    %19 = vector.broadcast %17 : vector<1x128xf32> to vector<60x128xf32>
    %20 = arith.mulf %18, %19 : vector<60x128xf32>
    %21 = arith.addf %15, %20 : vector<60x128xf32>
    %22 = vector.extract_strided_slice %1 {offsets = [3, 0], sizes = [60, 1], strides = [1, 1]} : vector<64x1xf32> to vector<60x1xf32>
    %23 = vector.extract_strided_slice %2 {offsets = [3, 0], sizes = [1, 128], strides = [1, 1]} : vector<5x128xf32> to vector<1x128xf32>
    %24 = vector.broadcast %22 : vector<60x1xf32> to vector<60x128xf32>
    %25 = vector.broadcast %23 : vector<1x128xf32> to vector<60x128xf32>
    %26 = arith.mulf %24, %25 : vector<60x128xf32>
    %27 = arith.addf %21, %26 : vector<60x128xf32>
    %28 = vector.extract_strided_slice %1 {offsets = [4, 0], sizes = [60, 1], strides = [1, 1]} : vector<64x1xf32> to vector<60x1xf32>
    %29 = vector.extract_strided_slice %2 {offsets = [4, 0], sizes = [1, 128], strides = [1, 1]} : vector<5x128xf32> to vector<1x128xf32>
    %30 = vector.broadcast %28 : vector<60x1xf32> to vector<60x128xf32>
    %31 = vector.broadcast %29 : vector<1x128xf32> to vector<60x128xf32>
    %32 = arith.mulf %30, %31 : vector<60x128xf32>
    %33 = arith.addf %27, %32 : vector<60x128xf32>
    %c0_4 = arith.constant 0 : index
    %c0_5 = arith.constant 0 : index
    %34 = vector.load %arg3[%c0_4, %c0_5] : memref<1x128xf32, #tpu.memory_space<vmem>>, vector<1x128xf32>
    %35 = vector.broadcast %34 : vector<1x128xf32> to vector<60x128xf32>
    %36 = arith.addf %33, %35 : vector<60x128xf32>
    %cst_6 = arith.constant 0.000000e+00 : f32
    %37 = vector.broadcast %cst_6 : f32 to vector<60x128xf32>
    %38 = arith.maximumf %36, %37 : vector<60x128xf32>
    %39 = vector.shape_cast %38 : vector<60x128xf32> to vector<30x2x128xf32>
    %cst_7 = arith.constant dense<0xFF800000> : vector<30x128xf32>
    %40 = vector.multi_reduction <maximumf>, %39, %cst_7 [1] : vector<30x2x128xf32> to vector<30x128xf32>
    %41 = vector.extract_strided_slice %40 {offsets = [0, 0], sizes = [28, 128], strides = [1, 1]} : vector<30x128xf32> to vector<28x128xf32>
    %42 = vector.extract_strided_slice %40 {offsets = [1, 0], sizes = [28, 128], strides = [1, 1]} : vector<30x128xf32> to vector<28x128xf32>
    %43 = vector.extract_strided_slice %40 {offsets = [2, 0], sizes = [28, 128], strides = [1, 1]} : vector<30x128xf32> to vector<28x128xf32>
    %44 = tpu.concatenate %41, %42, %43 in 1 : vector<28x128xf32>, vector<28x128xf32>, vector<28x128xf32> -> vector<28x384xf32>
    %c0_8 = arith.constant 0 : index
    %c0_9 = arith.constant 0 : index
    %45 = vector.load %arg4[%c0_8, %c0_9] : memref<384x256xf32, #tpu.memory_space<vmem>>, vector<384x256xf32>
    %cst_10 = arith.constant dense<0.000000e+00> : vector<28x256xf32>
    %46 = tpu.matmul %44, %45, %cst_10 {dimension_numbers = #tpu.dot_dimension_numbers<[1], [0], [0], [1], [0, 0, 1, 1], [], []>} : vector<28x384xf32>, vector<384x256xf32>, vector<28x256xf32> -> vector<28x256xf32>
    %c0_11 = arith.constant 0 : index
    %c0_12 = arith.constant 0 : index
    %47 = vector.load %arg5[%c0_11, %c0_12] : memref<1x256xf32, #tpu.memory_space<vmem>>, vector<1x256xf32>
    %48 = vector.broadcast %47 : vector<1x256xf32> to vector<28x256xf32>
    %49 = arith.addf %46, %48 : vector<28x256xf32>
    %cst_13 = arith.constant 0.000000e+00 : f32
    %50 = vector.broadcast %cst_13 : f32 to vector<28x256xf32>
    %51 = arith.maximumf %49, %50 : vector<28x256xf32>
    %52 = vector.shape_cast %51 : vector<28x256xf32> to vector<14x2x256xf32>
    %cst_14 = arith.constant dense<0xFF800000> : vector<14x256xf32>
    %53 = vector.multi_reduction <maximumf>, %52, %cst_14 [1] : vector<14x2x256xf32> to vector<14x256xf32>
    %54 = vector.extract_strided_slice %53 {offsets = [0, 0], sizes = [12, 256], strides = [1, 1]} : vector<14x256xf32> to vector<12x256xf32>
    %55 = vector.extract_strided_slice %53 {offsets = [1, 0], sizes = [12, 256], strides = [1, 1]} : vector<14x256xf32> to vector<12x256xf32>
    %56 = vector.extract_strided_slice %53 {offsets = [2, 0], sizes = [12, 256], strides = [1, 1]} : vector<14x256xf32> to vector<12x256xf32>
    %57 = tpu.concatenate %54, %55, %56 in 1 : vector<12x256xf32>, vector<12x256xf32>, vector<12x256xf32> -> vector<12x768xf32>
    %c0_15 = arith.constant 0 : index
    %c0_16 = arith.constant 0 : index
    %58 = vector.load %arg6[%c0_15, %c0_16] : memref<768x256xf32, #tpu.memory_space<vmem>>, vector<768x256xf32>
    %cst_17 = arith.constant dense<0.000000e+00> : vector<12x256xf32>
    %59 = tpu.matmul %57, %58, %cst_17 {dimension_numbers = #tpu.dot_dimension_numbers<[1], [0], [0], [1], [0, 0, 1, 1], [], []>} : vector<12x768xf32>, vector<768x256xf32>, vector<12x256xf32> -> vector<12x256xf32>
    %c0_18 = arith.constant 0 : index
    %c0_19 = arith.constant 0 : index
    %60 = vector.load %arg7[%c0_18, %c0_19] : memref<1x256xf32, #tpu.memory_space<vmem>>, vector<1x256xf32>
    %61 = vector.broadcast %60 : vector<1x256xf32> to vector<12x256xf32>
    %62 = arith.addf %59, %61 : vector<12x256xf32>
    %cst_20 = arith.constant 0.000000e+00 : f32
    %63 = vector.broadcast %cst_20 : f32 to vector<12x256xf32>
    %64 = arith.maximumf %62, %63 : vector<12x256xf32>
    %65 = vector.shape_cast %64 : vector<12x256xf32> to vector<6x2x256xf32>
    %cst_21 = arith.constant dense<0xFF800000> : vector<6x256xf32>
    %66 = vector.multi_reduction <maximumf>, %65, %cst_21 [1] : vector<6x2x256xf32> to vector<6x256xf32>
    %67 = vector.extract_strided_slice %66 {offsets = [0, 0], sizes = [1, 256], strides = [1, 1]} : vector<6x256xf32> to vector<1x256xf32>
    %68 = vector.extract_strided_slice %66 {offsets = [1, 0], sizes = [1, 256], strides = [1, 1]} : vector<6x256xf32> to vector<1x256xf32>
    %69 = vector.extract_strided_slice %66 {offsets = [2, 0], sizes = [1, 256], strides = [1, 1]} : vector<6x256xf32> to vector<1x256xf32>
    %70 = vector.extract_strided_slice %66 {offsets = [3, 0], sizes = [1, 256], strides = [1, 1]} : vector<6x256xf32> to vector<1x256xf32>
    %71 = vector.extract_strided_slice %66 {offsets = [4, 0], sizes = [1, 256], strides = [1, 1]} : vector<6x256xf32> to vector<1x256xf32>
    %72 = vector.extract_strided_slice %66 {offsets = [5, 0], sizes = [1, 256], strides = [1, 1]} : vector<6x256xf32> to vector<1x256xf32>
    %73 = tpu.concatenate %67, %68, %69, %70, %71, %72 in 1 : vector<1x256xf32>, vector<1x256xf32>, vector<1x256xf32>, vector<1x256xf32>, vector<1x256xf32>, vector<1x256xf32> -> vector<1x1536xf32>
    %c0_22 = arith.constant 0 : index
    %c0_23 = arith.constant 0 : index
    %74 = vector.load %arg8[%c0_22, %c0_23] : memref<1536x128xf32, #tpu.memory_space<vmem>>, vector<1536x128xf32>
    %cst_24 = arith.constant dense<0.000000e+00> : vector<1x128xf32>
    %75 = tpu.matmul %73, %74, %cst_24 {dimension_numbers = #tpu.dot_dimension_numbers<[1], [0], [0], [1], [0, 0, 1, 1], [], []>} : vector<1x1536xf32>, vector<1536x128xf32>, vector<1x128xf32> -> vector<1x128xf32>
    %c0_25 = arith.constant 0 : index
    %c0_26 = arith.constant 0 : index
    %76 = vector.load %arg9[%c0_25, %c0_26] : memref<1x128xf32, #tpu.memory_space<vmem>>, vector<1x128xf32>
    %77 = arith.addf %75, %76 : vector<1x128xf32>
    %cst_27 = arith.constant 0.000000e+00 : f32
    %78 = vector.broadcast %cst_27 : f32 to vector<1x128xf32>
    %79 = arith.maximumf %77, %78 : vector<1x128xf32>
    %c0_28 = arith.constant 0 : index
    %c0_29 = arith.constant 0 : index
    %80 = vector.load %arg10[%c0_28, %c0_29] : memref<128x128xf32, #tpu.memory_space<vmem>>, vector<128x128xf32>
    %cst_30 = arith.constant dense<0.000000e+00> : vector<1x128xf32>
    %81 = tpu.matmul %79, %80, %cst_30 {dimension_numbers = #tpu.dot_dimension_numbers<[1], [0], [0], [1], [0, 0, 1, 1], [], []>} : vector<1x128xf32>, vector<128x128xf32>, vector<1x128xf32> -> vector<1x128xf32>
    %c0_31 = arith.constant 0 : index
    %c0_32 = arith.constant 0 : index
    %82 = vector.load %arg11[%c0_31, %c0_32] : memref<1x128xf32, #tpu.memory_space<vmem>>, vector<1x128xf32>
    %83 = arith.addf %81, %82 : vector<1x128xf32>
    %c0_33 = arith.constant 0 : index
    %c0_34 = arith.constant 0 : index
    %c0_35 = arith.constant 0 : index
    %84 = vector.load %arg12[%c0_33, %c0_34, %c0_35] : memref<1x1x128xf32, #tpu.memory_space<vmem>>, vector<1x1x128xf32>
    %85 = vector.shape_cast %84 : vector<1x1x128xf32> to vector<1x128xf32>
    %86 = vector.shape_cast %83 : vector<1x128xf32> to vector<1x1x128xf32>
    tpu.vector_store %arg12[%c0_33, %c0_34, %c0_35], %86 {strides = array<i32>} : memref<1x1x128xf32, #tpu.memory_space<vmem>>, vector<1x1x128xf32>,
    return
  }
  func.func @transform_0(%arg0: i32) -> (i32, i32, i32) {
    %c0_i32 = arith.constant 0 : i32
    %c0_i32_0 = arith.constant 0 : i32
    %c0_i32_1 = arith.constant 0 : i32
    return %arg0, %c0_i32, %c0_i32_0 : i32, i32, i32
  }
  func.func @transform_1(%arg0: i32) -> (i32, i32) {
    %c0_i32 = arith.constant 0 : i32
    %c0_i32_0 = arith.constant 0 : i32
    %c0_i32_1 = arith.constant 0 : i32
    return %c0_i32, %c0_i32_0 : i32, i32
  }
  func.func @transform_2(%arg0: i32) -> (i32, i32) {
    %c0_i32 = arith.constant 0 : i32
    %c0_i32_0 = arith.constant 0 : i32
    %c0_i32_1 = arith.constant 0 : i32
    return %c0_i32, %c0_i32_0 : i32, i32
  }
  func.func @transform_3(%arg0: i32) -> (i32, i32) {
    %c0_i32 = arith.constant 0 : i32
    %c0_i32_0 = arith.constant 0 : i32
    %c0_i32_1 = arith.constant 0 : i32
    return %c0_i32, %c0_i32_0 : i32, i32
  }
  func.func @transform_4(%arg0: i32) -> (i32, i32) {
    %c0_i32 = arith.constant 0 : i32
    %c0_i32_0 = arith.constant 0 : i32
    %c0_i32_1 = arith.constant 0 : i32
    return %c0_i32, %c0_i32_0 : i32, i32
  }
  func.func @transform_5(%arg0: i32) -> (i32, i32) {
    %c0_i32 = arith.constant 0 : i32
    %c0_i32_0 = arith.constant 0 : i32
    %c0_i32_1 = arith.constant 0 : i32
    return %c0_i32, %c0_i32_0 : i32, i32
  }
  func.func @transform_6(%arg0: i32) -> (i32, i32) {
    %c0_i32 = arith.constant 0 : i32
    %c0_i32_0 = arith.constant 0 : i32
    %c0_i32_1 = arith.constant 0 : i32
    return %c0_i32, %c0_i32_0 : i32, i32
  }
  func.func @transform_7(%arg0: i32) -> (i32, i32) {
    %c0_i32 = arith.constant 0 : i32
    %c0_i32_0 = arith.constant 0 : i32
    %c0_i32_1 = arith.constant 0 : i32
    return %c0_i32, %c0_i32_0 : i32, i32
  }
  func.func @transform_8(%arg0: i32) -> (i32, i32) {
    %c0_i32 = arith.constant 0 : i32
    %c0_i32_0 = arith.constant 0 : i32
    %c0_i32_1 = arith.constant 0 : i32
    return %c0_i32, %c0_i32_0 : i32, i32
  }
  func.func @transform_9(%arg0: i32) -> (i32, i32) {
    %c0_i32 = arith.constant 0 : i32
    %c0_i32_0 = arith.constant 0 : i32
    %c0_i32_1 = arith.constant 0 : i32
    return %c0_i32, %c0_i32_0 : i32, i32
  }
  func.func @transform_10(%arg0: i32) -> (i32, i32) {
    %c0_i32 = arith.constant 0 : i32
    %c0_i32_0 = arith.constant 0 : i32
    %c0_i32_1 = arith.constant 0 : i32
    return %c0_i32, %c0_i32_0 : i32, i32
  }
  func.func @transform_11(%arg0: i32) -> (i32, i32, i32) {
    %c0_i32 = arith.constant 0 : i32
    %c0_i32_0 = arith.constant 0 : i32
    %c0_i32_1 = arith.constant 0 : i32
    return %arg0, %c0_i32, %c0_i32_0 : i32, i32, i32
  }
}

</mosaic_0001>

<bundles_post_ra>
// kernel: forward_pallas.1
= control target key start
LH: loop header
LB: loop body
LE: loop exit
PB: predicated region body
PF: predicated region fallthrough
CT: control target
= control target key end

     0   :  { %s5463_s0 = inlined_call_operand.vmem [shape: f32[2,64,1], index: 0, kind: input, shape index: {}]   ;;  %s5464_s1 = inlined_call_operand.vmem [shape: f32[5,128], index: 1, kind: input, shape index: {}]   ;;  %s5465_s2 = inlined_call_operand.vmem [shape: f32[1,128], index: 2, kind: input, shape index: {}]   ;;  %s5466_s3 = inlined_call_operand.vmem [shape: f32[384,256], index: 3, kind: input, shape index: {}]   ;;  %s5467_s4 = inlined_call_operand.vmem [shape: f32[1,256], index: 4, kind: input, shape index: {}]   ;;  %s5468_s5 = inlined_call_operand.vmem [shape: f32[768,256], index: 5, kind: input, shape index: {}]   ;;  %s5469_s6 = inlined_call_operand.vmem [shape: f32[1,256], index: 6, kind: input, shape index: {}]   ;;  %s5470_s7 = inlined_call_operand.vmem [shape: f32[1536,128], index: 7, kind: input, shape index: {}]   ;;  %s5471_s8 = inlined_call_operand.vmem [shape: f32[1,128], index: 8, kind: input, shape index: {}]   ;;  %s5472_s9 = inlined_call_operand.vmem [shape: f32[128,128], index: 9, kind: input, shape index: {}]   ;;  %s5473_s10 = inlined_call_operand.vmem [shape: f32[1,128], index: 10, kind: input, shape index: {}]   ;;  %s5474_s11 = inlined_call_operand.hbm [shape: f32[2,1,128], index: 11, kind: output, shape index: {}]  }
   0x1   :  { %5475 = sst [smem:[#allocation5_spill]] %s5463_s0 }
   0x2   :  { %5476 = sst [smem:[#allocation6_spill]] %s5464_s1 }
   0x3   :  { %16 = vsyncpa [#allocation3], 0 }
   0x4   :  { %18 = vsyncpa [#allocation3 + $0x1], 0  ;;  %s3066_s17 = smov 0   ;;  %s3068_s18 = smov 0  }
   0x5   :  { %s3070_s19 = smov 0   ;;  %s3072_s20 = smov 0  }
   0x6 LB: > { %s3087_s21 = sadd.s32 4294967295, %s3003_s20   ;;  %s2888_s22 = sadd.s32 4294967294, %s3003_s20   ;;  %s3003_s20 = sphi %s3072_s20, %s5484_s20   ;;  %s2999_s19 = sphi %s3070_s19, %s5483_s19   ;;  %s2995_s18 = sphi %s3068_s18, %s5482_s18   ;;  %s2991_s17 = sphi %s3066_s17, %s5481_s17  }
   0x7   : > { %s3091_s23 = sadd.s32 1, %s3003_s20   ;;  %s267_s24 = sadd.s32 1, %s2999_s19 }
   0x8   : > { %s264_s25 = ssub.s32 %s3003_s20, %s3091_s23  ;;  %p277_p0 = scmp.ne.s32.totalorder %s2999_s19, %s2995_s18 }
   0x9   : > { %p265_p1 = scmp.eq.s32.totalorder %s264_s25, 0  ;;  %p278_p2 = scmp.eq.s32.totalorder %s3087_s21, 1 }
   0xa   : > { %p283_p3 = scmp.ne.s32.totalorder %s2995_s18, %s2991_s17  ;;  %p284_p4 = scmp.eq.s32.totalorder %s2888_s22, 1 }
   0xb   : > { %s3102_s26 = scalar_select %p265_p1, %s2999_s19, %s267_s24  }
   0xc   : > { %p3104_p5 = por %p278_p2, %p277_p0  ;;  %p3108_p6 = por %p284_p4, %p283_p3 }
   0xd   : > { %p2891_p7 = scmp.ge.s32.totalorder %s3003_s20, 1  ;;  %p340_p8 = scmp.lt.s32.totalorder %s3003_s20, 3 }
   0xf   : > { %p341_p9 = pnand %p2891_p7, %p340_p8 }
  0x10   : > { %p379_p10 = scmp.lt.s32.totalorder (!%p341_p9), %s3087_s21, 1  ;;  %s5479_s0 = sld [smem:[#allocation5_spill]] (!%p341_p9) }
  0x11   : > { %344 = sbr.rel (%p341_p9) target bundleno = 974 (0x3ce), region = 64  ;;  %s5480_s1 = sld [smem:[#allocation6_spill]] (!%p341_p9) }
  0x12   : > { %s377_s22 = sand.u32 (!%p341_p9), 1, %s2995_s18   ;;  %s2961_s25 = scalar_lea.hbm (!%p341_p9), %s5474_s11, 2 }
  0x13   : > { %s378_s13 = scalar_lea.vmem (!%p341_p9), [#allocation2], %s377_s22  ;;  %s2821_s16 = scalar_lea.sflag (!%p341_p9), [#allocation3], %s377_s22 }
  0x16   : > { %v3005_v0 = vmov 0   ;;  %s380_s29 = scalar_select %p379_p10, %s3087_s21, 1  ;;  %vm467_vm0 = vcmask 1046528   ;;  %vm516_vm1 = vcmask 1045504   ;;  %vm565_vm2 = vcmask 1044480   ;;  %v1080_v40 = vld [vmem:[%s5466_s3 + $0xf0] sm:$0xff] }
  0x17   : > { %2938 = vset.pattern.permute.xlu1 %v3005_v0  ;;  %2937 = vset.pattern.permute.xlu0 %v3005_v0  ;;  %v392_v9 = vld [vmem:[%s5480_s1] sm:$0x1f]  ;;  %vm614_vm3 = vcmask 1043456   ;;  %v1112_v41 = vld [vmem:[%s5466_s3 + $0x1f0] sm:$0xff]  ;;  %v1081_v44 = vld [vmem:[%s5466_s3 + $0xf8] sm:$0xff]  ;;  %vm718_vm4 = vcmask 1041408  }
  0x18   : > { %2939 = vset.pattern.permute.xlu2 %v3005_v0  ;;  %s2896_s30 = sshll.u32 %s380_s29, 6  ;;  %v3122_v11 = vperm.slane %v392_v9, 1  ;;  %v3124_v12 = vperm.slane %v392_v9, 2  ;;  %v3129_v14 = vperm.slane %v392_v9, 3  ;;  %v3134_v16 = vperm.slane %v392_v9, 4  ;;  %v1144_v42 = vld [vmem:[%s5466_s3 + $0x2f0] sm:$0xff]  ;;  %1152 = vmatpush.msra.mxu0 %v1080_v40  ;;  %s2829_s29 = scalar_lea.hbm %s5474_s11, %s3087_s21 }
  0x19   : > { %s383_s14 = scalar_lea.vmem %s5479_s0, %s2896_s30  ;;  %v3139_v18 = vperm.slane %v392_v9, 0  ;;  %1181 = vmatpush.msra.mxu1 %v1112_v41  ;;  %1210 = vmatpush.msra.mxu2 %v1144_v42  ;;  %v1078_v45 = vld [vmem:[%s5466_s3 + $0xe0] sm:$0xff]  ;;  %v1079_v50 = vld [vmem:[%s5466_s3 + $0xe8] sm:$0xff]  ;;  %v1076_v51 = vld [vmem:[%s5466_s3 + $0xd0] sm:$0xff]  ;;  %vm957_vm5 = vcmask 1041409   ;;  %vm959_vm6 = vcmask 1042434  }
  0x1a   : > { %v386_v1 = vld [vmem:[%s383_s14 + $0x10] sm:$0xff]  ;;  %v384_v2 = vld [vmem:[%s383_s14] sm:$0xff]  ;;  %v387_v4 = vld [vmem:[%s383_s14 + $0x18] sm:$0xff]  ;;  %1239 = vmatpush.msra.mxu3 %v1081_v44  ;;  %1153 = vmatpush.msra.mxu0 %v1078_v45  ;;  %vm961_vm7 = vcmask 1043459   ;;  %vm963_vm8 = vcmask 1044484   ;;  %vm965_vm9 = vcmask 1045509  }
  0x1b   : > { %405 = vperm.xlu1 %2938, %v386_v1   ;;  %395 = vperm.xlu0 %2937, %v384_v2   ;;  %v388_v3 = vld [vmem:[%s383_s14 + $0x20] sm:$0xff]  ;;  %v385_v5 = vld [vmem:[%s383_s14 + $0x8] sm:$0xff]  ;;  %v391_v7 = vld [vmem:[%s383_s14 + $0x38] sm:$0xff]  ;;  %vm967_vm10 = vcmask 1046534   ;;  %vm969_vm11 = vcmask 1047559   ;;  %vm1347_vm12 = vcmask 1043458  }
  0x1c   : > { %415 = vperm.xlu2 %2939, %v388_v3   ;;  %v389_v6 = vld [vmem:[%s383_s14 + $0x28] sm:$0xff]  ;;  %v390_v8 = vld [vmem:[%s383_s14 + $0x30] sm:$0xff]  ;;  %v1110_v46 = vld [vmem:[%s5466_s3 + $0x1e0] sm:$0xff]  ;;  %1240 = vmatpush.msra.mxu3 %v1079_v50  ;;  %vm1350_vm13 = vcmask 1045508   ;;  %s2831_s14 = sshll.u32 %s378_s13, 4  ;;  %s2833_s15 = sshll.u32 %s2829_s29, 4  ;;  %s2832_s14 = int_to_ptr.vmem [resolvable:$true] %s2831_s14  ;;  %s2834_s15 = int_to_ptr.hbm [resolvable:$true] %s2833_s15 }
  0x1d   : > { %v1142_v47 = vld [vmem:[%s5466_s3 + $0x2e0] sm:$0xff]  ;;  %1182 = vmatpush.msra.mxu1 %v1110_v46  ;;  %v1108_v52 = vld [vmem:[%s5466_s3 + $0x1d0] sm:$0xff]  ;;  %1154 = vmatpush.msra.mxu0 %v1076_v51  ;;  %v1077_v56 = vld [vmem:[%s5466_s3 + $0xd8] sm:$0xff]  ;;  %s2955_s0 = sshra.s32 %s2834_s15, 4  ;;  %s2956_s0 = int_to_ptr.hbm [resolvable:$true] %s2955_s0 }
  0x1e   : > { %v3215_v48 = vld [vmem:[%s5465_s2] ss:$0 sm:$0xff]  ;;  %1211 = vmatpush.msra.mxu2 %v1142_v47  ;;  %v1140_v53 = vld [vmem:[%s5466_s3 + $0x2d0] sm:$0xff]  ;;  %1241 = vmatpush.msra.mxu3 %v1077_v56  ;;  %v1075_v62 = vld [vmem:[%s5466_s3 + $0xc8] sm:$0xff]  ;;  %s2957_s1 = scalar_lea.hbm %s2956_s0, 1  ;;  %p2962_p0 = scmp.lt.s32.totalorder %s2956_s0, %s5474_s11 }
  0x1f   : > { %1183 = vmatpush.msra.mxu1 %v1108_v52  ;;  %v1074_v57 = vld [vmem:[%s5466_s3 + $0xc0] sm:$0xff]  ;;  %v1072_v2 = vld [vmem:[%s5466_s3 + $0xb0] sm:$0xff]  ;;  %v1069_v52 = vld [vmem:[%s5466_s3 + $0x98] sm:$0xff]  ;;  %p2958_p11 = scmp.ne.s32.totalorder %s2956_s0, %s2957_s1  ;;  %p2963_p1 = scmp.lt.s32.totalorder %s2961_s25, %s2957_s1 }
  0x20   : > { %1212 = vmatpush.msra.mxu2 %v1140_v53  ;;  %v1106_v58 = vld [vmem:[%s5466_s3 + $0x1c0] sm:$0xff]  ;;  %1155 = vmatpush.msra.mxu0 %v1074_v57  ;;  %v1104_v3 = vld [vmem:[%s5466_s3 + $0x1b0] sm:$0xff] }
  0x21   : > { %v1138_v59 = vld [vmem:[%s5466_s3 + $0x2c0] sm:$0xff]  ;;  %1184 = vmatpush.msra.mxu1 %v1106_v58  ;;  %1242 = vmatpush.msra.mxu3 %v1075_v62  ;;  %v1132_v51 = vld [vmem:[%s5466_s3 + $0x290] sm:$0xff]  ;;  %p2959_p12 = pnand %p2958_p11, %p3104_p5  ;;  %p2964_p2 = por %p2963_p1, %p2962_p0 }
  0x22   : > { %1213 = vmatpush.msra.mxu2 %v1138_v59  ;;  %1156 = vmatpush.msra.mxu0 %v1072_v2  ;;  %v1066_v57 = vld [vmem:[%s5466_s3 + $0x80] sm:$0xff] }
  0x23   : > { %410 = vperm.xlu1 %2938, %v387_v4   ;;  %400 = vperm.xlu0 %2937, %v385_v5   ;;  %v1136_v4 = vld [vmem:[%s5466_s3 + $0x2b0] sm:$0xff]  ;;  %v1098_v58 = vld [vmem:[%s5466_s3 + $0x180] sm:$0xff]  ;;  %p2960_p13 = pneg %p2959_p12 }
  0x24   : > { %420 = vperm.xlu2 %2939, %v389_v6   ;;  %1185 = vmatpush.msra.mxu1 %v1104_v3  ;;  %v1130_v2 = vld [vmem:[%s5466_s3 + $0x280] sm:$0xff] }
  0x25   : > { %1214 = vmatpush.msra.mxu2 %v1136_v4  ;;  %p2965_p3 = pnand %p2964_p2, %p2960_p13 }
  0x2b   : > { %430 = vperm.xlu1 %2938, %v391_v7   ;;  %425 = vperm.xlu0 %2937, %v390_v8   ;;  %v1073_v8 = vld [vmem:[%s5466_s3 + $0xb8] sm:$0xff] }
  0x2c   : > { %1243 = vmatpush.msra.mxu3 %v1073_v8  ;;  %v1067_v8 = vld [vmem:[%s5466_s3 + $0x88] sm:$0xff] }
  0x76   : > { %v416_v10 = vpop.permute.xlu2 %415 }
  0x77   : > { %v3127_v13 = vmul.f32 %v3122_v11, %v416_v10  ;;  %v3132_v15 = vmul.f32 %v3124_v12, %v416_v10  ;;  %v3137_v17 = vmul.f32 %v3129_v14, %v416_v10  ;;  %v3143_v20 = vmul.f32 %v3134_v16, %v416_v10 }
  0x78   : > { %v438_v26 = vmul.f32 %v3139_v18, %v416_v10  ;;  %v1070_v10 = vld [vmem:[%s5466_s3 + $0xa0] sm:$0xff] }
  0x79   : > { %v475_v19 = vrot.slane %v3127_v13, 1  ;;  %v524_v22 = vrot.slane %v3132_v15, 2  ;;  %v573_v28 = vrot.slane %v3137_v17, 3  ;;  %v622_v32 = vrot.slane %v3143_v20, 4  ;;  %1157 = vmatpush.msra.mxu0 %v1070_v10 }
  0x7e   : > { %v3145_v21 = vpop.permute.xlu2 %420 }
  0x7f   : > { %v3150_v23 = vmul.f32 %v3122_v11, %v3145_v21  ;;  %v3154_v24 = vmul.f32 %v3124_v12, %v3145_v21  ;;  %v3158_v25 = vmul.f32 %v3129_v14, %v3145_v21  ;;  %v3163_v27 = vmul.f32 %v3134_v16, %v3145_v21 }
  0x81   : > { %v477_v29 = vrot.slane %v3150_v23, 1  ;;  %v526_v30 = vrot.slane %v3154_v24, 2  ;;  %v575_v31 = vrot.slane %v3158_v25, 3  ;;  %v624_v35 = vrot.slane %v3163_v27, 4  ;;  %v1051_v27 = vld [vmem:[%s5466_s3 + $0x8] sm:$0xff] }
  0x83   : > { %v478_v33 = vsel %vm467_vm0, %v475_v19, %v477_v29  ;;  %v527_v34 = vsel %vm516_vm1, %v524_v22, %v526_v30  ;;  %v576_v37 = vsel %vm565_vm2, %v573_v28, %v575_v31  ;;  %v625_v39 = vsel %vm614_vm3, %v622_v32, %v624_v35 }
  0x84   : > { %v495_v36 = vadd.f32 %v478_v33, %v438_v26  ;;  %v1102_v26 = vld [vmem:[%s5466_s3 + $0x1a0] sm:$0xff] }
  0x85   : > { %v1134_v33 = vld [vmem:[%s5466_s3 + $0x2a0] sm:$0xff]  ;;  %1186 = vmatpush.msra.mxu1 %v1102_v26 }
  0x86   : > { %v544_v38 = vadd.f32 %v527_v34, %v495_v36  ;;  %1215 = vmatpush.msra.mxu2 %v1134_v33 }
  0x88   : > { %v593_v43 = vadd.f32 %v576_v37, %v544_v38  ;;  %v3296_v37 = vmul.f32 %v3139_v18, %v3145_v21  ;;  %v1071_v38 = vld [vmem:[%s5466_s3 + $0xa8] sm:$0xff]  ;;  %v1068_v21 = vld [vmem:[%s5466_s3 + $0x90] sm:$0xff]  ;;  %1216 = vmatpush.msra.mxu2 %v1132_v51 }
  0x89   : > { %1244 = vmatpush.msra.mxu3 %v1071_v38  ;;  %1158 = vmatpush.msra.mxu0 %v1068_v21  ;;  %v1064_v21 = vld [vmem:[%s5466_s3 + $0x70] sm:$0xff] }
  0x8a   : > { %v642_v49 = vadd.f32 %v625_v39, %v593_v43  ;;  %v1100_v43 = vld [vmem:[%s5466_s3 + $0x190] sm:$0xff]  ;;  %1217 = vmatpush.msra.mxu2 %v1130_v2 }
  0x8b   : > { %1187 = vmatpush.msra.mxu1 %v1100_v43  ;;  %1245 = vmatpush.msra.mxu3 %v1069_v52 }
  0x8c   : > { %v654_v61 = vadd.f32 %v3215_v48, %v642_v49  ;;  %1159 = vmatpush.msra.mxu0 %v1066_v57 }
  0x8d   : > { %v406_v54 = vpop.permute.xlu1 %405  ;;  %v396_v55 = vpop.permute.xlu0 %395  ;;  %1188 = vmatpush.msra.mxu1 %v1098_v58  ;;  %1246 = vmatpush.msra.mxu3 %v1067_v8 }
  0x8e   : > { %v3242_v60 = vmul.f32 %v3122_v11, %v406_v54  ;;  %v3249_v63 = vmul.f32 %v3124_v12, %v406_v54  ;;  %v3252_v0 = vmul.f32 %v3129_v14, %v406_v54  ;;  %v3255_v1 = vmul.f32 %v3134_v16, %v406_v54  ;;  %1160 = vmatpush.msra.mxu0 %v1064_v21  ;;  %v1060_v21 = vld [vmem:[%s5466_s3 + $0x50] sm:$0xff] }
  0x8f   : > { %v3267_v5 = vmul.f32 %v3122_v11, %v396_v55  ;;  %v3270_v6 = vmul.f32 %v3124_v12, %v396_v55  ;;  %v3273_v7 = vmul.f32 %v3129_v14, %v396_v55  ;;  %v3279_v9 = vmul.f32 %v3134_v16, %v396_v55 }
  0x90   : > { %v436_v34 = vmul.f32 %v3139_v18, %v406_v54  ;;  %v3292_v36 = vmul.f32 %v3139_v18, %v396_v55  ;;  %v471_v39 = vrot.slane %v3242_v60, 1  ;;  %v520_v40 = vrot.slane %v3249_v63, 2  ;;  %v1063_v63 = vld [vmem:[%s5466_s3 + $0x68] sm:$0xff] }
  0x91   : > { %v569_v41 = vrot.slane %v3252_v0, 3  ;;  %v618_v42 = vrot.slane %v3255_v1, 4  ;;  %v468_v44 = vrot.slane %v3267_v5, 1  ;;  %v517_v45 = vrot.slane %v3270_v6, 2  ;;  %v1092_v0 = vld [vmem:[%s5466_s3 + $0x150] sm:$0xff]  ;;  %v1058_v1 = vld [vmem:[%s5466_s3 + $0x40] sm:$0xff] }
  0x92   : > { %v566_v46 = vrot.slane %v3273_v7, 3  ;;  %v3314_v47 = vmax.f32 %v654_v61, 0.0  ;;  %v615_v53 = vrot.slane %v3279_v9, 4  ;;  %v1124_v7 = vld [vmem:[%s5466_s3 + $0x250] sm:$0xff] }
  0x95   : > { %v411_v49 = vpop.permute.xlu1 %410  ;;  %v401_v50 = vpop.permute.xlu0 %400 }
  0x96   : > { %v454_v54 = vmul.f32 %v3122_v11, %v411_v49  ;;  %v503_v55 = vmul.f32 %v3124_v12, %v411_v49  ;;  %v552_v56 = vmul.f32 %v3129_v14, %v411_v49  ;;  %v437_v59 = vmul.f32 %v3139_v18, %v411_v49 }
  0x97   : > { %v601_v60 = vmul.f32 %v3134_v16, %v411_v49  ;;  %v452_v61 = vmul.f32 %v3122_v11, %v401_v50  ;;  %v501_v62 = vmul.f32 %v3124_v12, %v401_v50  ;;  %v435_v6 = vmul.f32 %v3139_v18, %v401_v50 }
  0x98   : > { %v473_v3 = vrot.slane %v454_v54, 1  ;;  %v522_v4 = vrot.slane %v503_v55, 2  ;;  %v571_v5 = vrot.slane %v552_v56, 3  ;;  %v550_v38 = vmul.f32 %v3129_v14, %v401_v50  ;;  %v1096_v54 = vld [vmem:[%s5466_s3 + $0x170] sm:$0xff] }
  0x99   : > { %v620_v10 = vrot.slane %v601_v60, 4  ;;  %v469_v26 = vrot.slane %v452_v61, 1  ;;  %v518_v33 = vrot.slane %v501_v62, 2  ;;  %v599_v52 = vmul.f32 %v3134_v16, %v401_v50  ;;  %v1065_v50 = vld [vmem:[%s5466_s3 + $0x78] sm:$0xff]  ;;  %1189 = vmatpush.msra.mxu1 %v1096_v54 }
  0x9a   : > { %v474_v43 = vsel %vm467_vm0, %v471_v39, %v473_v3  ;;  %v476_v49 = vsel %vm467_vm0, %v473_v3, %v475_v19  ;;  %v523_v51 = vsel %vm516_vm1, %v520_v40, %v522_v4  ;;  %v525_v57 = vsel %vm516_vm1, %v522_v4, %v524_v22  ;;  %v1128_v19 = vld [vmem:[%s5466_s3 + $0x270] sm:$0xff]  ;;  %1247 = vmatpush.msra.mxu3 %v1065_v50 }
  0x9b   : > { %v493_v55 = vadd.f32 %v474_v43, %v436_v34  ;;  %v494_v56 = vadd.f32 %v476_v49, %v437_v59  ;;  %v572_v13 = vsel %vm565_vm2, %v569_v41, %v571_v5  ;;  %v574_v34 = vsel %vm565_vm2, %v571_v5, %v573_v28  ;;  %v1062_v59 = vld [vmem:[%s5466_s3 + $0x60] sm:$0xff]  ;;  %1218 = vmatpush.msra.mxu2 %v1128_v19  ;;  %v1061_v49 = vld [vmem:[%s5466_s3 + $0x58] sm:$0xff] }
  0x9c   : > { %v621_v15 = vsel %vm614_vm3, %v618_v42, %v620_v10  ;;  %v470_v22 = vsel %vm467_vm0, %v468_v44, %v469_v26  ;;  %v472_v58 = vsel %vm467_vm0, %v469_v26, %v471_v39  ;;  %v1094_v28 = vld [vmem:[%s5466_s3 + $0x160] sm:$0xff]  ;;  %v519_v2 = vsel %vm516_vm1, %v517_v45, %v518_v33  ;;  %1161 = vmatpush.msra.mxu0 %v1062_v59 }
  0x9d   : > { %v542_v60 = vadd.f32 %v523_v51, %v493_v55  ;;  %v543_v61 = vadd.f32 %v525_v57, %v494_v56  ;;  %v491_v62 = vadd.f32 %v470_v22, %v3292_v36  ;;  %v492_v17 = vadd.f32 %v472_v58, %v435_v6  ;;  %v1126_v36 = vld [vmem:[%s5466_s3 + $0x260] sm:$0xff]  ;;  %v431_v26 = vpop.permute.xlu1 %430  ;;  %1190 = vmatpush.msra.mxu1 %v1094_v28  ;;  %v426_v55 = vpop.permute.xlu0 %425  ;;  %v1056_v22 = vld [vmem:[%s5466_s3 + $0x30] sm:$0xff] }
  0x9e   : > { %v521_v39 = vsel %vm516_vm1, %v518_v33, %v520_v40  ;;  %v567_v44 = vrot.slane %v550_v38, 3  ;;  %v616_v3 = vrot.slane %v599_v52, 4  ;;  %v623_v40 = vsel %vm614_vm3, %v620_v10, %v622_v32  ;;  %1219 = vmatpush.msra.mxu2 %v1126_v36  ;;  %1248 = vmatpush.msra.mxu3 %v1063_v63  ;;  %v1090_v56 = vld [vmem:[%s5466_s3 + $0x140] sm:$0xff] }
  0x9f   : > { %v591_v4 = vadd.f32 %v572_v13, %v542_v60  ;;  %v592_v5 = vadd.f32 %v574_v34, %v543_v61  ;;  %v540_v6 = vadd.f32 %v519_v2, %v491_v62  ;;  %v541_v8 = vadd.f32 %v521_v39, %v492_v17  ;;  %1162 = vmatpush.msra.mxu0 %v1060_v21  ;;  %v1122_v57 = vld [vmem:[%s5466_s3 + $0x240] sm:$0xff]  ;;  %v1088_v62 = vld [vmem:[%s5466_s3 + $0x130] sm:$0xff] }
  0xa0   : > { %v568_v45 = vsel %vm565_vm2, %v566_v46, %v567_v44  ;;  %v570_v33 = vsel %vm565_vm2, %v567_v44, %v569_v41  ;;  %v617_v38 = vsel %vm614_vm3, %v615_v53, %v616_v3  ;;  %v619_v9 = vsel %vm614_vm3, %v616_v3, %v618_v42  ;;  %1191 = vmatpush.msra.mxu1 %v1092_v0  ;;  %v1120_v17 = vld [vmem:[%s5466_s3 + $0x230] sm:$0xff]  ;;  %v1057_v3 = vld [vmem:[%s5466_s3 + $0x38] sm:$0xff]  ;;  %v1054_v36 = vld [vmem:[%s5466_s3 + $0x20] sm:$0xff] }
  0xa1   : > { %v640_v20 = vadd.f32 %v621_v15, %v591_v4  ;;  %v641_v43 = vadd.f32 %v623_v40, %v592_v5  ;;  %v589_v32 = vadd.f32 %v568_v45, %v540_v6  ;;  %v590_v10 = vadd.f32 %v570_v33, %v541_v8  ;;  %1220 = vmatpush.msra.mxu2 %v1124_v7  ;;  %v1059_v15 = vld [vmem:[%s5466_s3 + $0x48] sm:$0xff]  ;;  %v1052_v21 = vld [vmem:[%s5466_s3 + $0x10] sm:$0xff] }
  0xa2   : > { %v3420_v41 = vmul.f32 %v3122_v11, %v431_v26  ;;  %v3423_v46 = vmul.f32 %v3124_v12, %v431_v26  ;;  %v3426_v53 = vmul.f32 %v3129_v14, %v431_v26  ;;  %v441_v13 = vmul.f32 %v3139_v18, %v431_v26  ;;  %1249 = vmatpush.msra.mxu3 %v1061_v49  ;;  %v1084_v0 = vld [vmem:[%s5466_s3 + $0x110] sm:$0xff] }
  0xa3   : > { %v652_v42 = vadd.f32 %v3215_v48, %v640_v20  ;;  %v653_v51 = vadd.f32 %v3215_v48, %v641_v43  ;;  %v638_v52 = vadd.f32 %v617_v38, %v589_v32  ;;  %v639_v54 = vadd.f32 %v619_v9, %v590_v10  ;;  %1163 = vmatpush.msra.mxu0 %v1058_v1  ;;  %v1116_v7 = vld [vmem:[%s5466_s3 + $0x210] sm:$0xff]  ;;  %v1082_v1 = vld [vmem:[%s5466_s3 + $0x100] sm:$0xff] }
  0xa4   : > { %v481_v19 = vrot.slane %v3420_v41, 1  ;;  %v530_v50 = vrot.slane %v3423_v46, 2  ;;  %v3446_v34 = vmul.f32 %v3134_v16, %v431_v26  ;;  %v579_v61 = vrot.slane %v3426_v53, 3  ;;  %1192 = vmatpush.msra.mxu1 %v1090_v56  ;;  %1221 = vmatpush.msra.mxu2 %v1122_v57  ;;  %v1118_v26 = vld [vmem:[%s5466_s3 + $0x220] sm:$0xff]  ;;  %v1053_v46 = vld [vmem:[%s5466_s3 + $0x18] sm:$0xff] }
  0xa5   : > { %v3454_v58 = vmax.f32 %v652_v42, 0.0  ;;  %v650_v59 = vadd.f32 %v3215_v48, %v638_v52  ;;  %v651_v60 = vadd.f32 %v3215_v48, %v639_v54  ;;  %v3465_v28 = vmax.f32 %v653_v51, 0.0  ;;  %1250 = vmatpush.msra.mxu3 %v1059_v15  ;;  %1164 = vmatpush.msra.mxu0 %v1056_v22  ;;  %v1050_v53 = vld [vmem:[%s5466_s3] sm:$0xff] }
  0xa6   : > { %v498_v2 = vadd.f32 %v481_v19, %v441_v13  ;;  %v628_v39 = vrot.slane %v3446_v34, 4  ;;  %v457_v44 = vmul.f32 %v3122_v11, %v426_v55  ;;  %v440_v5 = vmul.f32 %v3139_v18, %v426_v55  ;;  %v1086_v11 = vld [vmem:[%s5466_s3 + $0x120] sm:$0xff]  ;;  %1193 = vmatpush.msra.mxu1 %v1088_v62  ;;  %1222 = vmatpush.msra.mxu2 %v1120_v17 }
  0xa7   : > { %v3475_v4 = vmax.f32 %v650_v59, 0.0  ;;  %v506_v6 = vmul.f32 %v3124_v12, %v426_v55  ;;  %v555_v8 = vmul.f32 %v3129_v14, %v426_v55  ;;  %v3486_v63 = vmax.f32 %v651_v60, 0.0  ;;  %v1055_v12 = vld [vmem:[%s5466_s3 + $0x28] sm:$0xff]  ;;  %1251 = vmatpush.msra.mxu3 %v1057_v3  ;;  %1165 = vmatpush.msra.mxu0 %v1054_v36  ;;  %v1114_v42 = vld [vmem:[%s5466_s3 + $0x200] sm:$0xff]  ;;  %v1113_v36 = vld [vmem:[%s5466_s3 + $0x1f8] sm:$0xff] }
  0xa8   : > { %v547_v40 = vadd.f32 %v530_v50, %v498_v2  ;;  %v479_v45 = vrot.slane %v457_v44, 1  ;;  %v604_v18 = vmul.f32 %v3134_v16, %v426_v55  ;;  %1194 = vmatpush.msra.mxu1 %v1086_v11  ;;  %1223 = vmatpush.msra.mxu2 %v1118_v26 }
  0xa9   : > { %v674_v14 = vrot.slane %v3475_v4, 2  ;;  %v528_v33 = vrot.slane %v506_v6, 2  ;;  %v577_v38 = vrot.slane %v555_v8, 3  ;;  %v675_v20 = vrot.slane %v3475_v4, 4  ;;  %1252 = vmatpush.msra.mxu3 %v1055_v12  ;;  %1166 = vmatpush.msra.mxu0 %v1052_v21 }
  0xaa   : > { %v596_v43 = vadd.f32 %v579_v61, %v547_v40  ;;  %v480_v16 = vsel %vm467_vm0, %v477_v29, %v479_v45  ;;  %v482_v32 = vsel %vm467_vm0, %v479_v45, %v481_v19  ;;  %v626_v10 = vrot.slane %v604_v18, 4  ;;  %1195 = vmatpush.msra.mxu1 %v1084_v0  ;;  %1224 = vmatpush.msra.mxu2 %v1116_v7  ;;  %v1107_v0 = vld [vmem:[%s5466_s3 + $0x1c8] sm:$0xff] }
  0xab   : > { %v496_v9 = vadd.f32 %v480_v16, %v3296_v37  ;;  %v497_v41 = vadd.f32 %v482_v32, %v440_v5  ;;  %v529_v23 = vsel %vm516_vm1, %v526_v30, %v528_v33  ;;  %v531_v29 = vsel %vm516_vm1, %v528_v33, %v530_v50  ;;  %1253 = vmatpush.msra.mxu3 %v1053_v46  ;;  %v1111_v5 = vld [vmem:[%s5466_s3 + $0x1e8] sm:$0xff] }
  0xac   : > { %v645_v49 = vadd.f32 %v628_v39, %v596_v43  ;;  %v578_v37 = vsel %vm565_vm2, %v575_v31, %v577_v38  ;;  %v580_v24 = vsel %vm565_vm2, %v577_v38, %v579_v61  ;;  %v627_v30 = vsel %vm614_vm3, %v624_v35, %v626_v10  ;;  %1167 = vmatpush.msra.mxu0 %v1050_v53  ;;  %v1139_v7 = vld [vmem:[%s5466_s3 + $0x2c8] sm:$0xff] }
  0xad   : > { %v545_v51 = vadd.f32 %v529_v23, %v496_v9  ;;  %v546_v52 = vadd.f32 %v531_v29, %v497_v41  ;;  %v629_v25 = vsel %vm614_vm3, %v626_v10, %v628_v39  ;;  %v676_v31 = vrot.slane %v3475_v4, 6  ;;  %1196 = vmatpush.msra.mxu1 %v1082_v1  ;;  %1225 = vmatpush.msra.mxu2 %v1114_v42 }
  0xae   : > { %v3537_v35 = vadd.f32 %v3215_v48, %v645_v49  ;;  %v677_v54 = vrot.slane %v3486_v63, 2  ;;  %v678_v55 = vrot.slane %v3486_v63, 4  ;;  %v679_v56 = vrot.slane %v3486_v63, 6  ;;  %1254 = vmatpush.msra.mxu3 %v1051_v27  ;;  %1268 = vmatpush.msrb.mxu0 %v1113_v36 }
  0xaf   : > { %v594_v57 = vadd.f32 %v578_v37, %v545_v51  ;;  %v595_v13 = vadd.f32 %v580_v24, %v546_v52  ;;  %v719_v19 = vsel %vm718_vm4, %v3475_v4, -inf  ;;  %v726_v50 = vsel %vm718_vm4, %v674_v14, -inf  ;;  %v1145_v4 = vld [vmem:[%s5466_s3 + $0x2f8] sm:$0xff] }
  0xb0   : > { %v665_v34 = vmax.f32 %v3537_v35, 0.0  ;;  %v720_v15 = vrot.slane %v719_v19, 4  ;;  %v727_v22 = vrot.slane %v726_v50, 4  ;;  %v733_v59 = vsel %vm718_vm4, %v675_v20, -inf  ;;  %1297 = vmatpush.msrb.mxu1 %v1145_v4  ;;  %v1109_v14 = vld [vmem:[%s5466_s3 + $0x1d8] sm:$0xff]  ;;  %1269 = vmatpush.msrb.mxu0 %v1111_v5 }
  0xb1   : > { %v643_v60 = vadd.f32 %v627_v30, %v594_v57  ;;  %v644_v61 = vadd.f32 %v629_v25, %v595_v13  ;;  %v734_v62 = vrot.slane %v733_v59, 4  ;;  %v740_v17 = vsel %vm718_vm4, %v676_v31, -inf }
  0xb2   : > { %v721_v2 = vmax.f32 %v719_v19, %v720_v15  ;;  %v728_v39 = vmax.f32 %v726_v50, %v727_v22  ;;  %v741_v44 = vrot.slane %v740_v17, 4  ;;  %v747_v3 = vsel %vm718_vm4, %v3486_v63, -inf  ;;  %v1143_v63 = vld [vmem:[%s5466_s3 + $0x2e8] sm:$0xff]  ;;  %1270 = vmatpush.msrb.mxu0 %v1109_v14 }
  0xb3   : > { %v655_v6 = vadd.f32 %v3215_v48, %v643_v60  ;;  %v656_v8 = vadd.f32 %v3215_v48, %v644_v61  ;;  %v735_v11 = vmax.f32 %v733_v59, %v734_v62  ;;  %v748_v26 = vrot.slane %v747_v3, 4  ;;  %v1141_v48 = vld [vmem:[%s5466_s3 + $0x2d8] sm:$0xff]  ;;  %1298 = vmatpush.msrb.mxu1 %v1143_v63 }
  0xb4   : > { %v722_v40 = vrot.slane %v721_v2, 2  ;;  %v729_v45 = vrot.slane %v728_v39, 2  ;;  %v742_v18 = vmax.f32 %v740_v17, %v741_v44  ;;  %v754_v12 = vsel %vm718_vm4, %v677_v54, -inf  ;;  %1271 = vmatpush.msrb.mxu0 %v1107_v0 }
  0xb5   : > { %v3571_v33 = vmax.f32 %v655_v6, 0.0  ;;  %v3573_v38 = vmax.f32 %v656_v8, 0.0  ;;  %v736_v21 = vrot.slane %v735_v11, 2  ;;  %v749_v20 = vmax.f32 %v747_v3, %v748_v26  ;;  %1299 = vmatpush.msrb.mxu1 %v1141_v48 }
  0xb6   : > { %v723_v43 = vmax.f32 %v721_v2, %v722_v40  ;;  %v730_v16 = vmax.f32 %v728_v39, %v729_v45  ;;  %v743_v32 = vrot.slane %v742_v18, 2  ;;  %v755_v10 = vrot.slane %v754_v12, 4 }
  0xb7   : > { %v737_v9 = vmax.f32 %v735_v11, %v736_v21  ;;  %v750_v41 = vrot.slane %v749_v20, 2  ;;  %v761_v23 = vsel %vm718_vm4, %v678_v55, -inf  ;;  %v768_v29 = vsel %vm718_vm4, %v679_v56, -inf  ;;  %1300 = vmatpush.msrb.mxu1 %v1139_v7 }
  0xb8   : > { %v724_v46 = vrot.slane %v723_v43, 1  ;;  %v731_v53 = vrot.slane %v730_v16, 1  ;;  %v744_v49 = vmax.f32 %v742_v18, %v743_v32  ;;  %v756_v37 = vmax.f32 %v754_v12, %v755_v10 }
  0xb9   : > { %v738_v24 = vrot.slane %v737_v9, 1  ;;  %v751_v30 = vmax.f32 %v749_v20, %v750_v41  ;;  %v762_v1 = vrot.slane %v761_v23, 4  ;;  %v769_v42 = vrot.slane %v768_v29, 4 }
  0xba   : > { %v725_v51 = vmax.f32 %v723_v43, %v724_v46  ;;  %v732_v52 = vmax.f32 %v730_v16, %v731_v53  ;;  %v745_v25 = vrot.slane %v744_v49, 1  ;;  %v757_v27 = vrot.slane %v756_v37, 2  ;;  %v1105_v53 = vld [vmem:[%s5466_s3 + $0x1b8] sm:$0xff] }
  0xbb   : > { %v739_v31 = vmax.f32 %v737_v9, %v738_v24  ;;  %v752_v54 = vrot.slane %v751_v30, 1  ;;  %v763_v55 = vmax.f32 %v761_v23, %v762_v1  ;;  %v770_v56 = vmax.f32 %v768_v29, %v769_v42  ;;  %1272 = vmatpush.msrb.mxu0 %v1105_v53 }
  0xbc   : > { %v746_v57 = vmax.f32 %v744_v49, %v745_v25  ;;  %v758_v13 = vmax.f32 %v756_v37, %v757_v27  ;;  %v958_v19 = vsel %vm957_vm5, %v732_v52, %v725_v51  ;;  %v775_v44 = vsel %vm718_vm4, %v3454_v58, -inf  ;;  %v1137_v49 = vld [vmem:[%s5466_s3 + $0x2b8] sm:$0xff]  ;;  %v1103_v37 = vld [vmem:[%s5466_s3 + $0x1a8] sm:$0xff] }
  0xbd   : > { %v753_v50 = vmax.f32 %v751_v30, %v752_v54  ;;  %v764_v15 = vrot.slane %v763_v55, 2  ;;  %v771_v22 = vrot.slane %v770_v56, 2  ;;  %v960_v59 = vsel %vm959_vm6, %v739_v31, %v958_v19  ;;  %1301 = vmatpush.msrb.mxu1 %v1137_v49  ;;  %v1133_v54 = vld [vmem:[%s5466_s3 + $0x298] sm:$0xff]  ;;  %1273 = vmatpush.msrb.mxu0 %v1103_v37 }
  0xbe   : > { %v759_v60 = vrot.slane %v758_v13, 1  ;;  %v962_v17 = vsel %vm961_vm7, %v746_v57, %v960_v59  ;;  %v776_v4 = vrot.slane %v775_v44, 4  ;;  %v993_v5 = vsel %vm957_vm5, %v739_v31, %v732_v52  ;;  %v1099_v59 = vld [vmem:[%s5466_s3 + $0x188] sm:$0xff] }
  0xbf   : > { %v765_v61 = vmax.f32 %v763_v55, %v764_v15  ;;  %v772_v62 = vmax.f32 %v770_v56, %v771_v22  ;;  %v964_v39 = vsel %vm963_vm8, %v753_v50, %v962_v17  ;;  %v994_v8 = vsel %vm959_vm6, %v746_v57, %v993_v5 }
  0xc0   : > { %v760_v2 = vmax.f32 %v758_v13, %v759_v60  ;;  %v680_v11 = vrot.slane %v3454_v58, 2  ;;  %v681_v26 = vrot.slane %v3454_v58, 4  ;;  %v777_v45 = vmax.f32 %v775_v44, %v776_v4 }
  0xc1   : > { %v766_v3 = vrot.slane %v765_v61, 1  ;;  %v773_v36 = vrot.slane %v772_v62, 1  ;;  %v995_v18 = vsel %vm961_vm7, %v753_v50, %v994_v8  ;;  %v1022_v21 = vsel %vm957_vm5, %v746_v57, %v739_v31  ;;  %v1101_v31 = vld [vmem:[%s5466_s3 + $0x198] sm:$0xff] }
  0xc2   : > { %v966_v6 = vsel %vm965_vm9, %v760_v2, %v964_v39  ;;  %v996_v12 = vsel %vm963_vm8, %v760_v2, %v995_v18  ;;  %v782_v14 = vsel %vm718_vm4, %v680_v11, -inf  ;;  %v789_v48 = vsel %vm718_vm4, %v681_v26, -inf  ;;  %1274 = vmatpush.msrb.mxu0 %v1101_v31 }
  0xc3   : > { %v767_v63 = vmax.f32 %v765_v61, %v766_v3  ;;  %v774_v40 = vmax.f32 %v772_v62, %v773_v36  ;;  %v778_v43 = vrot.slane %v777_v45, 2  ;;  %v783_v32 = vrot.slane %v782_v14, 4 }
  0xc4   : > { %v790_v7 = vrot.slane %v789_v48, 4  ;;  %v1023_v9 = vsel %vm959_vm6, %v753_v50, %v1022_v21  ;;  %v682_v46 = vrot.slane %v3454_v58, 6  ;;  %v683_v1 = vrot.slane %v3465_v28, 2  ;;  %v1135_v58 = vld [vmem:[%s5466_s3 + $0x2a8] sm:$0xff]  ;;  %1275 = vmatpush.msrb.mxu0 %v1099_v59 }
  0xc5   : > { %v968_v20 = vsel %vm967_vm10, %v767_v63, %v966_v6  ;;  %v997_v16 = vsel %vm965_vm9, %v767_v63, %v996_v12  ;;  %v779_v41 = vmax.f32 %v777_v45, %v778_v43  ;;  %v784_v23 = vmax.f32 %v782_v14, %v783_v32  ;;  %1302 = vmatpush.msrb.mxu1 %v1135_v58 }
  0xc6   : > { %v970_v10 = vsel %vm969_vm11, %v774_v40, %v968_v20  ;;  %v998_v0 = vsel %vm967_vm10, %v774_v40, %v997_v16  ;;  %v1024_v29 = vsel %vm961_vm7, %v760_v2, %v1023_v9  ;;  %v791_v24 = vmax.f32 %v789_v48, %v790_v7 }
  0xc7   : > { %1168 = vmatmul.f32.vlgmr.msra.gmra.mxu0 %v970_v10  ;;  %1255 = vmatmul.f32.vlgmr.msra.gmra.mxu3 %v970_v10  ;;  %v1025_v30 = vsel %vm963_vm8, %v767_v63, %v1024_v29  ;;  %v684_v42 = vrot.slane %v3465_v28, 4  ;;  %v780_v51 = vrot.slane %v779_v41, 1  ;;  %v785_v52 = vrot.slane %v784_v23, 2 }
  0xc8   : > { %v1026_v25 = vsel %vm965_vm9, %v774_v40, %v1025_v30  ;;  %v685_v27 = vrot.slane %v3465_v28, 6  ;;  %v792_v55 = vrot.slane %v791_v24, 2  ;;  %v796_v56 = vsel %vm718_vm4, %v682_v46, -inf  ;;  %1303 = vmatpush.msrb.mxu1 %v1133_v54 }
  0xc9   : > { %v803_v57 = vsel %vm718_vm4, %v3465_v28, -inf  ;;  %v810_v13 = vsel %vm718_vm4, %v683_v1, -inf  ;;  %v781_v19 = vmax.f32 %v779_v41, %v780_v51  ;;  %v786_v50 = vmax.f32 %v784_v23, %v785_v52  ;;  %v1131_v28 = vld [vmem:[%s5466_s3 + $0x288] sm:$0xff] }
  0xca   : > { %v797_v15 = vrot.slane %v796_v56, 4  ;;  %v804_v22 = vrot.slane %v803_v57, 4  ;;  %v793_v60 = vmax.f32 %v791_v24, %v792_v55  ;;  %v811_v61 = vrot.slane %v810_v13, 4  ;;  %1304 = vmatpush.msrb.mxu1 %v1131_v28 }
  0xcb   : > { %v817_v62 = vsel %vm718_vm4, %v684_v42, -inf  ;;  %v824_v17 = vsel %vm718_vm4, %v685_v27, -inf  ;;  %v3642_v2 = vsel %vm969_vm11, %v781_v19, %v998_v0  ;;  %v787_v39 = vrot.slane %v786_v50, 1 }
  0xcc   : > { %v1027_v44 = vsel %vm967_vm10, %v781_v19, %v1026_v25  ;;  %v798_v3 = vmax.f32 %v796_v56, %v797_v15  ;;  %1197 = vmatmul.f32.vlgmr.msra.gmra.mxu1 %v3642_v2  ;;  %v794_v36 = vrot.slane %v793_v60, 1  ;;  %v805_v4 = vmax.f32 %v803_v57, %v804_v22 }
  0xcd   : > { %v812_v5 = vmax.f32 %v810_v13, %v811_v61  ;;  %v818_v6 = vrot.slane %v817_v62, 4  ;;  %v788_v8 = vmax.f32 %v786_v50, %v787_v39  ;;  %v825_v26 = vrot.slane %v824_v17, 4  ;;  %v1097_v13 = vld [vmem:[%s5466_s3 + $0x178] sm:$0xff]  ;;  %v1095_v50 = vld [vmem:[%s5466_s3 + $0x168] sm:$0xff] }
  0xce   : > { %v799_v11 = vrot.slane %v798_v3, 2  ;;  %v831_v63 = vsel %vm718_vm4, %v3314_v47, -inf  ;;  %v795_v40 = vmax.f32 %v793_v60, %v794_v36  ;;  %v806_v45 = vrot.slane %v805_v4, 2  ;;  %1276 = vmatpush.msrb.mxu0 %v1097_v13  ;;  %v1127_v39 = vld [vmem:[%s5466_s3 + $0x268] sm:$0xff] }
  0xcf   : > { %v813_v18 = vrot.slane %v812_v5, 2  ;;  %v819_v12 = vmax.f32 %v817_v62, %v818_v6  ;;  %v971_v14 = vsel %vm957_vm5, %v788_v8, %v781_v19  ;;  %v3650_v48 = vsel %vm969_vm11, %v788_v8, %v1027_v44  ;;  %v1129_v19 = vld [vmem:[%s5466_s3 + $0x278] sm:$0xff]  ;;  %v1119_v13 = vld [vmem:[%s5466_s3 + $0x228] sm:$0xff] }
  0xd0   : > { %v800_v21 = vmax.f32 %v798_v3, %v799_v11  ;;  %v826_v20 = vmax.f32 %v824_v17, %v825_v26  ;;  %v1000_v43 = vsel %vm957_vm5, %v795_v40, %v788_v8  ;;  %1226 = vmatmul.f32.vlgmr.msra.gmra.mxu2 %v3650_v48  ;;  %v807_v16 = vmax.f32 %v805_v4, %v806_v45  ;;  %v1093_v44 = vld [vmem:[%s5466_s3 + $0x158] sm:$0xff]  ;;  %v1091_v45 = vld [vmem:[%s5466_s3 + $0x148] sm:$0xff] }
  0xd1   : > { %v814_v32 = vmax.f32 %v812_v5, %v813_v18  ;;  %v820_v10 = vrot.slane %v819_v12, 2  ;;  %v972_v9 = vsel %vm959_vm6, %v795_v40, %v971_v14  ;;  %v832_v41 = vrot.slane %v831_v63, 4  ;;  %1305 = vmatpush.msrb.mxu1 %v1129_v19  ;;  %1277 = vmatpush.msrb.mxu0 %v1095_v50 }
  0xd2   : > { %v801_v0 = vrot.slane %v800_v21, 1  ;;  %v827_v7 = vrot.slane %v826_v20, 2  ;;  %v808_v23 = vrot.slane %v807_v16, 1  ;;  %v686_v53 = vrot.slane %v3314_v47, 2 }
  0xd3   : > { %v815_v29 = vrot.slane %v814_v32, 1  ;;  %v821_v46 = vmax.f32 %v819_v12, %v820_v10  ;;  %v833_v24 = vmax.f32 %v831_v63, %v832_v41  ;;  %v687_v30 = vrot.slane %v3314_v47, 4  ;;  %v1125_v63 = vld [vmem:[%s5466_s3 + $0x258] sm:$0xff]  ;;  %1306 = vmatpush.msrb.mxu1 %v1127_v39  ;;  %1278 = vmatpush.msrb.mxu0 %v1093_v44 }
  0xd4   : > { %v802_v49 = vmax.f32 %v800_v21, %v801_v0  ;;  %v828_v37 = vmax.f32 %v826_v20, %v827_v7  ;;  %v809_v1 = vmax.f32 %v807_v16, %v808_v23  ;;  %v838_v51 = vsel %vm718_vm4, %v686_v53, -inf  ;;  %v1123_v16 = vld [vmem:[%s5466_s3 + $0x248] sm:$0xff] }
  0xd5   : > { %v816_v42 = vmax.f32 %v814_v32, %v815_v29  ;;  %v822_v58 = vrot.slane %v821_v46, 1  ;;  %v834_v27 = vrot.slane %v833_v24, 2  ;;  %v839_v57 = vrot.slane %v838_v51, 4  ;;  %1307 = vmatpush.msrb.mxu1 %v1125_v63  ;;  %1279 = vmatpush.msrb.mxu0 %v1091_v45 }
  0xd6   : > { %v829_v52 = vrot.slane %v828_v37, 1  ;;  %v973_v25 = vsel %vm961_vm7, %v802_v49, %v972_v9  ;;  %v1001_v31 = vsel %vm959_vm6, %v802_v49, %v1000_v43  ;;  %v845_v28 = vsel %vm718_vm4, %v687_v30, -inf }
  0xd7   : > { %v823_v54 = vmax.f32 %v821_v46, %v822_v58  ;;  %v974_v55 = vsel %vm963_vm8, %v809_v1, %v973_v25  ;;  %v1002_v56 = vsel %vm961_vm7, %v809_v1, %v1001_v31  ;;  %v835_v59 = vmax.f32 %v833_v24, %v834_v27  ;;  %1308 = vmatpush.msrb.mxu1 %v1123_v16  ;;  %v1121_v27 = vld [vmem:[%s5466_s3 + $0x238] sm:$0xff]  ;;  %v1087_v31 = vld [vmem:[%s5466_s3 + $0x128] sm:$0xff] }
  0xd8   : > { %v830_v15 = vmax.f32 %v828_v37, %v829_v52  ;;  %v975_v22 = vsel %vm965_vm9, %v816_v42, %v974_v55  ;;  %v1003_v60 = vsel %vm963_vm8, %v816_v42, %v1002_v56  ;;  %v840_v17 = vmax.f32 %v838_v51, %v839_v57 }
  0xd9   : > { %v976_v61 = vsel %vm967_vm10, %v823_v54, %v975_v22  ;;  %v1004_v62 = vsel %vm965_vm9, %v823_v54, %v1003_v60  ;;  %v836_v36 = vrot.slane %v835_v59, 1  ;;  %v846_v5 = vrot.slane %v845_v28, 4  ;;  %1309 = vmatpush.msrb.mxu1 %v1121_v27  ;;  %v1117_v60 = vld [vmem:[%s5466_s3 + $0x218] sm:$0xff] }
  0xda   : > { %v977_v3 = vsel %vm969_vm11, %v830_v15, %v976_v61  ;;  %v1005_v4 = vsel %vm967_vm10, %v830_v15, %v1004_v62  ;;  %v841_v6 = vrot.slane %v840_v17, 2  ;;  %v1029_v8 = vsel %vm957_vm5, %v802_v49, %v795_v40 }
  0xdb   : > { %1171 = vmatmul.f32.gmra.mxu0 %v977_v3  ;;  %1258 = vmatmul.f32.gmra.mxu3 %v977_v3  ;;  %v688_v11 = vrot.slane %v3314_v47, 6  ;;  %v689_v26 = vrot.slane %v3571_v33, 2  ;;  %v837_v18 = vmax.f32 %v835_v59, %v836_v36  ;;  %v847_v12 = vmax.f32 %v845_v28, %v846_v5  ;;  %v1085_v59 = vld [vmem:[%s5466_s3 + $0x118] sm:$0xff]  ;;  %v1115_v5 = vld [vmem:[%s5466_s3 + $0x208] sm:$0xff] }
  0xdc   : > { %v1030_v14 = vsel %vm959_vm6, %v809_v1, %v1029_v8  ;;  %v690_v21 = vrot.slane %v3571_v33, 4  ;;  %v842_v40 = vmax.f32 %v840_v17, %v841_v6  ;;  %v691_v20 = vrot.slane %v3571_v33, 6  ;;  %1310 = vmatpush.msrb.mxu1 %v1119_v13 }
  0xdd   : > { %v1031_v47 = vsel %vm961_vm7, %v816_v42, %v1030_v14  ;;  %v852_v43 = vsel %vm718_vm4, %v688_v11, -inf  ;;  %v3702_v32 = vsel %vm969_vm11, %v837_v18, %v1005_v4  ;;  %v848_v10 = vrot.slane %v847_v12, 2  ;;  %v1083_v4 = vld [vmem:[%s5466_s3 + $0x108] sm:$0xff] }
  0xde   : > { %v1032_v0 = vsel %vm963_vm8, %v823_v54, %v1031_v47  ;;  %v853_v7 = vrot.slane %v852_v43, 4  ;;  %1200 = vmatmul.f32.gmra.mxu1 %v3702_v32  ;;  %v843_v9 = vrot.slane %v842_v40, 1  ;;  %v859_v23 = vsel %vm718_vm4, %v3571_v33, -inf  ;;  %v1089_v33 = vld [vmem:[%s5466_s3 + $0x138] sm:$0xff] }
  0xdf   : > { %v1033_v41 = vsel %vm965_vm9, %v830_v15, %v1032_v0  ;;  %v866_v29 = vsel %vm718_vm4, %v689_v26, -inf  ;;  %v849_v46 = vmax.f32 %v847_v12, %v848_v10  ;;  %v860_v37 = vrot.slane %v859_v23, 4  ;;  %1280 = vmatpush.msrb.mxu0 %v1089_v33  ;;  %1311 = vmatpush.msrb.mxu1 %v1117_v60 }
  0xe0   : > { %v1034_v53 = vsel %vm967_vm10, %v837_v18, %v1033_v41  ;;  %v854_v49 = vmax.f32 %v852_v43, %v853_v7  ;;  %v844_v24 = vmax.f32 %v842_v40, %v843_v9  ;;  %v867_v30 = vrot.slane %v866_v29, 4 }
  0xe1   : > { %v873_v1 = vsel %vm718_vm4, %v690_v21, -inf  ;;  %v880_v42 = vsel %vm718_vm4, %v691_v20, -inf  ;;  %v850_v58 = vrot.slane %v849_v46, 1  ;;  %v861_v52 = vmax.f32 %v859_v23, %v860_v37  ;;  %1281 = vmatpush.msrb.mxu0 %v1087_v31  ;;  %1312 = vmatpush.msrb.mxu1 %v1115_v5 }
  0xe2   : > { %v855_v51 = vrot.slane %v854_v49, 2  ;;  %v874_v25 = vrot.slane %v873_v1, 4  ;;  %v978_v54 = vsel %vm957_vm5, %v844_v24, %v837_v18  ;;  %v3724_v55 = vsel %vm969_vm11, %v844_v24, %v1034_v53 }
  0xe3   : > { %v868_v56 = vmax.f32 %v866_v29, %v867_v30  ;;  %v881_v57 = vrot.slane %v880_v42, 4  ;;  %v851_v19 = vmax.f32 %v849_v46, %v850_v58  ;;  %1229 = vmatmul.f32.gmra.mxu2 %v3724_v55  ;;  %v862_v15 = vrot.slane %v861_v52, 2  ;;  %1282 = vmatpush.msrb.mxu0 %v1085_v59 }
  0xe4   : > { %v856_v50 = vmax.f32 %v854_v49, %v855_v51  ;;  %v875_v22 = vmax.f32 %v873_v1, %v874_v25  ;;  %v887_v17 = vsel %vm718_vm4, %v3573_v38, -inf  ;;  %v692_v28 = vrot.slane %v3573_v38, 2 }
  0xe5   : > { %v869_v61 = vrot.slane %v868_v56, 2  ;;  %v882_v62 = vmax.f32 %v880_v42, %v881_v57  ;;  %v1007_v39 = vsel %vm957_vm5, %v851_v19, %v844_v24  ;;  %v863_v3 = vmax.f32 %v861_v52, %v862_v15  ;;  %1283 = vmatpush.msrb.mxu0 %v1083_v4 }
  0xe6   : > { %v857_v44 = vrot.slane %v856_v50, 1  ;;  %v876_v36 = vrot.slane %v875_v22, 2  ;;  %v979_v11 = vsel %vm959_vm6, %v851_v19, %v978_v54  ;;  %v888_v26 = vrot.slane %v887_v17, 4 }
  0xe7   : > { %v870_v6 = vmax.f32 %v868_v56, %v869_v61  ;;  %v883_v8 = vrot.slane %v882_v62, 2  ;;  %v864_v45 = vrot.slane %v863_v3, 1  ;;  %v894_v12 = vsel %vm718_vm4, %v692_v28, -inf }
  0xe8   : > { %v858_v63 = vmax.f32 %v856_v50, %v857_v44  ;;  %v877_v18 = vmax.f32 %v875_v22, %v876_v36  ;;  %v889_v40 = vmax.f32 %v887_v17, %v888_v26  ;;  %v895_v47 = vrot.slane %v894_v12, 4 }
  0xe9   : > { %v871_v14 = vrot.slane %v870_v6, 1  ;;  %v884_v21 = vmax.f32 %v882_v62, %v883_v8  ;;  %v865_v20 = vmax.f32 %v863_v3, %v864_v45  ;;  %v693_v56 = vrot.slane %v3573_v38, 4 }
  0xea   : > { %v878_v43 = vrot.slane %v877_v18, 1  ;;  %v980_v16 = vsel %vm961_vm7, %v858_v63, %v979_v11  ;;  %v1008_v10 = vsel %vm959_vm6, %v858_v63, %v1007_v39  ;;  %v890_v9 = vrot.slane %v889_v40, 2 }
  0xeb   : > { %v872_v0 = vmax.f32 %v870_v6, %v871_v14  ;;  %v885_v7 = vrot.slane %v884_v21, 1  ;;  %v896_v41 = vmax.f32 %v894_v12, %v895_v47  ;;  %v981_v29 = vsel %vm963_vm8, %v865_v20, %v980_v16 }
  0xec   : > { %v879_v23 = vmax.f32 %v877_v18, %v878_v43  ;;  %v1009_v46 = vsel %vm961_vm7, %v865_v20, %v1008_v10  ;;  %v1036_v53 = vsel %vm957_vm5, %v858_v63, %v851_v19  ;;  %v891_v24 = vmax.f32 %v889_v40, %v890_v9 }
  0xed   : > { %v886_v49 = vmax.f32 %v884_v21, %v885_v7  ;;  %v982_v37 = vsel %vm965_vm9, %v872_v0, %v981_v29  ;;  %v1010_v30 = vsel %vm963_vm8, %v872_v0, %v1009_v46  ;;  %v897_v58 = vrot.slane %v896_v41, 2 }
  0xee   : > { %v983_v1 = vsel %vm967_vm10, %v879_v23, %v982_v37  ;;  %v1011_v42 = vsel %vm965_vm9, %v879_v23, %v1010_v30  ;;  %v1037_v51 = vsel %vm959_vm6, %v865_v20, %v1036_v53  ;;  %v892_v25 = vrot.slane %v891_v24, 1 }
  0xef   : > { %v984_v52 = vsel %vm969_vm11, %v886_v49, %v983_v1  ;;  %v1012_v33 = vsel %vm967_vm10, %v886_v49, %v1011_v42  ;;  %v1038_v27 = vsel %vm961_vm7, %v872_v0, %v1037_v51  ;;  %v898_v31 = vmax.f32 %v896_v41, %v897_v58 }
  0xf0   : > { %1174 = vmatmul.f32.gmra.mxu0 %v984_v52  ;;  %v1039_v54 = vsel %vm963_vm8, %v879_v23, %v1038_v27  ;;  %1261 = vmatmul.f32.gmra.mxu3 %v984_v52  ;;  %v694_v57 = vrot.slane %v3573_v38, 6  ;;  %v893_v13 = vmax.f32 %v891_v24, %v892_v25  ;;  %v915_v50 = vsel %vm718_vm4, %v665_v34, -inf }
  0xf1   : > { %v1040_v19 = vsel %vm965_vm9, %v886_v49, %v1039_v54  ;;  %v695_v15 = vrot.slane %v665_v34, 2  ;;  %v899_v22 = vrot.slane %v898_v31, 1  ;;  %v901_v59 = vsel %vm718_vm4, %v693_v56, -inf  ;;  %v1801_v54 = vld [vmem:[%s5468_s5 + $0x1f0] sm:$0xff]  ;;  %v1767_v56 = vld [vmem:[%s5468_s5 + $0xe0] sm:$0xff] }
  0xf2   : > { %v908_v60 = vsel %vm718_vm4, %v694_v57, -inf  ;;  %v916_v61 = vrot.slane %v915_v50, 4  ;;  %v1013_v62 = vsel %vm969_vm11, %v893_v13, %v1012_v33  ;;  %v1041_v38 = vsel %vm967_vm10, %v893_v13, %v1040_v19  ;;  %1960 = vmatpush.msrb.mxu3 %v1801_v54  ;;  %v1799_v57 = vld [vmem:[%s5468_s5 + $0x1e0] sm:$0xff]  ;;  %v1821_v54 = vld [vmem:[%s5468_s5 + $0x290] sm:$0xff] }
  0xf3   : > { %v902_v17 = vrot.slane %v901_v59, 4  ;;  %v909_v28 = vrot.slane %v908_v60, 4  ;;  %1203 = vmatmul.f32.gmra.mxu1 %v1013_v62  ;;  %v900_v39 = vmax.f32 %v898_v31, %v899_v22  ;;  %v922_v3 = vsel %vm718_vm4, %v695_v15, -inf  ;;  %v1769_v31 = vld [vmem:[%s5468_s5 + $0xf0] sm:$0xff] }
  0xf4   : > { %v917_v44 = vmax.f32 %v915_v50, %v916_v61  ;;  %v923_v34 = vrot.slane %v922_v3, 4  ;;  %1937 = vmatpush.msrb.mxu2 %v1769_v31  ;;  %1961 = vmatpush.msrb.mxu3 %v1799_v57  ;;  %v1765_v22 = vld [vmem:[%s5468_s5 + $0xd0] sm:$0xff]  ;;  %v1783_v31 = vld [vmem:[%s5468_s5 + $0x160] sm:$0xff] }
  0xf5   : > { %v903_v36 = vmax.f32 %v901_v59, %v902_v17  ;;  %v910_v35 = vmax.f32 %v908_v60, %v909_v28  ;;  %v1042_v4 = vsel %vm969_vm11, %v900_v39, %v1041_v38  ;;  %v985_v47 = vsel %vm957_vm5, %v900_v39, %v893_v13  ;;  %v1797_v59 = vld [vmem:[%s5468_s5 + $0x1d0] sm:$0xff]  ;;  %v1763_v17 = vld [vmem:[%s5468_s5 + $0xc0] sm:$0xff] }
  0xf6   : > { %v918_v5 = vrot.slane %v917_v44, 2  ;;  %1232 = vmatmul.f32.gmra.mxu2 %v1042_v4  ;;  %v924_v11 = vmax.f32 %v922_v3, %v923_v34  ;;  %1962 = vmatpush.msrb.mxu3 %v1797_v59  ;;  %v1795_v28 = vld [vmem:[%s5468_s5 + $0x1c0] sm:$0xff]  ;;  %v1793_v34 = vld [vmem:[%s5468_s5 + $0x1b0] sm:$0xff] }
  0xf7   : > { %v904_v6 = vrot.slane %v903_v36, 2  ;;  %v911_v8 = vrot.slane %v910_v35, 2  ;;  %1938 = vmatpush.msrb.mxu2 %v1767_v56  ;;  %v1853_v57 = vld [vmem:[%s5468_s5 + $0x390] sm:$0xff] }
  0xf8   : > { %v919_v26 = vmax.f32 %v917_v44, %v918_v5  ;;  %v925_v18 = vrot.slane %v924_v11, 2  ;;  %1963 = vmatpush.msrb.mxu3 %v1795_v28  ;;  %v1863_v5 = vld [vmem:[%s5468_s5 + $0x3e0] sm:$0xff] }
  0xf9   : > { %v905_v63 = vmax.f32 %v903_v36, %v904_v6  ;;  %v912_v45 = vmax.f32 %v910_v35, %v911_v8  ;;  %1939 = vmatpush.msrb.mxu2 %v1765_v22  ;;  %v1865_v36 = vld [vmem:[%s5468_s5 + $0x3f0] sm:$0xff]  ;;  %v1759_v6 = vld [vmem:[%s5468_s5 + $0xa0] sm:$0xff] }
  0xfa   : > { %v920_v12 = vrot.slane %v919_v26, 1  ;;  %v926_v40 = vmax.f32 %v924_v11, %v925_v18  ;;  %v1761_v35 = vld [vmem:[%s5468_s5 + $0xb0] sm:$0xff]  ;;  %2006 = vmatpush.msra.mxu1 %v1865_v36  ;;  %1964 = vmatpush.msrb.mxu3 %v1793_v34  ;;  %v1791_v11 = vld [vmem:[%s5468_s5 + $0x1a0] sm:$0xff] }
  0xfb   : > { %v906_v14 = vrot.slane %v905_v63, 1  ;;  %v913_v21 = vrot.slane %v912_v45, 1  ;;  %1940 = vmatpush.msrb.mxu2 %v1763_v17  ;;  %v1757_v18 = vld [vmem:[%s5468_s5 + $0x90] sm:$0xff] }
  0xfc   : > { %v927_v16 = vrot.slane %v926_v40, 1  ;;  %v921_v10 = vmax.f32 %v919_v26, %v920_v12  ;;  %v1829_v26 = vld [vmem:[%s5468_s5 + $0x2d0] sm:$0xff]  ;;  %2007 = vmatpush.msra.mxu1 %v1863_v5  ;;  %1965 = vmatpush.msrb.mxu3 %v1791_v11 }
  0xfd   : > { %v907_v20 = vmax.f32 %v905_v63, %v906_v14  ;;  %v914_v43 = vmax.f32 %v912_v45, %v913_v21  ;;  %1941 = vmatpush.msrb.mxu2 %v1761_v35  ;;  %v1861_v63 = vld [vmem:[%s5468_s5 + $0x3d0] sm:$0xff] }
  0xfe   : > { %v928_v9 = vmax.f32 %v926_v40, %v927_v16  ;;  %v1789_v21 = vld [vmem:[%s5468_s5 + $0x190] sm:$0xff]  ;;  %v1827_v40 = vld [vmem:[%s5468_s5 + $0x2c0] sm:$0xff]  ;;  %2008 = vmatpush.msra.mxu1 %v1861_v63 }
  0xff   : > { %v986_v0 = vsel %vm959_vm6, %v907_v20, %v985_v47  ;;  %v1014_v7 = vsel %vm957_vm5, %v907_v20, %v900_v39  ;;  %v1043_v41 = vsel %vm957_vm5, %v914_v43, %v907_v20  ;;  %v1833_v39 = vld [vmem:[%s5468_s5 + $0x2f0] sm:$0xff]  ;;  %1942 = vmatpush.msrb.mxu2 %v1759_v6  ;;  %v1755_v16 = vld [vmem:[%s5468_s5 + $0x80] sm:$0xff]  ;;  %1966 = vmatpush.msrb.mxu3 %v1789_v21 }
 0x100   : > { %v987_v23 = vsel %vm961_vm7, %v914_v43, %v986_v0  ;;  %v1015_v29 = vsel %vm959_vm6, %v914_v43, %v1014_v7  ;;  %v1044_v46 = vsel %vm959_vm6, %v921_v10, %v1043_v41  ;;  %1983 = vmatpush.msra.mxu0 %v1833_v39  ;;  %v1859_v43 = vld [vmem:[%s5468_s5 + $0x3c0] sm:$0xff]  ;;  %v1825_v41 = vld [vmem:[%s5468_s5 + $0x2b0] sm:$0xff] }
 0x101   : > { %1177 = vmatmul.f32.gmra.mxu0 %v987_v23  ;;  %v1016_v53 = vsel %vm961_vm7, %v921_v10, %v1015_v29  ;;  %v1045_v49 = vsel %vm961_vm7, %v928_v9, %v1044_v46  ;;  %1264 = vmatmul.f32.gmra.mxu3 %v987_v23  ;;  %v1787_v9 = vld [vmem:[%s5468_s5 + $0x180] sm:$0xff]  ;;  %v1817_v35 = vld [vmem:[%s5468_s5 + $0x270] sm:$0xff] }
 0x102   : > { %1206 = vmatmul.f32.gmra.mxu1 %v1016_v53  ;;  %1235 = vmatmul.f32.gmra.mxu2 %v1045_v49  ;;  %v1849_v34 = vld [vmem:[%s5468_s5 + $0x370] sm:$0xff]  ;;  %v1815_v63 = vld [vmem:[%s5468_s5 + $0x260] sm:$0xff] }
 0x103   : > { %1943 = vmatpush.msrb.mxu2 %v1757_v18  ;;  %2009 = vmatpush.msra.mxu1 %v1859_v43  ;;  %v1813_v43 = vld [vmem:[%s5468_s5 + $0x250] sm:$0xff] }
 0x104   : > { %1967 = vmatpush.msrb.mxu3 %v1787_v9 }
 0x105   : > { %1944 = vmatpush.msrb.mxu2 %v1755_v16 }
 0x109   : > { %1284 = vmatmul.f32.vlgmr.msrb.gmra.mxu0 %v3642_v2  ;;  %v1146_v2 = vld [vmem:[%s5467_s4] sm:$0x3] }
 0x10a   : > { %1313 = vmatmul.f32.vlgmr.msrb.gmra.mxu1 %v3650_v48  ;;  %v3801_v33 = vperm.slane %v1146_v2, 1 }
 0x111   : > { %1287 = vmatmul.f32.gmra.mxu0 %v3702_v32  ;;  %v3798_v32 = vperm.slane %v1146_v2, 0 }
 0x112   : > { %1316 = vmatmul.f32.gmra.mxu1 %v3724_v55 }
 0x119   : > { %1290 = vmatmul.f32.gmra.mxu0 %v1013_v62 }
 0x11a   : > { %1319 = vmatmul.f32.gmra.mxu1 %v1042_v4  ;;  %v1831_v4 = vld [vmem:[%s5468_s5 + $0x2e0] sm:$0xff] }
 0x11b   : > { %1984 = vmatpush.msra.mxu0 %v1831_v4 }
 0x11d   : > { %1985 = vmatpush.msra.mxu0 %v1829_v26  ;;  %v1777_v26 = vld [vmem:[%s5468_s5 + $0x130] sm:$0xff] }
 0x11f   : > { %1986 = vmatpush.msra.mxu0 %v1827_v40 }
 0x121   : > { %1293 = vmatmul.f32.gmra.mxu0 %v1016_v53 }
 0x122   : > { %1322 = vmatmul.f32.gmra.mxu1 %v1045_v49  ;;  %v1857_v49 = vld [vmem:[%s5468_s5 + $0x3b0] sm:$0xff]  ;;  %1987 = vmatpush.msra.mxu0 %v1825_v41 }
 0x123   : > { %2010 = vmatpush.msra.mxu1 %v1857_v49  ;;  %v1845_v41 = vld [vmem:[%s5468_s5 + $0x350] sm:$0xff] }
 0x144   : > { %v1169_v37 = vpop.f32.mrf.mxu0 }
 0x145   : > { %v1170_v13 = vadd.f32 %v1169_v37, %v3798_v32  ;;  %v1753_v37 = vld [vmem:[%s5468_s5 + $0x70] sm:$0xff] }
 0x146   : > { %1945 = vmatpush.msrb.mxu2 %v1753_v37 }
 0x149   : > { %v1198_v24 = vpop.f32.mrf.mxu1 }
 0x14a   : > { %v1256_v48 = vpop.f32.mrf.mxu3  ;;  %v1199_v60 = vadd.f32 %v1198_v24, %v1170_v13 }
 0x14b   : > { %v1257_v19 = vadd.f32 %v1256_v48, %v3801_v33 }
 0x153   : > { %v1227_v55 = vpop.f32.mrf.mxu2 }
 0x154   : > { %v1228_v44 = vadd.f32 %v1227_v55, %v1199_v60  ;;  %v1855_v55 = vld [vmem:[%s5468_s5 + $0x3a0] sm:$0xff] }
 0x155   : > { %2011 = vmatpush.msra.mxu1 %v1855_v55 }
 0x156   : > { %v1326_v12 = vmax.f32 %v1228_v44, 0.0 }
 0x157   : > { %2012 = vmatpush.msra.mxu1 %v1853_v57  ;;  %v1809_v57 = vld [vmem:[%s5468_s5 + $0x230] sm:$0xff] }
 0x158   : > { %v1172_v30 = vpop.f32.mrf.mxu0 }
 0x159   : > { %v1173_v45 = vadd.f32 %v1172_v30, %v3798_v32  ;;  %v1785_v30 = vld [vmem:[%s5468_s5 + $0x170] sm:$0xff] }
 0x15a   : > { %1968 = vmatpush.msrb.mxu3 %v1785_v30  ;;  %v1843_v30 = vld [vmem:[%s5468_s5 + $0x340] sm:$0xff] }
 0x15b   : > { %v3789_v1 = vpop.f32.mrf.mxu1 }
 0x15c   : > { %v1202_v23 = vadd.f32 %v3789_v1, %v1173_v45  ;;  %v1823_v1 = vld [vmem:[%s5468_s5 + $0x2a0] sm:$0xff]  ;;  %1969 = vmatpush.msrb.mxu3 %v1783_v31 }
 0x15d   : > { %1988 = vmatpush.msra.mxu0 %v1823_v1  ;;  %v1739_v1 = vld [vmem:[%s5468_s5] sm:$0xff] }
 0x15e   : > { %v1259_v50 = vpop.f32.mrf.mxu3 }
 0x15f   : > { %v1260_v47 = vadd.f32 %v1259_v50, %v3801_v33  ;;  %v1819_v50 = vld [vmem:[%s5468_s5 + $0x280] sm:$0xff]  ;;  %1989 = vmatpush.msra.mxu0 %v1821_v54 }
 0x161   : > { %1990 = vmatpush.msra.mxu0 %v1819_v50 }
 0x163   : > { %1991 = vmatpush.msra.mxu0 %v1817_v35 }
 0x165   : > { %1992 = vmatpush.msra.mxu0 %v1815_v63 }
 0x166   : > { %v3825_v61 = vpop.f32.mrf.mxu2 }
 0x167   : > { %v1231_v2 = vadd.f32 %v3825_v61, %v1202_v23  ;;  %v1851_v61 = vld [vmem:[%s5468_s5 + $0x380] sm:$0xff]  ;;  %v1741_v23 = vld [vmem:[%s5468_s5 + $0x10] sm:$0xff]  ;;  %1993 = vmatpush.msra.mxu0 %v1813_v43 }
 0x168   : > { %2013 = vmatpush.msra.mxu1 %v1851_v61 }
 0x16a   : > { %2014 = vmatpush.msra.mxu1 %v1849_v34  ;;  %v1895_v34 = vld [vmem:[%s5468_s5 + $0x4e0] sm:$0xff] }
 0x16d   : > { %v3791_v42 = vpop.f32.mrf.mxu0 }
 0x170   : > { %v3793_v58 = vpop.f32.mrf.mxu1 }
 0x173   : > { %v1262_v29 = vpop.f32.mrf.mxu3 }
 0x179   : > { %v1233_v24 = vpop.f32.mrf.mxu2 }
 0x17e   : > { %v1178_v51 = vpop.f32.mrf.mxu0 }
 0x17f   : > { %v1179_v52 = vadd.f32 %v1178_v51, %v3798_v32  ;;  %v1207_v25 = vpop.f32.mrf.mxu1  ;;  %v1751_v51 = vld [vmem:[%s5468_s5 + $0x60] sm:$0xff] }
 0x180   : > { %1946 = vmatpush.msrb.mxu2 %v1751_v51 }
 0x181   : > { %v3803_v27 = vadd.f32 %v1207_v25, %v1179_v52  ;;  %v1176_v52 = vadd.f32 %v3791_v42, %v3798_v32  ;;  %v1749_v42 = vld [vmem:[%s5468_s5 + $0x50] sm:$0xff]  ;;  %v1263_v32 = vadd.f32 %v1262_v29, %v3801_v33 }
 0x182   : > { %1947 = vmatpush.msrb.mxu2 %v1749_v42  ;;  %v1773_v29 = vld [vmem:[%s5468_s5 + $0x110] sm:$0xff] }
 0x183   : > { %v1205_v17 = vadd.f32 %v3793_v58, %v1176_v52  ;;  %v1745_v58 = vld [vmem:[%s5468_s5 + $0x30] sm:$0xff] }
 0x184   : > { %v1265_v11 = vpop.f32.mrf.mxu3  ;;  %v1841_v42 = vld [vmem:[%s5468_s5 + $0x330] sm:$0xff] }
 0x185   : > { %v1234_v4 = vadd.f32 %v1233_v24, %v1205_v17  ;;  %v1236_v45 = vpop.f32.mrf.mxu2  ;;  %v1266_v9 = vadd.f32 %v1265_v11, %v3801_v33  ;;  %v1811_v24 = vld [vmem:[%s5468_s5 + $0x240] sm:$0xff]  ;;  %v1929_v17 = vld [vmem:[%s5468_s5 + $0x5f0] sm:$0xff] }
 0x186   : > { %v1285_v15 = vpop.f32.mrf.mxu0  ;;  %v3992_v49 = vadd.f32 %v1236_v45, %v3803_v27  ;;  %1994 = vmatpush.msra.mxu0 %v1811_v24  ;;  %v1805_v11 = vld [vmem:[%s5468_s5 + $0x210] sm:$0xff] }
 0x187   : > { %v1286_v62 = vadd.f32 %v1285_v15, %v1257_v19  ;;  %v1314_v38 = vpop.f32.mrf.mxu1  ;;  %v1781_v19 = vld [vmem:[%s5468_s5 + $0x150] sm:$0xff]  ;;  %v3931_v15 = vmax.f32 %v1231_v2, 0.0 }
 0x188   : > { %1970 = vmatpush.msrb.mxu3 %v1781_v19  ;;  %1995 = vmatpush.msra.mxu0 %v1809_v57 }
 0x189   : > { %v1315_v3 = vadd.f32 %v1314_v38, %v1286_v62  ;;  %v1747_v62 = vld [vmem:[%s5468_s5 + $0x40] sm:$0xff] }
 0x18a   : > { %v1779_v38 = vld [vmem:[%s5468_s5 + $0x140] sm:$0xff]  ;;  %1948 = vmatpush.msrb.mxu2 %v1747_v62 }
 0x18b   : > { %v1327_v8 = vmax.f32 %v1315_v3, 0.0  ;;  %1971 = vmatpush.msrb.mxu3 %v1779_v38  ;;  %v1897_v38 = vld [vmem:[%s5468_s5 + $0x4f0] sm:$0xff] }
 0x18c   : > { %1949 = vmatpush.msrb.mxu2 %v1745_v58  ;;  %v1927_v58 = vld [vmem:[%s5468_s5 + $0x5e0] sm:$0xff] }
 0x18d   : > { %v1342_v14 = vrot.slane %v1327_v8, 6  ;;  %1972 = vmatpush.msrb.mxu3 %v1777_v26  ;;  %v1837_v26 = vld [vmem:[%s5468_s5 + $0x310] sm:$0xff] }
 0x18e   : > { %v1288_v20 = vpop.f32.mrf.mxu0 }
 0x18f   : > { %v1346_v10 = vsel %vm718_vm4, %v1326_v12, %v1342_v14  ;;  %v1348_v0 = vsel %vm1347_vm12, %v1326_v12, %v1342_v14  ;;  %v1317_v7 = vpop.f32.mrf.mxu1  ;;  %v1289_v53 = vadd.f32 %v1288_v20, %v1260_v47  ;;  %v1351_v25 = vsel %vm1350_vm13, %v1326_v12, %v1342_v14  ;;  %v1775_v20 = vld [vmem:[%s5468_s5 + $0x120] sm:$0xff] }
 0x190   : > { %v1349_v46 = vrot.slane %v1348_v0, 2  ;;  %1372 = vst [vmem:[#allocation1] ss:$4 sm:$0xff] %v1346_v10  ;;  %v1353_v13 = vsel %vm516_vm1, %v1342_v14, %v1326_v12  ;;  %v1352_v22 = vrot.slane %v1351_v25, 4  ;;  %v1847_v12 = vld [vmem:[%s5468_s5 + $0x360] sm:$0xff]  ;;  %1973 = vmatpush.msrb.mxu3 %v1775_v20 }
 0x191   : > { %v1318_v48 = vadd.f32 %v1317_v7, %v1289_v53  ;;  %v1354_v36 = vrot.slane %v1353_v13, 6  ;;  %v1743_v14 = vld [vmem:[%s5468_s5 + $0x20] sm:$0xff]  ;;  %v3978_v7 = vmax.f32 %v1234_v4, 0.0  ;;  %2015 = vmatpush.msra.mxu1 %v1847_v12 }
 0x192   : > { %1376 = vst [vmem:[#allocation1 + $0x20] ss:$4 sm:$0xff] %v1349_v46  ;;  %1950 = vmatpush.msrb.mxu2 %v1743_v14  ;;  %1974 = vmatpush.msrb.mxu3 %v1773_v29 }
 0x193   : > { %v1329_v56 = vmax.f32 %v1318_v48, 0.0  ;;  %2016 = vmatpush.msra.mxu1 %v1845_v41 }
 0x194   : > { %1951 = vmatpush.msrb.mxu2 %v1741_v23 }
 0x195   : > { %v3933_v59 = vrot.slane %v1329_v56, 6  ;;  %v1771_v56 = vld [vmem:[%s5468_s5 + $0x100] sm:$0xff]  ;;  %2017 = vmatpush.msra.mxu1 %v1843_v30 }
 0x196   : > { %v1291_v60 = vpop.f32.mrf.mxu0  ;;  %1952 = vmatpush.msrb.mxu2 %v1739_v1  ;;  %1975 = vmatpush.msrb.mxu3 %v1771_v56 }
 0x197   : > { %v1373_v28 = vld.sshfl [vmem:[#allocation1] sm:$0xff pattern:$0x73625140]  ;;  %v1374_v39 = vld.sshfl [vmem:[#allocation1 + $0x8] sm:$0xff pattern:$0x73625140]  ;;  %v1292_v44 = vadd.f32 %v1291_v60, %v1263_v32  ;;  %v1320_v3 = vpop.f32.mrf.mxu1  ;;  %v1356_v18 = vsel %vm1347_vm12, %v3931_v15, %v3933_v59  ;;  %v1355_v27 = vsel %vm718_vm4, %v3931_v15, %v3933_v59  ;;  %v4011_v25 = vsel %vm1350_vm13, %v3931_v15, %v3933_v59  ;;  %2018 = vmatpush.msra.mxu1 %v1841_v42 }
 0x198   : > { %1379 = vst [vmem:[#allocation1] ss:$4 sm:$0xff] %v1352_v22  ;;  %v1443_v21 = vsel %vm718_vm4, %v1373_v28, -inf  ;;  %v1450_v0 = vsel %vm718_vm4, %v1374_v39, -inf  ;;  %v1357_v33 = vrot.slane %v1356_v18, 2  ;;  %v1332_v60 = vmax.f32 %v3992_v49, 0.0  ;;  %2029 = vmatpush.msra.mxu2 %v1897_v38  ;;  %2052 = vmatpush.msra.mxu3 %v1929_v17 }
 0x199   : > { %v1377_v5 = vld.sshfl [vmem:[#allocation1 + $0x20] sm:$0xff pattern:$0x73625140]  ;;  %v1378_v6 = vld.sshfl [vmem:[#allocation1 + $0x28] sm:$0xff pattern:$0x73625140]  ;;  %v1321_v8 = vadd.f32 %v1320_v3, %v1292_v44  ;;  %v4030_v61 = vsel %vm516_vm1, %v3933_v59, %v3931_v15 }
 0x19a   : > { %1382 = vst [vmem:[#allocation1 + $0x20] ss:$4 sm:$0xff] %v1354_v36  ;;  %v1457_v40 = vsel %vm718_vm4, %v1377_v5, -inf  ;;  %v1444_v16 = vrot.slane %v1443_v21, 4  ;;  %v1451_v46 = vrot.slane %v1450_v0, 4  ;;  %v1464_v53 = vsel %vm718_vm4, %v1378_v6, -inf  ;;  %2030 = vmatpush.msra.mxu2 %v1895_v34  ;;  %2053 = vmatpush.msra.mxu3 %v1927_v58 }
 0x19b   : > { %v1331_v47 = vmax.f32 %v1321_v8, 0.0  ;;  %v1458_v10 = vrot.slane %v1457_v40, 4  ;;  %v1465_v48 = vrot.slane %v1464_v53, 4  ;;  %v1359_v39 = vrot.slane %v4011_v25, 4  ;;  %v1807_v15 = vld [vmem:[%s5468_s5 + $0x220] sm:$0xff]  ;;  %v1766_v17 = vld [vmem:[%s5468_s5 + $0xd8] sm:$0xff] }
 0x19c   : > { %v1445_v2 = vmax.f32 %v1443_v21, %v1444_v16  ;;  %v1452_v50 = vmax.f32 %v1450_v0, %v1451_v46  ;;  %v1839_v59 = vld [vmem:[%s5468_s5 + $0x320] sm:$0xff]  ;;  %1996 = vmatpush.msra.mxu0 %v1807_v15  ;;  %v1893_v21 = vld [vmem:[%s5468_s5 + $0x4d0] sm:$0xff]  ;;  %v1361_v16 = vrot.slane %v4030_v61, 6  ;;  %v1770_v46 = vld [vmem:[%s5468_s5 + $0xf8] sm:$0xff] }
 0x19d   : > { %v1459_v52 = vmax.f32 %v1457_v40, %v1458_v10  ;;  %v4013_v31 = vrot.slane %v1331_v47, 6  ;;  %v1466_v22 = vmax.f32 %v1464_v53, %v1465_v48  ;;  %2019 = vmatpush.msra.mxu1 %v1839_v59  ;;  %v1925_v40 = vld [vmem:[%s5468_s5 + $0x5d0] sm:$0xff]  ;;  %v1803_v47 = vld [vmem:[%s5468_s5 + $0x200] sm:$0xff]  ;;  %2031 = vmatpush.msra.mxu2 %v1893_v21  ;;  %v1764_v34 = vld [vmem:[%s5468_s5 + $0xc8] sm:$0xff] }
 0x19e   : > { %v1294_v37 = vpop.f32.mrf.mxu0  ;;  %v1446_v28 = vrot.slane %v1445_v2, 2  ;;  %v1453_v45 = vrot.slane %v1452_v50, 2  ;;  %v1835_v10 = vld [vmem:[%s5468_s5 + $0x300] sm:$0xff]  ;;  %1997 = vmatpush.msra.mxu0 %v1805_v11  ;;  %2054 = vmatpush.msra.mxu3 %v1925_v40 }
 0x19f   : > { %v1380_v55 = vld.sshfl [vmem:[#allocation1] sm:$0xff pattern:$0x73625140]  ;;  %v4006_v51 = vld.sshfl [vmem:[#allocation1 + $0x8] sm:$0xff pattern:$0x73625140]  ;;  %v1295_v54 = vadd.f32 %v1294_v37, %v1266_v9  ;;  %v1323_v19 = vpop.f32.mrf.mxu1  ;;  %v4056_v8 = vsel %vm1347_vm12, %v3978_v7, %v4013_v31  ;;  %v4067_v12 = vsel %vm1350_vm13, %v3978_v7, %v4013_v31  ;;  %2020 = vmatpush.msra.mxu1 %v1837_v26  ;;  %v4100_v30 = vsel %vm718_vm4, %v3978_v7, %v4013_v31 }
 0x1a0   : > { %1385 = vst [vmem:[#allocation1] ss:$4 sm:$0xff] %v1355_v27  ;;  %v1460_v44 = vrot.slane %v1459_v52, 2  ;;  %v1471_v3 = vsel %vm718_vm4, %v1380_v55, -inf  ;;  %v1447_v4 = vmax.f32 %v1445_v2, %v1446_v28  ;;  %v1467_v18 = vrot.slane %v1466_v22, 2  ;;  %v1891_v0 = vld [vmem:[%s5468_s5 + $0x4c0] sm:$0xff]  ;;  %1998 = vmatpush.msra.mxu0 %v1803_v47 }
 0x1a1   : > { %v1383_v32 = vld.sshfl [vmem:[#allocation1 + $0x20] sm:$0xff pattern:$0x73625140]  ;;  %v4024_v13 = vld.sshfl [vmem:[#allocation1 + $0x28] sm:$0xff pattern:$0x73625140]  ;;  %v1324_v62 = vadd.f32 %v1323_v19, %v1295_v54  ;;  %v4107_v48 = vsel %vm516_vm1, %v4013_v31, %v3978_v7  ;;  %2021 = vmatpush.msra.mxu1 %v1835_v10  ;;  %2032 = vmatpush.msra.mxu2 %v1891_v0 }
 0x1a2   : > { %1388 = vst [vmem:[#allocation1 + $0x20] ss:$4 sm:$0xff] %v1357_v33  ;;  %v1485_v36 = vsel %vm718_vm4, %v1383_v32, -inf  ;;  %v1472_v5 = vrot.slane %v1471_v3, 4  ;;  %v1461_v63 = vmax.f32 %v1459_v52, %v1460_v44  ;;  %v1923_v9 = vld [vmem:[%s5468_s5 + $0x5c0] sm:$0xff]  ;;  %v1448_v41 = vrot.slane %v1447_v4, 1  ;;  %2075 = vmatpush.msrb.mxu0 %v1770_v46 }
 0x1a3   : > { %v1333_v35 = vmax.f32 %v1324_v62, 0.0  ;;  %v1486_v6 = vrot.slane %v1485_v36, 4  ;;  %v4091_v33 = vmax.f32 %v1452_v50, %v1453_v45  ;;  %v4093_v37 = vmax.f32 %v1466_v22, %v1467_v18  ;;  %v1802_v27 = vld [vmem:[%s5468_s5 + $0x1f8] sm:$0xff]  ;;  %v1889_v55 = vld [vmem:[%s5468_s5 + $0x4b0] sm:$0xff]  ;;  %v1768_v7 = vld [vmem:[%s5468_s5 + $0xe8] sm:$0xff]  ;;  %2055 = vmatpush.msra.mxu3 %v1923_v9 }
 0x1a4   : > { %v1473_v20 = vmax.f32 %v1471_v3, %v1472_v5  ;;  %v1462_v23 = vrot.slane %v1461_v63, 1  ;;  %v1478_v24 = vsel %vm718_vm4, %v4006_v51, -inf  ;;  %v1364_v1 = vrot.slane %v4056_v8, 2  ;;  %v1921_v51 = vld [vmem:[%s5468_s5 + $0x5b0] sm:$0xff]  ;;  %v1800_v31 = vld [vmem:[%s5468_s5 + $0x1e8] sm:$0xff]  ;;  %v1887_v54 = vld [vmem:[%s5468_s5 + $0x4a0] sm:$0xff]  ;;  %2098 = vmatpush.msrb.mxu1 %v1802_v27  ;;  %2033 = vmatpush.msra.mxu2 %v1889_v55 }
 0x1a5   : > { %v1345_v14 = vrot.slane %v1333_v35, 6  ;;  %v1487_v43 = vmax.f32 %v1485_v36, %v1486_v6  ;;  %v1366_v2 = vrot.slane %v4067_v12, 4  ;;  %v1449_v19 = vmax.f32 %v1447_v4, %v1448_v41  ;;  %v1919_v38 = vld [vmem:[%s5468_s5 + $0x5a0] sm:$0xff]  ;;  %v1798_v28 = vld [vmem:[%s5468_s5 + $0x1d8] sm:$0xff]  ;;  %2056 = vmatpush.msra.mxu3 %v1921_v51  ;;  %v1885_v36 = vld [vmem:[%s5468_s5 + $0x490] sm:$0xff]  ;;  %2076 = vmatpush.msrb.mxu0 %v1768_v7 }
 0x1a6   : > { %v1474_v53 = vrot.slane %v1473_v20, 2  ;;  %v4132_v56 = vmax.f32 %v1461_v63, %v1462_v23  ;;  %v1479_v50 = vrot.slane %v1478_v24, 4  ;;  %v1492_v22 = vsel %vm718_vm4, %v4024_v13, -inf  ;;  %v1917_v35 = vld [vmem:[%s5468_s5 + $0x590] sm:$0xff]  ;;  %2099 = vmatpush.msrb.mxu1 %v1800_v31  ;;  %2034 = vmatpush.msra.mxu2 %v1887_v54  ;;  %v1883_v40 = vld [vmem:[%s5468_s5 + $0x480] sm:$0xff]  ;;  %v1762_v10 = vld [vmem:[%s5468_s5 + $0xb8] sm:$0xff] }
 0x1a7   : > { %v1387_v29 = vld.sshfl [vmem:[#allocation1 + $0x8] sm:$0xff pattern:$0x73625140]  ;;  %v4121_v52 = vsel %vm718_vm4, %v1332_v60, %v1345_v14  ;;  %v1488_v42 = vrot.slane %v1487_v43, 2  ;;  %v1455_v13 = vrot.slane %v4091_v33, 1  ;;  %v1469_v44 = vrot.slane %v4093_v37, 1  ;;  %2057 = vmatpush.msra.mxu3 %v1919_v38  ;;  %2077 = vmatpush.msrb.mxu0 %v1766_v17 }
 0x1a8   : > { %v1475_v57 = vmax.f32 %v1473_v20, %v1474_v53  ;;  %v1506_v62 = vsel %vm718_vm4, %v1387_v29, -inf  ;;  %v4151_v3 = vsel %vm1347_vm12, %v1332_v60, %v1345_v14  ;;  %v1480_v58 = vmax.f32 %v1478_v24, %v1479_v50  ;;  %v1796_v60 = vld [vmem:[%s5468_s5 + $0x1c8] sm:$0xff]  ;;  %v1386_v5 = vld.sshfl [vmem:[#allocation1] sm:$0xff pattern:$0x73625140]  ;;  %2100 = vmatpush.msrb.mxu1 %v1798_v28  ;;  %2035 = vmatpush.msra.mxu2 %v1885_v36  ;;  %v1794_v0 = vld [vmem:[%s5468_s5 + $0x1b8] sm:$0xff] }
 0x1a9   : > { %v1390_v32 = vld.sshfl [vmem:[#allocation1 + $0x28] sm:$0xff pattern:$0x73625140]  ;;  %v1489_v59 = vmax.f32 %v1487_v43, %v1488_v42  ;;  %v1493_v4 = vrot.slane %v1492_v22, 4  ;;  %v1507_v49 = vrot.slane %v1506_v62, 4  ;;  %v1663_v26 = vsel %vm957_vm5, %v4132_v56, %v1449_v19  ;;  %v1915_v47 = vld [vmem:[%s5468_s5 + $0x580] sm:$0xff]  ;;  %2058 = vmatpush.msra.mxu3 %v1917_v35  ;;  %2078 = vmatpush.msrb.mxu0 %v1764_v34 }
 0x1aa   : > { %v1476_v15 = vrot.slane %v1475_v57, 1  ;;  %v1520_v63 = vsel %vm718_vm4, %v1390_v32, -inf  ;;  %v1389_v45 = vld.sshfl [vmem:[#allocation1 + $0x20] sm:$0xff pattern:$0x73625140]  ;;  %v1499_v18 = vsel %vm718_vm4, %v1386_v5, -inf  ;;  %v4184_v43 = vmax.f32 %v4093_v37, %v1469_v44  ;;  %2101 = vmatpush.msrb.mxu1 %v1796_v60  ;;  %2036 = vmatpush.msra.mxu2 %v1883_v40 }
 0x1ab   : > { %v1490_v11 = vrot.slane %v1489_v59, 1  ;;  %1391 = vst [vmem:[#allocation1] ss:$4 sm:$0xff] %v1359_v39  ;;  %v1494_v14 = vmax.f32 %v1492_v22, %v1493_v4  ;;  %v1508_v21 = vmax.f32 %v1506_v62, %v1507_v49  ;;  %v1500_v20 = vrot.slane %v1499_v18, 4  ;;  %v1881_v23 = vld [vmem:[%s5468_s5 + $0x470] sm:$0xff]  ;;  %v1760_v46 = vld [vmem:[%s5468_s5 + $0xa8] sm:$0xff]  ;;  %2059 = vmatpush.msra.mxu3 %v1915_v47  ;;  %2079 = vmatpush.msrb.mxu0 %v1762_v10 }
 0x1ac   : > { %v4165_v6 = vmax.f32 %v1475_v57, %v1476_v15  ;;  %1394 = vst [vmem:[#allocation1 + $0x20] ss:$4 sm:$0xff] %v1361_v16  ;;  %v1513_v25 = vsel %vm718_vm4, %v1389_v45, -inf  ;;  %v1456_v39 = vmax.f32 %v4091_v33, %v1455_v13  ;;  %v1481_v16 = vrot.slane %v1480_v58, 2  ;;  %v1913_v29 = vld [vmem:[%s5468_s5 + $0x570] sm:$0xff]  ;;  %v1792_v55 = vld [vmem:[%s5468_s5 + $0x1a8] sm:$0xff]  ;;  %2102 = vmatpush.msrb.mxu1 %v1794_v0  ;;  %2037 = vmatpush.msra.mxu2 %v1881_v23 }
 0x1ad   : > { %v1514_v61 = vrot.slane %v1513_v25, 4  ;;  %v1495_v9 = vrot.slane %v1494_v14, 2  ;;  %v1509_v41 = vrot.slane %v1508_v21, 2  ;;  %v4201_v53 = vmax.f32 %v1489_v59, %v1490_v11  ;;  %v1879_v51 = vld [vmem:[%s5468_s5 + $0x460] sm:$0xff]  ;;  %v1758_v32 = vld [vmem:[%s5468_s5 + $0x98] sm:$0xff]  ;;  %v1877_v50 = vld [vmem:[%s5468_s5 + $0x450] sm:$0xff]  ;;  %2060 = vmatpush.msra.mxu3 %v1913_v29  ;;  %2080 = vmatpush.msrb.mxu0 %v1760_v46 }
 0x1ae   : > { %v1501_v33 = vmax.f32 %v1499_v18, %v1500_v20  ;;  %v1664_v37 = vsel %vm959_vm6, %v4165_v6, %v1663_v26  ;;  %v1521_v24 = vrot.slane %v1520_v63, 4  ;;  %v1368_v27 = vrot.slane %v4107_v48, 6  ;;  %v1911_v7 = vld [vmem:[%s5468_s5 + $0x560] sm:$0xff]  ;;  %v1790_v19 = vld [vmem:[%s5468_s5 + $0x198] sm:$0xff]  ;;  %v1909_v17 = vld [vmem:[%s5468_s5 + $0x550] sm:$0xff]  ;;  %2103 = vmatpush.msrb.mxu1 %v1792_v55  ;;  %2038 = vmatpush.msra.mxu2 %v1879_v51 }
 0x1af   : > { %v1515_v31 = vmax.f32 %v1513_v25, %v1514_v61  ;;  %v1482_v54 = vmax.f32 %v1480_v58, %v1481_v16  ;;  %v1496_v57 = vmax.f32 %v1494_v14, %v1495_v9  ;;  %v1371_v42 = vrot.slane %v4151_v3, 2  ;;  %v1756_v28 = vld [vmem:[%s5468_s5 + $0x88] sm:$0xff]  ;;  %v1875_v49 = vld [vmem:[%s5468_s5 + $0x440] sm:$0xff]  ;;  %2061 = vmatpush.msra.mxu3 %v1911_v7  ;;  %v1754_v18 = vld [vmem:[%s5468_s5 + $0x78] sm:$0xff]  ;;  %2081 = vmatpush.msrb.mxu0 %v1758_v32 }
 0x1b0   : > { %v1502_v22 = vrot.slane %v1501_v33, 2  ;;  %v1510_v62 = vmax.f32 %v1508_v21, %v1509_v41  ;;  %v4227_v38 = vsel %vm957_vm5, %v4184_v43, %v1456_v39  ;;  %v1788_v15 = vld [vmem:[%s5468_s5 + $0x188] sm:$0xff]  ;;  %v1522_v36 = vmax.f32 %v1520_v63, %v1521_v24  ;;  %v1907_v45 = vld [vmem:[%s5468_s5 + $0x540] sm:$0xff]  ;;  %2104 = vmatpush.msrb.mxu1 %v1790_v19  ;;  %2039 = vmatpush.msra.mxu2 %v1877_v50  ;;  %v1786_v9 = vld [vmem:[%s5468_s5 + $0x178] sm:$0xff] }
 0x1b1   : > { %v1516_v59 = vrot.slane %v1515_v31, 2  ;;  %v1483_v13 = vrot.slane %v1482_v54, 1  ;;  %v1497_v44 = vrot.slane %v1496_v57, 1  ;;  %v1665_v58 = vsel %vm961_vm7, %v4201_v53, %v1664_v37  ;;  %2062 = vmatpush.msra.mxu3 %v1909_v17  ;;  %2082 = vmatpush.msrb.mxu0 %v1756_v28  ;;  %v1873_v8 = vld [vmem:[%s5468_s5 + $0x430] sm:$0xff]  ;;  %v1752_v46 = vld [vmem:[%s5468_s5 + $0x68] sm:$0xff]  ;;  %v1746_v12 = vld [vmem:[%s5468_s5 + $0x38] sm:$0xff] }
 0x1b2   : > { %v1392_v35 = vld.sshfl [vmem:[#allocation1] sm:$0xff pattern:$0x73625140]  ;;  %v1503_v34 = vmax.f32 %v1501_v33, %v1502_v22  ;;  %v1393_v4 = vld.sshfl [vmem:[#allocation1 + $0x8] sm:$0xff pattern:$0x73625140]  ;;  %v1689_v60 = vsel %vm957_vm5, %v4165_v6, %v4132_v56  ;;  %2105 = vmatpush.msrb.mxu1 %v1788_v15  ;;  %2040 = vmatpush.msra.mxu2 %v1875_v49 }
 0x1b3   : > { %v1395_v5 = vld.sshfl [vmem:[#allocation1 + $0x20] sm:$0xff pattern:$0x73625140]  ;;  %v1517_v11 = vmax.f32 %v1515_v31, %v1516_v59  ;;  %v1527_v26 = vsel %vm718_vm4, %v1392_v35, -inf  ;;  %1397 = vst [vmem:[#allocation1] ss:$4 sm:$0xff] %v4100_v30  ;;  %v4248_v63 = vmax.f32 %v1482_v54, %v1483_v13  ;;  %v4257_v47 = vmax.f32 %v1496_v57, %v1497_v44  ;;  %2063 = vmatpush.msra.mxu3 %v1907_v45 }
 0x1b4   : > { %v1504_v56 = vrot.slane %v1503_v34, 1  ;;  %v1528_v14 = vrot.slane %v1527_v26, 4  ;;  %v1541_v21 = vsel %vm718_vm4, %v1395_v5, -inf  ;;  %v1396_v40 = vld.sshfl [vmem:[#allocation1 + $0x28] sm:$0xff pattern:$0x73625140]  ;;  %v1690_v33 = vsel %vm959_vm6, %v4201_v53, %v1689_v60  ;;  %2083 = vmatpush.msrb.mxu0 %v1754_v18  ;;  %2106 = vmatpush.msrb.mxu1 %v1786_v9 }
 0x1b5   : > { %v1518_v30 = vrot.slane %v1517_v11, 1  ;;  %v1542_v20 = vrot.slane %v1541_v21, 4  ;;  %1400 = vst [vmem:[#allocation1 + $0x20] ss:$4 sm:$0xff] %v1364_v1  ;;  %v1511_v25 = vrot.slane %v1510_v62, 1  ;;  %v1523_v39 = vrot.slane %v1522_v36, 2  ;;  %2041 = vmatpush.msra.mxu2 %v1873_v8 }
 0x1b6   : > { %v4261_v10 = vmax.f32 %v1503_v34, %v1504_v56  ;;  %v1529_v0 = vmax.f32 %v1527_v26, %v1528_v14  ;;  %v1534_v61 = vsel %vm718_vm4, %v1393_v4, -inf  ;;  %v1548_v16 = vsel %vm718_vm4, %v1396_v40, -inf  ;;  %v1905_v29 = vld [vmem:[%s5468_s5 + $0x530] sm:$0xff]  ;;  %v1784_v7 = vld [vmem:[%s5468_s5 + $0x168] sm:$0xff]  ;;  %v1871_v31 = vld [vmem:[%s5468_s5 + $0x420] sm:$0xff]  ;;  %2084 = vmatpush.msrb.mxu0 %v1752_v46 }
 0x1b7   : > { %v1543_v1 = vmax.f32 %v1541_v21, %v1542_v20  ;;  %v4271_v41 = vmax.f32 %v1510_v62, %v1511_v25  ;;  %v1524_v23 = vmax.f32 %v1522_v36, %v1523_v39  ;;  %v4281_v37 = vmax.f32 %v1517_v11, %v1518_v30  ;;  %v1903_v54 = vld [vmem:[%s5468_s5 + $0x520] sm:$0xff]  ;;  %v1750_v22 = vld [vmem:[%s5468_s5 + $0x58] sm:$0xff]  ;;  %v1869_v17 = vld [vmem:[%s5468_s5 + $0x410] sm:$0xff]  ;;  %2064 = vmatpush.msra.mxu3 %v1905_v29 }
 0x1b8   : > { %v1530_v24 = vrot.slane %v1529_v0, 2  ;;  %v1535_v55 = vrot.slane %v1534_v61, 4  ;;  %v1549_v51 = vrot.slane %v1548_v16, 4  ;;  %v1666_v32 = vsel %vm963_vm8, %v4261_v10, %v1665_v58  ;;  %v1782_v62 = vld [vmem:[%s5468_s5 + $0x158] sm:$0xff]  ;;  %2107 = vmatpush.msrb.mxu1 %v1784_v7  ;;  %v1901_v4 = vld [vmem:[%s5468_s5 + $0x510] sm:$0xff]  ;;  %v1748_v49 = vld [vmem:[%s5468_s5 + $0x48] sm:$0xff]  ;;  %2042 = vmatpush.msra.mxu2 %v1871_v31 }
 0x1b9   : > { %v1544_v57 = vrot.slane %v1543_v1, 2  ;;  %v1525_v19 = vrot.slane %v1524_v23, 1  ;;  %v1671_v50 = vsel %vm959_vm6, %v4248_v63, %v4227_v38  ;;  %v1780_v60 = vld [vmem:[%s5468_s5 + $0x148] sm:$0xff]  ;;  %v1667_v11 = vsel %vm965_vm9, %v4281_v37, %v1666_v32  ;;  %2065 = vmatpush.msra.mxu3 %v1903_v54  ;;  %2085 = vmatpush.msrb.mxu0 %v1750_v22  ;;  %v1867_v30 = vld [vmem:[%s5468_s5 + $0x400] sm:$0xff] }
 0x1ba   : > { %v1531_v28 = vmax.f32 %v1529_v0, %v1530_v24  ;;  %v1536_v15 = vmax.f32 %v1534_v61, %v1535_v55  ;;  %v1550_v59 = vmax.f32 %v1548_v16, %v1549_v51  ;;  %v1672_v38 = vsel %vm961_vm7, %v4257_v47, %v1671_v50  ;;  %v1398_v13 = vld.sshfl [vmem:[#allocation1] sm:$0xff pattern:$0x73625140]  ;;  %v1399_v44 = vld.sshfl [vmem:[#allocation1 + $0x8] sm:$0xff pattern:$0x73625140]  ;;  %2108 = vmatpush.msrb.mxu1 %v1782_v62 }
 0x1bb   : > { %v1545_v36 = vmax.f32 %v1543_v1, %v1544_v57  ;;  %v4308_v35 = vmax.f32 %v1524_v23, %v1525_v19  ;;  %v1673_v34 = vsel %vm963_vm8, %v4271_v41, %v1672_v38  ;;  %v1555_v58 = vsel %vm718_vm4, %v1398_v13, -inf  ;;  %1403 = vst [vmem:[#allocation1] ss:$4 sm:$0xff] %v1366_v2  ;;  %v1899_v20 = vld [vmem:[%s5468_s5 + $0x500] sm:$0xff]  ;;  %2043 = vmatpush.msra.mxu2 %v1869_v17  ;;  %v1778_v2 = vld [vmem:[%s5468_s5 + $0x138] sm:$0xff]  ;;  %v1776_v57 = vld [vmem:[%s5468_s5 + $0x128] sm:$0xff] }
 0x1bc   : > { %v1532_v5 = vrot.slane %v1531_v28, 1  ;;  %v4324_v26 = vld.sshfl [vmem:[#allocation1 + $0x28] sm:$0xff pattern:$0x73625140]  ;;  %v1537_v45 = vrot.slane %v1536_v15, 2  ;;  %v1551_v18 = vrot.slane %v1550_v59, 2  ;;  %v1691_v40 = vsel %vm961_vm7, %v4261_v10, %v1690_v33  ;;  %2066 = vmatpush.msra.mxu3 %v1901_v4  ;;  %2086 = vmatpush.msrb.mxu0 %v1748_v49 }
 0x1bd   : > { %v1546_v56 = vrot.slane %v1545_v36, 1  ;;  %v1674_v14 = vsel %vm965_vm9, %v4308_v35, %v1673_v34  ;;  %v1556_v21 = vrot.slane %v1555_v58, 4  ;;  %v1562_v61 = vsel %vm718_vm4, %v1399_v44, -inf  ;;  %2109 = vmatpush.msrb.mxu1 %v1780_v60  ;;  %v1401_v23 = vld.sshfl [vmem:[#allocation1 + $0x20] sm:$0xff pattern:$0x73625140]  ;;  %2044 = vmatpush.msra.mxu2 %v1867_v30 }
 0x1be   : > { %v4338_v25 = vmax.f32 %v1531_v28, %v1532_v5  ;;  %v1538_v39 = vmax.f32 %v1536_v15, %v1537_v45  ;;  %v1552_v0 = vmax.f32 %v1550_v59, %v1551_v18  ;;  %v1563_v8 = vrot.slane %v1562_v61, 4  ;;  %2067 = vmatpush.msra.mxu3 %v1899_v20  ;;  %v1834_v55 = vld [vmem:[%s5468_s5 + $0x2f8] sm:$0xff]  ;;  %1406 = vst [vmem:[#allocation1 + $0x20] ss:$4 sm:$0xff] %v1368_v27  ;;  %v1832_v19 = vld [vmem:[%s5468_s5 + $0x2e8] sm:$0xff] }
 0x1bf   : > { %v4347_v16 = vmax.f32 %v1545_v36, %v1546_v56  ;;  %v1557_v9 = vmax.f32 %v1555_v58, %v1556_v21  ;;  %v1696_v1 = vsel %vm957_vm5, %v4248_v63, %v4184_v43  ;;  %v1692_v24 = vsel %vm963_vm8, %v4281_v37, %v1691_v40  ;;  %v1744_v43 = vld [vmem:[%s5468_s5 + $0x28] sm:$0xff]  ;;  %2087 = vmatpush.msrb.mxu0 %v1746_v12  ;;  %v1742_v50 = vld [vmem:[%s5468_s5 + $0x18] sm:$0xff] }
 0x1c0   : > { %v1668_v29 = vsel %vm967_vm10, %v4338_v25, %v1667_v11  ;;  %v1539_v46 = vrot.slane %v1538_v39, 1  ;;  %v1553_v33 = vrot.slane %v1552_v0, 1  ;;  %v1693_v31 = vsel %vm965_vm9, %v4338_v25, %v1692_v24  ;;  %2110 = vmatpush.msrb.mxu1 %v1778_v2  ;;  %v1866_v15 = vld [vmem:[%s5468_s5 + $0x3f8] sm:$0xff]  ;;  %v1864_v18 = vld [vmem:[%s5468_s5 + $0x3e8] sm:$0xff] }
 0x1c1   : > { %v4366_v51 = vsel %vm969_vm11, %v4347_v16, %v1668_v29  ;;  %v1558_v7 = vrot.slane %v1557_v9, 2  ;;  %v1564_v54 = vmax.f32 %v1562_v61, %v1563_v8  ;;  %v1697_v27 = vsel %vm959_vm6, %v4257_v47, %v1696_v1  ;;  %2088 = vmatpush.msrb.mxu0 %v1744_v43  ;;  %v1774_v59 = vld [vmem:[%s5468_s5 + $0x118] sm:$0xff]  ;;  %v1740_v56 = vld [vmem:[%s5468_s5 + $0x8] sm:$0xff] }
 0x1c2   : > { %1953 = vmatmul.f32.vlgmr.msrb.gmra.mxu2 %v4366_v51  ;;  %v4374_v32 = vmax.f32 %v1538_v39, %v1539_v46  ;;  %v4376_v48 = vmax.f32 %v1552_v0, %v1553_v33  ;;  %v1569_v22 = vsel %vm718_vm4, %v1401_v23, -inf  ;;  %v1698_v28 = vsel %vm961_vm7, %v4271_v41, %v1697_v27  ;;  %v1830_v38 = vld [vmem:[%s5468_s5 + $0x2d8] sm:$0xff]  ;;  %2111 = vmatpush.msrb.mxu1 %v1776_v57  ;;  %v1404_v58 = vld.sshfl [vmem:[#allocation1] sm:$0xff pattern:$0x73625140] }
 0x1c3   : > { %v1559_v62 = vmax.f32 %v1557_v9, %v1558_v7  ;;  %v1565_v17 = vrot.slane %v1564_v54, 2  ;;  %2121 = vmatpush.msrb.mxu2 %v1834_v55  ;;  %v1570_v13 = vrot.slane %v1569_v22, 4  ;;  %v1694_v36 = vsel %vm967_vm10, %v4347_v16, %v1693_v31  ;;  %v1405_v4 = vld.sshfl [vmem:[#allocation1 + $0x8] sm:$0xff pattern:$0x73625140]  ;;  %2089 = vmatpush.msrb.mxu0 %v1742_v50  ;;  %v1898_v21 = vld [vmem:[%s5468_s5 + $0x4f8] sm:$0xff] }
 0x1c4   : > { %v1675_v44 = vsel %vm967_vm10, %v4374_v32, %v1674_v14  ;;  %v1699_v34 = vsel %vm963_vm8, %v4308_v35, %v1698_v28  ;;  %v1715_v49 = vsel %vm957_vm5, %v4201_v53, %v4165_v6  ;;  %v1772_v6 = vld [vmem:[%s5468_s5 + $0x108] sm:$0xff]  ;;  %2112 = vmatpush.msrb.mxu1 %v1774_v59  ;;  %v1862_v53 = vld [vmem:[%s5468_s5 + $0x3d8] sm:$0xff]  ;;  %v1583_v30 = vsel %vm718_vm4, %v1404_v58, -inf  ;;  %1409 = vst [vmem:[#allocation1] ss:$4 sm:$0xff] %v4121_v52 }
 0x1c5   : > { %v4409_v60 = vsel %vm969_vm11, %v4376_v48, %v1675_v44  ;;  %v1560_v5 = vrot.slane %v1559_v62, 1  ;;  %v1566_v11 = vmax.f32 %v1564_v54, %v1565_v17  ;;  %v1700_v45 = vsel %vm965_vm9, %v4374_v32, %v1699_v34  ;;  %2122 = vmatpush.msrb.mxu2 %v1832_v19  ;;  %v1828_v14 = vld [vmem:[%s5468_s5 + $0x2c8] sm:$0xff]  ;;  %v1407_v12 = vld.sshfl [vmem:[#allocation1 + $0x20] sm:$0xff pattern:$0x73625140]  ;;  %2090 = vmatpush.msrb.mxu0 %v1740_v56  ;;  %v1826_v24 = vld [vmem:[%s5468_s5 + $0x2b8] sm:$0xff] }
 0x1c6   : > { %1976 = vmatmul.f32.vlgmr.msrb.gmra.mxu3 %v4409_v60  ;;  %v1571_v40 = vmax.f32 %v1569_v22, %v1570_v13  ;;  %v1576_v20 = vsel %vm718_vm4, %v4324_v26, -inf  ;;  %v1716_v39 = vsel %vm959_vm6, %v4261_v10, %v1715_v49  ;;  %v1584_v2 = vrot.slane %v1583_v30, 4  ;;  %2113 = vmatpush.msrb.mxu1 %v1772_v6  ;;  %v1408_v52 = vld.sshfl [vmem:[#allocation1 + $0x28] sm:$0xff pattern:$0x73625140]  ;;  %v1930_v43 = vld [vmem:[%s5468_s5 + $0x5f8] sm:$0xff] }
 0x1c7   : > { %v4438_v0 = vmax.f32 %v1559_v62, %v1560_v5  ;;  %v1567_v61 = vrot.slane %v1566_v11, 1  ;;  %2144 = vmatpush.msrb.mxu3 %v1866_v15  ;;  %2123 = vmatpush.msrb.mxu2 %v1830_v38  ;;  %v1577_v9 = vrot.slane %v1576_v20, 4  ;;  %v1701_v8 = vsel %vm967_vm10, %v4376_v48, %v1700_v45  ;;  %v1860_v55 = vld [vmem:[%s5468_s5 + $0x3c8] sm:$0xff]  ;;  %1412 = vst [vmem:[#allocation1 + $0x20] ss:$4 sm:$0xff] %v1371_v42  ;;  %v1858_v15 = vld [vmem:[%s5468_s5 + $0x3b8] sm:$0xff] }
 0x1c8   : > { %v1572_v1 = vrot.slane %v1571_v40, 2  ;;  %v1597_v26 = vsel %vm718_vm4, %v1407_v12, -inf  ;;  %v1590_v23 = vsel %vm718_vm4, %v1405_v4, -inf  ;;  %v1585_v46 = vmax.f32 %v1583_v30, %v1584_v2  ;;  %v1896_v62 = vld [vmem:[%s5468_s5 + $0x4e8] sm:$0xff]  ;;  %v1894_v34 = vld [vmem:[%s5468_s5 + $0x4d8] sm:$0xff] }
 0x1c9   : > { %v4446_v10 = vsel %vm969_vm11, %v4438_v0, %v1694_v36  ;;  %v4448_v29 = vmax.f32 %v1566_v11, %v1567_v61  ;;  %2145 = vmatpush.msrb.mxu3 %v1864_v18  ;;  %2124 = vmatpush.msrb.mxu2 %v1828_v14  ;;  %v1598_v33 = vrot.slane %v1597_v26, 4  ;;  %v1578_v31 = vmax.f32 %v1576_v20, %v1577_v9  ;;  %v1824_v17 = vld [vmem:[%s5468_s5 + $0x2a8] sm:$0xff]  ;;  %v1822_v58 = vld [vmem:[%s5468_s5 + $0x298] sm:$0xff] }
 0x1ca   : > { %1999 = vmatmul.f32.vlgmr.msra.gmra.mxu0 %v4446_v10  ;;  %v1573_v7 = vmax.f32 %v1571_v40, %v1572_v1  ;;  %v1591_v54 = vrot.slane %v1590_v23, 4  ;;  %v1604_v57 = vsel %vm718_vm4, %v1408_v52, -inf  ;;  %v1586_v19 = vrot.slane %v1585_v46, 2  ;;  %v1928_v59 = vld [vmem:[%s5468_s5 + $0x5e8] sm:$0xff]  ;;  %v1926_v18 = vld [vmem:[%s5468_s5 + $0x5d8] sm:$0xff] }
 0x1cb   : > { %v4465_v27 = vsel %vm969_vm11, %v4448_v29, %v1701_v8  ;;  %2146 = vmatpush.msrb.mxu3 %v1862_v53  ;;  %2167 = vmatpush.msra.mxu0 %v1898_v21  ;;  %v1599_v50 = vmax.f32 %v1597_v26, %v1598_v33  ;;  %v1605_v22 = vrot.slane %v1604_v57, 4  ;;  %v1579_v42 = vrot.slane %v1578_v31, 2  ;;  %v1856_v38 = vld [vmem:[%s5468_s5 + $0x3a8] sm:$0xff]  ;;  %v1410_v4 = vld.sshfl [vmem:[#allocation1] sm:$0xff pattern:$0x73625140] }
 0x1cc   : > { %2022 = vmatmul.f32.vlgmr.msra.gmra.mxu1 %v4465_v27  ;;  %v1574_v3 = vrot.slane %v1573_v7, 1  ;;  %v1592_v28 = vmax.f32 %v1590_v23, %v1591_v54  ;;  %2125 = vmatpush.msrb.mxu2 %v1826_v24  ;;  %v1587_v13 = vmax.f32 %v1585_v46, %v1586_v19  ;;  %v1717_v49 = vsel %vm961_vm7, %v4281_v37, %v1716_v39  ;;  %v1411_v6 = vld.sshfl [vmem:[#allocation1 + $0x8] sm:$0xff pattern:$0x73625140]  ;;  %v1854_v61 = vld [vmem:[%s5468_s5 + $0x398] sm:$0xff] }
 0x1cd   : > { %2147 = vmatpush.msrb.mxu3 %v1860_v55  ;;  %2190 = vmatpush.msra.mxu1 %v1930_v43  ;;  %v1600_v44 = vrot.slane %v1599_v50, 2  ;;  %v1606_v36 = vmax.f32 %v1604_v57, %v1605_v22  ;;  %v1580_v11 = vmax.f32 %v1578_v31, %v1579_v42  ;;  %v1611_v56 = vsel %vm718_vm4, %v1410_v4, -inf  ;;  %v1892_v37 = vld [vmem:[%s5468_s5 + $0x4c8] sm:$0xff]  ;;  %v1890_v23 = vld [vmem:[%s5468_s5 + $0x4b8] sm:$0xff] }
 0x1ce   : > { %v4491_v5 = vmax.f32 %v1573_v7, %v1574_v3  ;;  %v1593_v45 = vrot.slane %v1592_v28, 2  ;;  %2168 = vmatpush.msra.mxu0 %v1896_v62  ;;  %2126 = vmatpush.msrb.mxu2 %v1824_v17  ;;  %v1588_v53 = vrot.slane %v1587_v13, 1  ;;  %v1612_v40 = vrot.slane %v1611_v56, 4  ;;  %v1820_v30 = vld [vmem:[%s5468_s5 + $0x288] sm:$0xff]  ;;  %v1922_v57 = vld [vmem:[%s5468_s5 + $0x5b8] sm:$0xff] }
 0x1cf   : > { %v1601_v14 = vmax.f32 %v1599_v50, %v1600_v44  ;;  %v1607_v21 = vrot.slane %v1606_v36, 2  ;;  %2148 = vmatpush.msrb.mxu3 %v1858_v15  ;;  %2191 = vmatpush.msra.mxu1 %v1928_v59  ;;  %v1581_v20 = vrot.slane %v1580_v11, 1  ;;  %v1924_v12 = vld [vmem:[%s5468_s5 + $0x5c8] sm:$0xff]  ;;  %v1618_v2 = vsel %vm718_vm4, %v1411_v6, -inf  ;;  %v1818_v22 = vld [vmem:[%s5468_s5 + $0x278] sm:$0xff] }
 0x1d0   : > { %v1594_v39 = vmax.f32 %v1592_v28, %v1593_v45  ;;  %2169 = vmatpush.msra.mxu0 %v1894_v34  ;;  %2127 = vmatpush.msrb.mxu2 %v1822_v58  ;;  %v1718_v9 = vsel %vm963_vm8, %v4338_v25, %v1717_v49  ;;  %v4512_v8 = vmax.f32 %v1587_v13, %v1588_v53  ;;  %v1619_v25 = vrot.slane %v1618_v2, 4  ;;  %v1852_v55 = vld [vmem:[%s5468_s5 + $0x388] sm:$0xff]  ;;  %v1850_v62 = vld [vmem:[%s5468_s5 + $0x378] sm:$0xff]  ;;  %v1413_v59 = vld.sshfl [vmem:[#allocation1 + $0x20] sm:$0xff pattern:$0x73625140] }
 0x1d1   : > { %v1602_v1 = vrot.slane %v1601_v14, 1  ;;  %v1608_v26 = vmax.f32 %v1606_v36, %v1607_v21  ;;  %2149 = vmatpush.msrb.mxu3 %v1856_v38  ;;  %2192 = vmatpush.msra.mxu1 %v1926_v18  ;;  %v1613_v52 = vmax.f32 %v1611_v56, %v1612_v40  ;;  %v1677_v46 = vsel %vm957_vm5, %v4491_v5, %v4438_v0  ;;  %v1888_v15 = vld [vmem:[%s5468_s5 + $0x4a8] sm:$0xff]  ;;  %v1886_v45 = vld [vmem:[%s5468_s5 + $0x498] sm:$0xff] }
 0x1d2   : > { %v4520_v33 = vmax.f32 %v1580_v11, %v1581_v20  ;;  %v1595_v24 = vrot.slane %v1594_v39, 1  ;;  %2170 = vmatpush.msra.mxu0 %v1892_v37  ;;  %2128 = vmatpush.msrb.mxu2 %v1820_v30  ;;  %v1678_v7 = vsel %vm959_vm6, %v4512_v8, %v1677_v46  ;;  %v1620_v50 = vmax.f32 %v1618_v2, %v1619_v25  ;;  %v1920_v34 = vld [vmem:[%s5468_s5 + $0x5a8] sm:$0xff]  ;;  %v1814_v53 = vld [vmem:[%s5468_s5 + $0x258] sm:$0xff] }
 0x1d3   : > { %v4525_v43 = vmax.f32 %v1601_v14, %v1602_v1  ;;  %v1609_v31 = vrot.slane %v1608_v26, 1  ;;  %2150 = vmatpush.msrb.mxu3 %v1854_v61  ;;  %2193 = vmatpush.msra.mxu1 %v1924_v12  ;;  %v1614_v54 = vrot.slane %v1613_v52, 2  ;;  %v1719_v44 = vsel %vm965_vm9, %v4347_v16, %v1718_v9  ;;  %v1816_v58 = vld [vmem:[%s5468_s5 + $0x268] sm:$0xff]  ;;  %v1882_v25 = vld [vmem:[%s5468_s5 + $0x478] sm:$0xff] }
 0x1d4   : > { %v4532_v19 = vmax.f32 %v1594_v39, %v1595_v24  ;;  %2171 = vmatpush.msra.mxu0 %v1890_v23  ;;  %v1680_v42 = vsel %vm957_vm5, %v4520_v33, %v4448_v29  ;;  %v1621_v13 = vrot.slane %v1620_v50, 2  ;;  %v1722_v36 = vsel %vm957_vm5, %v4257_v47, %v4248_v63  ;;  %v1414_v4 = vld.sshfl [vmem:[#allocation1 + $0x28] sm:$0xff pattern:$0x73625140]  ;;  %2129 = vmatpush.msrb.mxu2 %v1818_v22  ;;  %v1842_v22 = vld [vmem:[%s5468_s5 + $0x338] sm:$0xff] }
 0x1d5   : > { %v4542_v17 = vsel %vm961_vm7, %v4525_v43, %v1678_v7  ;;  %v4544_v3 = vmax.f32 %v1608_v26, %v1609_v31  ;;  %v1615_v28 = vmax.f32 %v1613_v52, %v1614_v54  ;;  %2151 = vmatpush.msrb.mxu3 %v1852_v55  ;;  %2194 = vmatpush.msra.mxu1 %v1922_v57  ;;  %v1848_v47 = vld [vmem:[%s5468_s5 + $0x368] sm:$0xff]  ;;  %v1625_v14 = vsel %vm718_vm4, %v1413_v59, -inf  ;;  %v1914_v31 = vld [vmem:[%s5468_s5 + $0x578] sm:$0xff] }
 0x1d6   : > { %1956 = vmatmul.f32.gmra.mxu2 %v4542_v17  ;;  %v1681_v38 = vsel %vm959_vm6, %v4532_v19, %v1680_v42  ;;  %v1703_v16 = vsel %vm957_vm5, %v4512_v8, %v4491_v5  ;;  %v1723_v63 = vsel %vm959_vm6, %v4271_v41, %v1722_v36  ;;  %v1622_v18 = vmax.f32 %v1620_v50, %v1621_v13  ;;  %v1918_v41 = vld [vmem:[%s5468_s5 + $0x598] sm:$0xff]  ;;  %v1916_v61 = vld [vmem:[%s5468_s5 + $0x588] sm:$0xff] }
 0x1d7   : > { %v4568_v49 = vsel %vm961_vm7, %v4544_v3, %v1681_v38  ;;  %v1616_v11 = vrot.slane %v1615_v28, 1  ;;  %2152 = vmatpush.msrb.mxu3 %v1850_v62  ;;  %v1720_v56 = vsel %vm967_vm10, %v4438_v0, %v1719_v44  ;;  %v1724_v6 = vsel %vm961_vm7, %v4308_v35, %v1723_v63  ;;  %2172 = vmatpush.msra.mxu0 %v1888_v15  ;;  %v1846_v35 = vld [vmem:[%s5468_s5 + $0x358] sm:$0xff]  ;;  %v1844_v1 = vld [vmem:[%s5468_s5 + $0x348] sm:$0xff] }
 0x1d8   : > { %1979 = vmatmul.f32.gmra.mxu3 %v4568_v49  ;;  %v1725_v37 = vsel %vm963_vm8, %v4374_v32, %v1724_v6  ;;  %2195 = vmatpush.msra.mxu1 %v1920_v34  ;;  %v1626_v0 = vrot.slane %v1625_v14, 4  ;;  %v1632_v40 = vsel %vm718_vm4, %v1414_v4, -inf  ;;  %v1704_v30 = vsel %vm959_vm6, %v4525_v43, %v1703_v16  ;;  %v1884_v32 = vld [vmem:[%s5468_s5 + $0x488] sm:$0xff]  ;;  %v1878_v44 = vld [vmem:[%s5468_s5 + $0x458] sm:$0xff] }
 0x1d9   : > { %v1617_v21 = vmax.f32 %v1615_v28, %v1616_v11  ;;  %2130 = vmatpush.msrb.mxu2 %v1816_v58  ;;  %v1623_v20 = vrot.slane %v1622_v18, 1  ;;  %v1706_v39 = vsel %vm957_vm5, %v4532_v19, %v4520_v33  ;;  %2153 = vmatpush.msrb.mxu3 %v1848_v47  ;;  %v1633_v12 = vrot.slane %v1632_v40, 4  ;;  %v1812_v46 = vld [vmem:[%s5468_s5 + $0x248] sm:$0xff]  ;;  %v1910_v36 = vld [vmem:[%s5468_s5 + $0x558] sm:$0xff] }
 0x1da   : > { %2173 = vmatpush.msra.mxu0 %v1886_v45  ;;  %v1726_v9 = vsel %vm965_vm9, %v4376_v48, %v1725_v37  ;;  %2196 = vmatpush.msra.mxu1 %v1918_v41  ;;  %v1627_v26 = vmax.f32 %v1625_v14, %v1626_v0  ;;  %v1707_v48 = vsel %vm959_vm6, %v4544_v3, %v1706_v39  ;;  %v1880_v62 = vld [vmem:[%s5468_s5 + $0x468] sm:$0xff]  ;;  %v1838_v58 = vld [vmem:[%s5468_s5 + $0x318] sm:$0xff]  ;;  %v2360_v39 = vld [vmem:[%s5470_s7 + $0x60] sm:$0xff] }
 0x1db   : > { %v4611_v2 = vsel %vm961_vm7, %v1617_v21, %v1704_v30  ;;  %2131 = vmatpush.msrb.mxu2 %v1814_v53  ;;  %v1624_v52 = vmax.f32 %v1622_v18, %v1623_v20  ;;  %v1727_v23 = vsel %vm967_vm10, %v4448_v29, %v1726_v9  ;;  %2154 = vmatpush.msrb.mxu3 %v1846_v35  ;;  %v1912_v42 = vld [vmem:[%s5468_s5 + $0x568] sm:$0xff]  ;;  %v1806_v11 = vld [vmem:[%s5468_s5 + $0x218] sm:$0xff]  ;;  %v2394_v30 = vld [vmem:[%s5470_s7 + $0x170] sm:$0xff] }
 0x1dc   : > { %2002 = vmatmul.f32.gmra.mxu0 %v4611_v2  ;;  %v4628_v24 = vsel %vm969_vm11, %v4491_v5, %v1720_v56  ;;  %2197 = vmatpush.msra.mxu1 %v1916_v61  ;;  %v1628_v55 = vrot.slane %v1627_v26, 2  ;;  %v1634_v29 = vmax.f32 %v1632_v40, %v1633_v12  ;;  %v1810_v5 = vld [vmem:[%s5468_s5 + $0x238] sm:$0xff]  ;;  %v4646_v54 = vsel %vm969_vm11, %v4520_v33, %v1727_v23  ;;  %v1808_v33 = vld [vmem:[%s5468_s5 + $0x228] sm:$0xff]  ;;  %v2410_v20 = vld [vmem:[%s5470_s7 + $0x1f0] sm:$0xff] }
 0x1dd   : > { %2174 = vmatpush.msra.mxu0 %v1884_v32  ;;  %v4634_v7 = vsel %vm961_vm7, %v1624_v52, %v1707_v48  ;;  %2155 = vmatpush.msrb.mxu3 %v1844_v1  ;;  %v1729_v15 = vsel %vm957_vm5, %v4525_v43, %v4512_v8  ;;  %v1840_v38 = vld [vmem:[%s5468_s5 + $0x328] sm:$0xff]  ;;  %v1732_v43 = vsel %vm957_vm5, %v4544_v3, %v4532_v19  ;;  %v1874_v18 = vld [vmem:[%s5468_s5 + $0x438] sm:$0xff]  ;;  %v2376_v32 = vld [vmem:[%s5470_s7 + $0xe0] sm:$0xff] }
 0x1de   : > { %2045 = vmatmul.f32.vlgmr.msra.gmra.mxu2 %v4628_v24  ;;  %2025 = vmatmul.f32.gmra.mxu1 %v4634_v7  ;;  %v1629_v57 = vmax.f32 %v1627_v26, %v1628_v55  ;;  %v1635_v50 = vrot.slane %v1634_v29, 2  ;;  %v1730_v13 = vsel %vm959_vm6, %v1617_v21, %v1729_v15  ;;  %v1733_v4 = vsel %vm959_vm6, %v1624_v52, %v1732_v43  ;;  %v1876_v19 = vld [vmem:[%s5468_s5 + $0x448] sm:$0xff]  ;;  %v1906_v56 = vld [vmem:[%s5468_s5 + $0x538] sm:$0xff]  ;;  %v2378_v21 = vld [vmem:[%s5470_s7 + $0xf0] sm:$0xff] }
 0x1df   : > { %2132 = vmatpush.msrb.mxu2 %v1812_v46  ;;  %2175 = vmatpush.msra.mxu0 %v1882_v25  ;;  %v1804_v3 = vld [vmem:[%s5468_s5 + $0x208] sm:$0xff]  ;;  %v1870_v41 = vld [vmem:[%s5468_s5 + $0x418] sm:$0xff]  ;;  %v2392_v1 = vld [vmem:[%s5470_s7 + $0x160] sm:$0xff] }
 0x1e0   : > { %2068 = vmatmul.f32.vlgmr.msra.gmra.mxu3 %v4646_v54  ;;  %2198 = vmatpush.msra.mxu1 %v1914_v31  ;;  %v1630_v28 = vrot.slane %v1629_v57, 1  ;;  %v1636_v59 = vmax.f32 %v1634_v29, %v1635_v50  ;;  %v1836_v45 = vld [vmem:[%s5468_s5 + $0x308] sm:$0xff]  ;;  %v1902_v53 = vld [vmem:[%s5468_s5 + $0x518] sm:$0xff]  ;;  %v2408_v26 = vld [vmem:[%s5470_s7 + $0x1e0] sm:$0xff] }
 0x1e1   : > { %2133 = vmatpush.msrb.mxu2 %v1810_v5  ;;  %2156 = vmatpush.msrb.mxu3 %v1842_v22  ;;  %v1904_v6 = vld [vmem:[%s5468_s5 + $0x528] sm:$0xff]  ;;  %v2395_v37 = vld [vmem:[%s5470_s7 + $0x178] sm:$0xff]  ;;  %v2358_v52 = vld [vmem:[%s5470_s7 + $0x50] sm:$0xff] }
 0x1e2   : > { %2176 = vmatpush.msra.mxu0 %v1880_v62  ;;  %v1631_v34 = vmax.f32 %v1629_v57, %v1630_v28  ;;  %v1637_v8 = vrot.slane %v1636_v59, 1  ;;  %2199 = vmatpush.msra.mxu1 %v1912_v42  ;;  %v1868_v14 = vld [vmem:[%s5468_s5 + $0x408] sm:$0xff]  ;;  %v2411_v35 = vld [vmem:[%s5470_s7 + $0x1f8] sm:$0xff]  ;;  %v2374_v23 = vld [vmem:[%s5470_s7 + $0xd0] sm:$0xff] }
 0x1e3   : > { %2134 = vmatpush.msrb.mxu2 %v1808_v33  ;;  %2157 = vmatpush.msrb.mxu3 %v1840_v38  ;;  %v2361_v0 = vld [vmem:[%s5470_s7 + $0x68] sm:$0xff]  ;;  %v2375_v9 = vld [vmem:[%s5470_s7 + $0xd8] sm:$0xff]  ;;  %v2390_v55 = vld [vmem:[%s5470_s7 + $0x150] sm:$0xff] }
 0x1e4   : > { %2091 = vmatmul.f32.vlgmr.msrb.gmra.mxu0 %v4366_v51  ;;  %v1731_v16 = vsel %vm961_vm7, %v1631_v34, %v1730_v13  ;;  %v1638_v63 = vmax.f32 %v1636_v59, %v1637_v8  ;;  %2200 = vmatpush.msra.mxu1 %v1910_v36  ;;  %v1908_v51 = vld [vmem:[%s5468_s5 + $0x548] sm:$0xff]  ;;  %v2391_v46 = vld [vmem:[%s5470_s7 + $0x158] sm:$0xff]  ;;  %v2406_v29 = vld [vmem:[%s5470_s7 + $0x1d0] sm:$0xff] }
 0x1e5   : > { %2177 = vmatpush.msra.mxu0 %v1878_v44  ;;  %2158 = vmatpush.msrb.mxu3 %v1838_v58  ;;  %v2377_v40 = vld [vmem:[%s5470_s7 + $0xe8] sm:$0xff]  ;;  %v2407_v48 = vld [vmem:[%s5470_s7 + $0x1d8] sm:$0xff]  ;;  %v2372_v31 = vld [vmem:[%s5470_s7 + $0xc0] sm:$0xff] }
 0x1e6   : > { %2048 = vmatmul.f32.gmra.mxu2 %v1731_v16  ;;  %2114 = vmatmul.f32.vlgmr.msrb.gmra.mxu1 %v4409_v60  ;;  %v1734_v47 = vsel %vm961_vm7, %v1638_v63, %v1733_v4  ;;  %v1872_v60 = vld [vmem:[%s5468_s5 + $0x428] sm:$0xff]  ;;  %v2355_v57 = vld [vmem:[%s5470_s7 + $0x38] sm:$0xff]  ;;  %v2388_v22 = vld [vmem:[%s5470_s7 + $0x140] sm:$0xff] }
 0x1e7   : > { %2135 = vmatpush.msrb.mxu2 %v1806_v11  ;;  %2178 = vmatpush.msra.mxu0 %v1876_v19  ;;  %v2393_v61 = vld [vmem:[%s5470_s7 + $0x168] sm:$0xff]  ;;  %v2371_v50 = vld [vmem:[%s5470_s7 + $0xb8] sm:$0xff]  ;;  %v2404_v62 = vld [vmem:[%s5470_s7 + $0x1c0] sm:$0xff] }
 0x1e8   : > { %2071 = vmatmul.f32.gmra.mxu3 %v1734_v47  ;;  %2201 = vmatpush.msra.mxu1 %v1908_v51  ;;  %v2409_v12 = vld [vmem:[%s5470_s7 + $0x1e8] sm:$0xff]  ;;  %v2354_v42 = vld [vmem:[%s5470_s7 + $0x30] sm:$0xff]  ;;  %v2387_v28 = vld [vmem:[%s5470_s7 + $0x138] sm:$0xff] }
 0x1e9   : > { %2136 = vmatpush.msrb.mxu2 %v1804_v3  ;;  %2159 = vmatpush.msrb.mxu3 %v1836_v45  ;;  %v2373_v25 = vld [vmem:[%s5470_s7 + $0xc8] sm:$0xff]  ;;  %v2370_v33 = vld [vmem:[%s5470_s7 + $0xb0] sm:$0xff]  ;;  %v2403_v15 = vld [vmem:[%s5470_s7 + $0x1b8] sm:$0xff] }
 0x1ea   : > { %2179 = vmatpush.msra.mxu0 %v1874_v18  ;;  %2202 = vmatpush.msra.mxu1 %v1906_v56  ;;  %v2389_v5 = vld [vmem:[%s5470_s7 + $0x148] sm:$0xff]  ;;  %v2386_v13 = vld [vmem:[%s5470_s7 + $0x130] sm:$0xff]  ;;  %v2352_v36 = vld [vmem:[%s5470_s7 + $0x20] sm:$0xff] }
 0x1eb   : > { %v2353_v59 = vld [vmem:[%s5470_s7 + $0x28] sm:$0xff]  ;;  %v2402_v44 = vld [vmem:[%s5470_s7 + $0x1b0] sm:$0xff]  ;;  %v2368_v34 = vld [vmem:[%s5470_s7 + $0xa0] sm:$0xff] }
 0x1ec   : > { %2094 = vmatmul.f32.gmra.mxu0 %v4542_v17  ;;  %2203 = vmatpush.msra.mxu1 %v1904_v6  ;;  %v1900_v17 = vld [vmem:[%s5468_s5 + $0x508] sm:$0xff]  ;;  %v2351_v11 = vld [vmem:[%s5470_s7 + $0x18] sm:$0xff]  ;;  %v2384_v19 = vld [vmem:[%s5470_s7 + $0x120] sm:$0xff] }
 0x1ed   : > { %2180 = vmatpush.msra.mxu0 %v1872_v60  ;;  %v2369_v38 = vld [vmem:[%s5470_s7 + $0xa8] sm:$0xff]  ;;  %v2400_v51 = vld [vmem:[%s5470_s7 + $0x1a0] sm:$0xff]  ;;  %v2366_v45 = vld [vmem:[%s5470_s7 + $0x90] sm:$0xff] }
 0x1ee   : > { %2137 = vmatmul.f32.vlgmr.msrb.gmra.mxu2 %v4446_v10  ;;  %2117 = vmatmul.f32.gmra.mxu1 %v4568_v49  ;;  %v2363_v10 = vld [vmem:[%s5470_s7 + $0x78] sm:$0xff]  ;;  %v2362_v49 = vld [vmem:[%s5470_s7 + $0x70] sm:$0xff]  ;;  %v2385_v58 = vld [vmem:[%s5470_s7 + $0x128] sm:$0xff] }
 0x1ef   : > { %2181 = vmatpush.msra.mxu0 %v1870_v41  ;;  %2204 = vmatpush.msra.mxu1 %v1902_v53  ;;  %v2401_v4 = vld [vmem:[%s5470_s7 + $0x1a8] sm:$0xff]  ;;  %v2383_v18 = vld [vmem:[%s5470_s7 + $0x118] sm:$0xff] }
 0x1f0   : > { %2160 = vmatmul.f32.vlgmr.msrb.gmra.mxu3 %v4465_v27  ;;  %v2379_v27 = vld [vmem:[%s5470_s7 + $0xf8] sm:$0xff]  ;;  %2541 = vmatpush.msra.mxu2 %v2363_v10 }
 0x1f1   : > { %2182 = vmatpush.msra.mxu0 %v1868_v14  ;;  %2205 = vmatpush.msra.mxu1 %v1900_v17  ;;  %v2399_v56 = vld [vmem:[%s5470_s7 + $0x198] sm:$0xff]  ;;  %v4911_v14 = vld [vmem:[%s5469_s6] sm:$0x3] }
 0x1f2   : > { %2561 = vmatpush.msra.mxu3 %v2379_v27  ;;  %2542 = vmatpush.msra.mxu2 %v2362_v49  ;;  %v2349_v27 = vld [vmem:[%s5470_s7 + $0x8] sm:$0xff] }
 0x1f3   : > { %2581 = vmatpush.msrb.mxu0 %v2395_v37  ;;  %2601 = vmatpush.msrb.mxu1 %v2411_v35  ;;  %v2365_v49 = vld [vmem:[%s5470_s7 + $0x88] sm:$0xff]  ;;  %v1933_v37 = vperm.slane %v4911_v14, 0  ;;  %v2398_v35 = vld [vmem:[%s5470_s7 + $0x190] sm:$0xff] }
 0x1f4   : > { %2183 = vmatmul.f32.vlgmr.msra.gmra.mxu0 %v4628_v24  ;;  %2562 = vmatpush.msra.mxu3 %v2378_v21  ;;  %v2357_v24 = vld [vmem:[%s5470_s7 + $0x48] sm:$0xff]  ;;  %v2382_v21 = vld [vmem:[%s5470_s7 + $0x110] sm:$0xff] }
 0x1f5   : > { %2543 = vmatpush.msra.mxu2 %v2361_v0  ;;  %2582 = vmatpush.msrb.mxu0 %v2394_v30  ;;  %v2348_v0 = vld [vmem:[%s5470_s7] sm:$0xff] }
 0x1f6   : > { %2140 = vmatmul.f32.gmra.mxu2 %v4611_v2  ;;  %2206 = vmatmul.f32.vlgmr.msra.gmra.mxu1 %v4646_v54  ;;  %v2359_v2 = vld [vmem:[%s5470_s7 + $0x58] sm:$0xff]  ;;  %v2405_v54 = vld [vmem:[%s5470_s7 + $0x1c8] sm:$0xff] }
 0x1f7   : > { %2563 = vmatpush.msra.mxu3 %v2377_v40  ;;  %2602 = vmatpush.msrb.mxu1 %v2410_v20  ;;  %v2364_v40 = vld [vmem:[%s5470_s7 + $0x80] sm:$0xff]  ;;  %v2381_v20 = vld [vmem:[%s5470_s7 + $0x108] sm:$0xff] }
 0x1f8   : > { %2163 = vmatmul.f32.gmra.mxu3 %v4634_v7  ;;  %2544 = vmatpush.msra.mxu2 %v2360_v39  ;;  %v2356_v7 = vld [vmem:[%s5470_s7 + $0x40] sm:$0xff]  ;;  %v2397_v39 = vld [vmem:[%s5470_s7 + $0x188] sm:$0xff] }
 0x1f9   : > { %2564 = vmatpush.msra.mxu3 %v2376_v32  ;;  %2583 = vmatpush.msrb.mxu0 %v2393_v61  ;;  %v2427_v32 = vld [vmem:[%s5470_s7 + $0x278] sm:$0xff] }
 0x1fa   : > { %2603 = vmatpush.msrb.mxu1 %v2409_v12  ;;  %2545 = vmatpush.msra.mxu2 %v2359_v2  ;;  %v2443_v12 = vld [vmem:[%s5470_s7 + $0x2f8] sm:$0xff]  ;;  %v2380_v2 = vld [vmem:[%s5470_s7 + $0x100] sm:$0xff] }
 0x1fb   : > { %2565 = vmatpush.msra.mxu3 %v2375_v9  ;;  %2584 = vmatpush.msrb.mxu0 %v2392_v1  ;;  %v2396_v9 = vld [vmem:[%s5470_s7 + $0x180] sm:$0xff]  ;;  %v2426_v1 = vld [vmem:[%s5470_s7 + $0x270] sm:$0xff] }
 0x1fc   : > { %2186 = vmatmul.f32.gmra.mxu0 %v1731_v16  ;;  %2604 = vmatpush.msrb.mxu1 %v2408_v26  ;;  %v2367_v16 = vld [vmem:[%s5470_s7 + $0x98] sm:$0xff]  ;;  %v2442_v26 = vld [vmem:[%s5470_s7 + $0x2f0] sm:$0xff] }
 0x1fd   : > { %2546 = vmatpush.msra.mxu2 %v2358_v52  ;;  %2566 = vmatpush.msra.mxu3 %v2374_v23  ;;  %v2459_v23 = vld [vmem:[%s5470_s7 + $0x378] sm:$0xff] }
 0x1fe   : > { %2209 = vmatmul.f32.gmra.mxu1 %v1734_v47  ;;  %2585 = vmatpush.msrb.mxu0 %v2391_v46  ;;  %v2350_v47 = vld [vmem:[%s5470_s7 + $0x10] sm:$0xff]  ;;  %v2475_v46 = vld [vmem:[%s5470_s7 + $0x3f8] sm:$0xff] }
 0x1ff   : > { %2605 = vmatpush.msrb.mxu1 %v2407_v48  ;;  %2547 = vmatpush.msra.mxu2 %v2357_v24  ;;  %v1934_v48 = vperm.slane %v4911_v14, 1  ;;  %v2425_v24 = vld [vmem:[%s5470_s7 + $0x268] sm:$0xff] }
 0x200   : > { %2567 = vmatpush.msra.mxu3 %v2373_v25  ;;  %2586 = vmatpush.msrb.mxu0 %v2390_v55  ;;  %v2441_v25 = vld [vmem:[%s5470_s7 + $0x2e8] sm:$0xff]  ;;  %v2458_v55 = vld [vmem:[%s5470_s7 + $0x370] sm:$0xff] }
 0x201   : > { %2606 = vmatpush.msrb.mxu1 %v2406_v29  ;;  %2548 = vmatpush.msra.mxu2 %v2356_v7  ;;  %v2474_v7 = vld [vmem:[%s5470_s7 + $0x3f0] sm:$0xff]  ;;  %v2417_v14 = vld [vmem:[%s5470_s7 + $0x228] sm:$0xff] }
 0x202   : > { %2568 = vmatpush.msra.mxu3 %v2372_v31  ;;  %2587 = vmatpush.msrb.mxu0 %v2389_v5  ;;  %v2424_v31 = vld [vmem:[%s5470_s7 + $0x260] sm:$0xff] }
 0x203   : > { %2607 = vmatpush.msrb.mxu1 %v2405_v54  ;;  %2549 = vmatpush.msra.mxu2 %v2355_v57  ;;  %v2440_v5 = vld [vmem:[%s5470_s7 + $0x2e0] sm:$0xff] }
 0x204   : > { %2569 = vmatpush.msra.mxu3 %v2371_v50  ;;  %2588 = vmatpush.msrb.mxu0 %v2388_v22  ;;  %v2457_v50 = vld [vmem:[%s5470_s7 + $0x368] sm:$0xff] }
 0x205   : > { %2608 = vmatpush.msrb.mxu1 %v2404_v62  ;;  %2550 = vmatpush.msra.mxu2 %v2354_v42  ;;  %v2473_v22 = vld [vmem:[%s5470_s7 + $0x3e8] sm:$0xff]  ;;  %v2423_v42 = vld [vmem:[%s5470_s7 + $0x258] sm:$0xff] }
 0x206   : > { %2570 = vmatpush.msra.mxu3 %v2370_v33  ;;  %2589 = vmatpush.msrb.mxu0 %v2387_v28  ;;  %v2439_v33 = vld [vmem:[%s5470_s7 + $0x2d8] sm:$0xff] }
 0x207   : > { %2609 = vmatpush.msrb.mxu1 %v2403_v15  ;;  %2551 = vmatpush.msra.mxu2 %v2353_v59  ;;  %v2456_v59 = vld [vmem:[%s5470_s7 + $0x360] sm:$0xff] }
 0x208   : > { %2571 = vmatpush.msra.mxu3 %v2369_v38  ;;  %2590 = vmatpush.msrb.mxu0 %v2386_v13  ;;  %v2472_v38 = vld [vmem:[%s5470_s7 + $0x3e0] sm:$0xff]  ;;  %v2422_v13 = vld [vmem:[%s5470_s7 + $0x250] sm:$0xff] }
 0x209   : > { %2610 = vmatpush.msrb.mxu1 %v2402_v44  ;;  %2552 = vmatpush.msra.mxu2 %v2352_v36  ;;  %v2438_v44 = vld [vmem:[%s5470_s7 + $0x2d0] sm:$0xff] }
 0x20a   : > { %2572 = vmatpush.msra.mxu3 %v2368_v34  ;;  %2591 = vmatpush.msrb.mxu0 %v2385_v58  ;;  %v2455_v34 = vld [vmem:[%s5470_s7 + $0x358] sm:$0xff]  ;;  %v2421_v58 = vld [vmem:[%s5470_s7 + $0x248] sm:$0xff] }
 0x20b   : > { %2611 = vmatpush.msrb.mxu1 %v2401_v4  ;;  %2553 = vmatpush.msra.mxu2 %v2351_v11  ;;  %v2454_v11 = vld [vmem:[%s5470_s7 + $0x350] sm:$0xff] }
 0x20c   : > { %2573 = vmatpush.msra.mxu3 %v2367_v16  ;;  %2592 = vmatpush.msrb.mxu0 %v2384_v19  ;;  %v2470_v16 = vld [vmem:[%s5470_s7 + $0x3d0] sm:$0xff]  ;;  %v2420_v19 = vld [vmem:[%s5470_s7 + $0x240] sm:$0xff] }
 0x20d   : > { %2612 = vmatpush.msrb.mxu1 %v2400_v51  ;;  %2554 = vmatpush.msra.mxu2 %v2350_v47  ;;  %v2436_v51 = vld [vmem:[%s5470_s7 + $0x2c0] sm:$0xff] }
 0x20e   : > { %2574 = vmatpush.msra.mxu3 %v2366_v45  ;;  %2593 = vmatpush.msrb.mxu0 %v2383_v18  ;;  %v2453_v18 = vld [vmem:[%s5470_s7 + $0x348] sm:$0xff] }
 0x20f   : > { %2613 = vmatpush.msrb.mxu1 %v2399_v56  ;;  %2555 = vmatpush.msra.mxu2 %v2349_v27  ;;  %v2469_v56 = vld [vmem:[%s5470_s7 + $0x3c8] sm:$0xff]  ;;  %v2419_v27 = vld [vmem:[%s5470_s7 + $0x238] sm:$0xff] }
 0x210   : > { %2575 = vmatpush.msra.mxu3 %v2365_v49  ;;  %2594 = vmatpush.msrb.mxu0 %v2382_v21 }
 0x211   : > { %2614 = vmatpush.msrb.mxu1 %v2398_v35  ;;  %2556 = vmatpush.msra.mxu2 %v2348_v0 }
 0x212   : > { %2576 = vmatpush.msra.mxu3 %v2364_v40  ;;  %2595 = vmatpush.msrb.mxu0 %v2381_v20  ;;  %v2452_v40 = vld [vmem:[%s5470_s7 + $0x340] sm:$0xff] }
 0x213   : > { %2615 = vmatpush.msrb.mxu1 %v2397_v39  ;;  %2621 = vmatpush.msrb.mxu2 %v2427_v32  ;;  %v2468_v20 = vld [vmem:[%s5470_s7 + $0x3c0] sm:$0xff]  ;;  %v2434_v39 = vld [vmem:[%s5470_s7 + $0x2b0] sm:$0xff] }
 0x214   : > { %2641 = vmatpush.msrb.mxu3 %v2443_v12  ;;  %2596 = vmatpush.msrb.mxu0 %v2380_v2  ;;  %v2451_v2 = vld [vmem:[%s5470_s7 + $0x338] sm:$0xff] }
 0x215   : > { %2616 = vmatpush.msrb.mxu1 %v2396_v9  ;;  %2622 = vmatpush.msrb.mxu2 %v2426_v1  ;;  %v2467_v9 = vld [vmem:[%s5470_s7 + $0x3b8] sm:$0xff] }
 0x216   : > { %2642 = vmatpush.msrb.mxu3 %v2442_v26  ;;  %2661 = vmatpush.msra.mxu0 %v2459_v23  ;;  %v2466_v23 = vld [vmem:[%s5470_s7 + $0x3b0] sm:$0xff] }
 0x217   : > { %2681 = vmatpush.msra.mxu1 %v2475_v46  ;;  %2623 = vmatpush.msrb.mxu2 %v2425_v24 }
 0x218   : > { %2643 = vmatpush.msrb.mxu3 %v2441_v25  ;;  %2662 = vmatpush.msra.mxu0 %v2458_v55 }
 0x219   : > { %2682 = vmatpush.msra.mxu1 %v2474_v7  ;;  %2624 = vmatpush.msrb.mxu2 %v2424_v31  ;;  %v2449_v7 = vld [vmem:[%s5470_s7 + $0x328] sm:$0xff] }
 0x21a   : > { %2644 = vmatpush.msrb.mxu3 %v2440_v5  ;;  %2663 = vmatpush.msra.mxu0 %v2457_v50  ;;  %v2465_v31 = vld [vmem:[%s5470_s7 + $0x3a8] sm:$0xff] }
 0x21b   : > { %2683 = vmatpush.msra.mxu1 %v2473_v22  ;;  %2625 = vmatpush.msrb.mxu2 %v2423_v42  ;;  %v2431_v22 = vld [vmem:[%s5470_s7 + $0x298] sm:$0xff]  ;;  %v2448_v42 = vld [vmem:[%s5470_s7 + $0x320] sm:$0xff] }
 0x21c   : > { %2645 = vmatpush.msrb.mxu3 %v2439_v33  ;;  %2664 = vmatpush.msra.mxu0 %v2456_v59  ;;  %v2464_v33 = vld [vmem:[%s5470_s7 + $0x3a0] sm:$0xff] }
 0x21d   : > { %2684 = vmatpush.msra.mxu1 %v2472_v38  ;;  %2626 = vmatpush.msrb.mxu2 %v2422_v13 }
 0x21e   : > { %2646 = vmatpush.msrb.mxu3 %v2438_v44  ;;  %2665 = vmatpush.msra.mxu0 %v2455_v34  ;;  %v2430_v44 = vld [vmem:[%s5470_s7 + $0x290] sm:$0xff] }
 0x21f   : > { %2627 = vmatpush.msrb.mxu2 %v2421_v58  ;;  %v2413_v58 = vld [vmem:[%s5470_s7 + $0x208] sm:$0xff] }
 0x220   : > { %2666 = vmatpush.msra.mxu0 %v2454_v11  ;;  %v2446_v11 = vld [vmem:[%s5470_s7 + $0x310] sm:$0xff] }
 0x221   : > { %2628 = vmatpush.msrb.mxu2 %v2420_v19  ;;  %v2412_v19 = vld [vmem:[%s5470_s7 + $0x200] sm:$0xff] }
 0x222   : > { %2667 = vmatpush.msra.mxu0 %v2453_v18  ;;  %v2445_v18 = vld [vmem:[%s5470_s7 + $0x308] sm:$0xff] }
 0x223   : > { %2629 = vmatpush.msrb.mxu2 %v2419_v27 }
 0x224   : > { %2668 = vmatpush.msra.mxu0 %v2452_v40 }
 0x226   : > { %2669 = vmatpush.msra.mxu0 %v2451_v2 }
 0x245   : > { %v1954_v8 = vpop.f32.mrf.mxu2 }
 0x246   : > { %v1955_v52 = vadd.f32 %v1954_v8, %v1933_v37  ;;  %v2471_v8 = vld [vmem:[%s5470_s7 + $0x3d8] sm:$0xff] }
 0x247   : > { %v4864_v43 = vpop.f32.mrf.mxu0  ;;  %2685 = vmatpush.msra.mxu1 %v2471_v8 }
 0x249   : > { %v4878_v63 = vpop.f32.mrf.mxu3  ;;  %v4886_v3 = vpop.f32.mrf.mxu1  ;;  %2686 = vmatpush.msra.mxu1 %v2470_v16 }
 0x24a   : > { %v1978_v54 = vadd.f32 %v4878_v63, %v1955_v52  ;;  %v2450_v52 = vld [vmem:[%s5470_s7 + $0x330] sm:$0xff] }
 0x24b   : > { %2687 = vmatpush.msra.mxu1 %v2469_v56  ;;  %2670 = vmatpush.msra.mxu0 %v2450_v52  ;;  %v2461_v56 = vld [vmem:[%s5470_s7 + $0x388] sm:$0xff] }
 0x24c   : > { %v2001_v36 = vadd.f32 %v4864_v43, %v1978_v54  ;;  %v2437_v43 = vld [vmem:[%s5470_s7 + $0x2c8] sm:$0xff]  ;;  %v2415_v54 = vld [vmem:[%s5470_s7 + $0x218] sm:$0xff] }
 0x24d   : > { %2647 = vmatpush.msrb.mxu3 %v2437_v43  ;;  %2688 = vmatpush.msra.mxu1 %v2468_v20 }
 0x24e   : > { %v2024_v47 = vadd.f32 %v4886_v3, %v2001_v36  ;;  %v2435_v3 = vld [vmem:[%s5470_s7 + $0x2b8] sm:$0xff]  ;;  %2671 = vmatpush.msra.mxu0 %v2449_v7 }
 0x24f   : > { %2648 = vmatpush.msrb.mxu3 %v2436_v51  ;;  %2689 = vmatpush.msra.mxu1 %v2467_v9  ;;  %v2447_v36 = vld [vmem:[%s5470_s7 + $0x318] sm:$0xff] }
 0x250   : > { %2672 = vmatpush.msra.mxu0 %v2448_v42 }
 0x251   : > { %2649 = vmatpush.msrb.mxu3 %v2435_v3  ;;  %2690 = vmatpush.msra.mxu1 %v2466_v23 }
 0x252   : > { %2673 = vmatpush.msra.mxu0 %v2447_v36  ;;  %v2507_v36 = vld [vmem:[%s5470_s7 + $0x4f8] sm:$0xff] }
 0x253   : > { %2650 = vmatpush.msrb.mxu3 %v2434_v39  ;;  %2691 = vmatpush.msra.mxu1 %v2465_v31 }
 0x254   : > { %2674 = vmatpush.msra.mxu0 %v2446_v11 }
 0x255   : > { %2692 = vmatpush.msra.mxu1 %v2464_v33 }
 0x256   : > { %2675 = vmatpush.msra.mxu0 %v2445_v18  ;;  %v2506_v18 = vld [vmem:[%s5470_s7 + $0x4f0] sm:$0xff] }
 0x259   : > { %v4900_v60 = vpop.f32.mrf.mxu2  ;;  %v4902_v6 = vpop.f32.mrf.mxu0 }
 0x25a   : > { %v1958_v32 = vadd.f32 %v4900_v60, %v1933_v37  ;;  %v2433_v60 = vld [vmem:[%s5470_s7 + $0x2a8] sm:$0xff] }
 0x25b   : > { %v4904_v41 = vpop.f32.mrf.mxu3  ;;  %v4906_v53 = vpop.f32.mrf.mxu1  ;;  %2651 = vmatpush.msrb.mxu3 %v2433_v60 }
 0x25c   : > { %v1981_v24 = vadd.f32 %v4904_v41, %v1958_v32 }
 0x261   : > { %v4913_v17 = vpop.f32.mrf.mxu2  ;;  %v2092_v10 = vpop.f32.mrf.mxu0 }
 0x262   : > { %v2093_v28 = vadd.f32 %v2092_v10, %v1934_v48  ;;  %v2047_v49 = vadd.f32 %v4913_v17, %v2024_v47  ;;  %v2418_v17 = vld [vmem:[%s5470_s7 + $0x230] sm:$0xff] }
 0x263   : > { %v4934_v30 = vpop.f32.mrf.mxu3  ;;  %v2115_v61 = vpop.f32.mrf.mxu1  ;;  %2630 = vmatpush.msrb.mxu2 %v2418_v17 }
 0x264   : > { %v2116_v4 = vadd.f32 %v2115_v61, %v2093_v28  ;;  %v2070_v37 = vadd.f32 %v4934_v30, %v2047_v49  ;;  %v2416_v30 = vld [vmem:[%s5470_s7 + $0x220] sm:$0xff]  ;;  %v2414_v28 = vld [vmem:[%s5470_s7 + $0x210] sm:$0xff] }
 0x265   : > { %2631 = vmatpush.msrb.mxu2 %v2417_v14 }
 0x266   : > { %v2213_v41 = vmax.f32 %v2070_v37, 0.0 }
 0x267   : > { %2632 = vmatpush.msrb.mxu2 %v2416_v30 }
 0x269   : > { %v4978_v29 = vpop.f32.mrf.mxu2  ;;  %v2095_v57 = vpop.f32.mrf.mxu0  ;;  %2633 = vmatpush.msrb.mxu2 %v2415_v54 }
 0x26a   : > { %v2096_v21 = vadd.f32 %v2095_v57, %v1934_v48  ;;  %v2432_v48 = vld [vmem:[%s5470_s7 + $0x2a0] sm:$0xff] }
 0x26b   : > { %v4996_v62 = vpop.f32.mrf.mxu3  ;;  %v5006_v15 = vpop.f32.mrf.mxu1  ;;  %2652 = vmatpush.msrb.mxu3 %v2432_v48  ;;  %2634 = vmatpush.msrb.mxu2 %v2414_v28 }
 0x26c   : > { %v2119_v1 = vadd.f32 %v5006_v15, %v2096_v21  ;;  %v2004_v15 = vadd.f32 %v4902_v6, %v1981_v24  ;;  %v2463_v6 = vld [vmem:[%s5470_s7 + $0x398] sm:$0xff]  ;;  %v2460_v21 = vld [vmem:[%s5470_s7 + $0x380] sm:$0xff] }
 0x26d   : > { %2653 = vmatpush.msrb.mxu3 %v2431_v22  ;;  %2693 = vmatpush.msra.mxu1 %v2463_v6 }
 0x26e   : > { %v2027_v51 = vadd.f32 %v4906_v53, %v2004_v15  ;;  %2635 = vmatpush.msrb.mxu2 %v2413_v58 }
 0x26f   : > { %2654 = vmatpush.msrb.mxu3 %v2430_v44  ;;  %v2491_v44 = vld [vmem:[%s5470_s7 + $0x478] sm:$0xff] }
 0x270   : > { %v2050_v53 = vadd.f32 %v4978_v29, %v2027_v51  ;;  %2636 = vmatpush.msrb.mxu2 %v2412_v19 }
 0x271   : > { %v2138_v63 = vpop.f32.mrf.mxu2  ;;  %v2184_v0 = vpop.f32.mrf.mxu0 }
 0x272   : > { %v2139_v45 = vadd.f32 %v2138_v63, %v2116_v4  ;;  %v2429_v4 = vld [vmem:[%s5470_s7 + $0x288] sm:$0xff]  ;;  %v2462_v63 = vld [vmem:[%s5470_s7 + $0x390] sm:$0xff]  ;;  %v2073_v20 = vadd.f32 %v4996_v62, %v2050_v53 }
 0x273   : > { %v2161_v10 = vpop.f32.mrf.mxu3  ;;  %v2207_v12 = vpop.f32.mrf.mxu1  ;;  %2655 = vmatpush.msrb.mxu3 %v2429_v4  ;;  %2694 = vmatpush.msra.mxu1 %v2462_v63  ;;  %v2490_v63 = vld [vmem:[%s5470_s7 + $0x470] sm:$0xff] }
 0x274   : > { %v2162_v35 = vadd.f32 %v2161_v10, %v2139_v45  ;;  %v2428_v45 = vld [vmem:[%s5470_s7 + $0x280] sm:$0xff]  ;;  %v2215_v52 = vmax.f32 %v2073_v20, 0.0 }
 0x275   : > { %v2444_v10 = vld [vmem:[%s5470_s7 + $0x300] sm:$0xff]  ;;  %2656 = vmatpush.msrb.mxu3 %v2428_v45  ;;  %2695 = vmatpush.msra.mxu1 %v2461_v56  ;;  %v2523_v56 = vld [vmem:[%s5470_s7 + $0x578] sm:$0xff] }
 0x276   : > { %v2185_v61 = vadd.f32 %v2184_v0, %v2162_v35  ;;  %2676 = vmatpush.msra.mxu0 %v2444_v10  ;;  %v2539_v10 = vld [vmem:[%s5470_s7 + $0x5f8] sm:$0xff]  ;;  %v2488_v20 = vld [vmem:[%s5470_s7 + $0x460] sm:$0xff] }
 0x277   : > { %2696 = vmatpush.msra.mxu1 %v2460_v21 }
 0x278   : > { %v2208_v26 = vadd.f32 %v2207_v12, %v2185_v61 }
 0x279   : > { %v2141_v46 = vpop.f32.mrf.mxu2  ;;  %v2187_v13 = vpop.f32.mrf.mxu0 }
 0x27a   : > { %v2214_v25 = vmax.f32 %v2208_v26, 0.0  ;;  %v2142_v55 = vadd.f32 %v2141_v46, %v2119_v1 }
 0x27b   : > { %v2164_v5 = vpop.f32.mrf.mxu3  ;;  %v2210_v43 = vpop.f32.mrf.mxu1 }
 0x27c   : > { %v2221_v57 = vrot.slane %v2214_v25, 6  ;;  %v2165_v50 = vadd.f32 %v2164_v5, %v2142_v55 }
 0x27e   : > { %v2223_v59 = vsel %vm718_vm4, %v2213_v41, %v2221_v57  ;;  %v2224_v38 = vsel %vm1347_vm12, %v2213_v41, %v2221_v57  ;;  %v2188_v8 = vadd.f32 %v2187_v13, %v2165_v50  ;;  %v2226_v47 = vsel %vm1350_vm13, %v2213_v41, %v2221_v57 }
 0x27f   : > { %v2225_v34 = vrot.slane %v2224_v38, 2  ;;  %2233 = vst [vmem:[#allocation1] ss:$4 sm:$0xff] %v2223_v59  ;;  %v2227_v27 = vrot.slane %v2226_v47, 4  ;;  %v2228_v3 = vsel %vm516_vm1, %v2221_v57, %v2213_v41 }
 0x280   : > { %v2211_v16 = vadd.f32 %v2210_v43, %v2188_v8  ;;  %v2229_v17 = vrot.slane %v2228_v3, 6 }
 0x281   : > { %2237 = vst [vmem:[#allocation1 + $0x20] ss:$4 sm:$0xff] %v2225_v34 }
 0x282   : > { %v2216_v49 = vmax.f32 %v2211_v16, 0.0 }
 0x284   : > { %v2222_v12 = vrot.slane %v2216_v49, 6 }
 0x286   : > { %v2234_v35 = vld.sshfl [vmem:[#allocation1] sm:$0xff pattern:$0x73625140]  ;;  %v2235_v0 = vld.sshfl [vmem:[#allocation1 + $0x8] sm:$0xff pattern:$0x73625140]  ;;  %v2231_v48 = vsel %vm1347_vm12, %v2215_v52, %v2222_v12  ;;  %v2230_v31 = vsel %vm718_vm4, %v2215_v52, %v2222_v12 }
 0x287   : > { %v2264_v29 = vsel %vm718_vm4, %v2234_v35, -inf  ;;  %v2271_v40 = vsel %vm718_vm4, %v2235_v0, -inf  ;;  %2240 = vst [vmem:[#allocation1] ss:$4 sm:$0xff] %v2227_v27  ;;  %v2232_v33 = vrot.slane %v2231_v48, 2  ;;  %v2489_v27 = vld [vmem:[%s5470_s7 + $0x468] sm:$0xff] }
 0x288   : > { %v2265_v39 = vrot.slane %v2264_v29, 4  ;;  %v2272_v32 = vrot.slane %v2271_v40, 4  ;;  %v2238_v61 = vld.sshfl [vmem:[#allocation1 + $0x20] sm:$0xff pattern:$0x73625140]  ;;  %v2505_v35 = vld [vmem:[%s5470_s7 + $0x4e8] sm:$0xff] }
 0x289   : > { %v2278_v2 = vsel %vm718_vm4, %v2238_v61, -inf  ;;  %v2239_v9 = vld.sshfl [vmem:[#allocation1 + $0x28] sm:$0xff pattern:$0x73625140]  ;;  %v2522_v0 = vld [vmem:[%s5470_s7 + $0x570] sm:$0xff]  ;;  %v2504_v61 = vld [vmem:[%s5470_s7 + $0x4e0] sm:$0xff] }
 0x28a   : > { %v2266_v14 = vmax.f32 %v2264_v29, %v2265_v39  ;;  %v2273_v60 = vmax.f32 %v2271_v40, %v2272_v32  ;;  %v2279_v37 = vrot.slane %v2278_v2, 4  ;;  %v2285_v1 = vsel %vm718_vm4, %v2239_v9, -inf  ;;  %2243 = vst [vmem:[#allocation1 + $0x20] ss:$4 sm:$0xff] %v2229_v17  ;;  %v2538_v40 = vld [vmem:[%s5470_s7 + $0x5f0] sm:$0xff]  ;;  %v2521_v12 = vld [vmem:[%s5470_s7 + $0x568] sm:$0xff] }
 0x28b   : > { %v2286_v26 = vrot.slane %v2285_v1, 4  ;;  %v2537_v9 = vld [vmem:[%s5470_s7 + $0x5e8] sm:$0xff]  ;;  %v2503_v52 = vld [vmem:[%s5470_s7 + $0x4d8] sm:$0xff] }
 0x28c   : > { %v2267_v23 = vrot.slane %v2266_v14, 2  ;;  %v2274_v46 = vrot.slane %v2273_v60, 2  ;;  %v2280_v62 = vmax.f32 %v2278_v2, %v2279_v37 }
 0x28d   : > { %v2287_v30 = vmax.f32 %v2285_v1, %v2286_v26  ;;  %v2487_v26 = vld [vmem:[%s5470_s7 + $0x458] sm:$0xff] }
 0x28e   : > { %v2268_v24 = vmax.f32 %v2266_v14, %v2267_v23  ;;  %v2275_v25 = vmax.f32 %v2273_v60, %v2274_v46  ;;  %v2281_v55 = vrot.slane %v2280_v62, 2  ;;  %v2241_v7 = vld.sshfl [vmem:[#allocation1] sm:$0xff pattern:$0x73625140] }
 0x28f   : > { %v2288_v5 = vrot.slane %v2287_v30, 2  ;;  %v2292_v54 = vsel %vm718_vm4, %v2241_v7, -inf  ;;  %v2242_v41 = vld.sshfl [vmem:[#allocation1 + $0x8] sm:$0xff pattern:$0x73625140]  ;;  %v2520_v46 = vld [vmem:[%s5470_s7 + $0x560] sm:$0xff] }
 0x290   : > { %v2269_v57 = vrot.slane %v2268_v24, 1  ;;  %v2276_v50 = vrot.slane %v2275_v25, 1  ;;  %v2282_v22 = vmax.f32 %v2280_v62, %v2281_v55  ;;  %v2293_v42 = vrot.slane %v2292_v54, 4  ;;  %2246 = vst [vmem:[#allocation1] ss:$4 sm:$0xff] %v2230_v31 }
 0x291   : > { %v2289_v28 = vmax.f32 %v2287_v30, %v2288_v5  ;;  %v2299_v15 = vsel %vm718_vm4, %v2242_v41, -inf  ;;  %v2244_v59 = vld.sshfl [vmem:[#allocation1 + $0x20] sm:$0xff pattern:$0x73625140]  ;;  %v2486_v5 = vld [vmem:[%s5470_s7 + $0x450] sm:$0xff] }
 0x292   : > { %v2270_v38 = vmax.f32 %v2268_v24, %v2269_v57  ;;  %v2277_v13 = vmax.f32 %v2275_v25, %v2276_v50  ;;  %v2283_v34 = vrot.slane %v2282_v22, 1  ;;  %v2294_v8 = vmax.f32 %v2292_v54, %v2293_v42  ;;  %v2245_v6 = vld.sshfl [vmem:[#allocation1 + $0x28] sm:$0xff pattern:$0x73625140]  ;;  %v2536_v25 = vld [vmem:[%s5470_s7 + $0x5e0] sm:$0xff]  ;;  %v2502_v57 = vld [vmem:[%s5470_s7 + $0x4d0] sm:$0xff] }
 0x293   : > { %v2290_v58 = vrot.slane %v2289_v28, 1  ;;  %v2300_v43 = vrot.slane %v2299_v15, 4  ;;  %v2306_v4 = vsel %vm718_vm4, %v2244_v59, -inf  ;;  %v2313_v11 = vsel %vm718_vm4, %v2245_v6, -inf  ;;  %2249 = vst [vmem:[#allocation1 + $0x20] ss:$4 sm:$0xff] %v2232_v33 }
 0x294   : > { %2557 = vmatmul.f32.vlgmr.msra.gmra.mxu2 %v2270_v38  ;;  %2577 = vmatmul.f32.vlgmr.msra.gmra.mxu3 %v2277_v13  ;;  %v2284_v16 = vmax.f32 %v2282_v22, %v2283_v34  ;;  %v2295_v19 = vrot.slane %v2294_v8, 2  ;;  %v2307_v51 = vrot.slane %v2306_v4, 4  ;;  %v2314_v47 = vrot.slane %v2313_v11, 4  ;;  %v2519_v50 = vld [vmem:[%s5470_s7 + $0x558] sm:$0xff]  ;;  %v2485_v33 = vld [vmem:[%s5470_s7 + $0x448] sm:$0xff]  ;;  %v2518_v59 = vld [vmem:[%s5470_s7 + $0x550] sm:$0xff] }
 0x295   : > { %2701 = vmatpush.msra.mxu2 %v2491_v44  ;;  %2721 = vmatpush.msra.mxu3 %v2507_v36  ;;  %v2291_v45 = vmax.f32 %v2289_v28, %v2290_v58  ;;  %v2301_v53 = vmax.f32 %v2299_v15, %v2300_v43  ;;  %v2535_v42 = vld [vmem:[%s5470_s7 + $0x5d8] sm:$0xff]  ;;  %v2501_v15 = vld [vmem:[%s5470_s7 + $0x4c8] sm:$0xff]  ;;  %v2534_v44 = vld [vmem:[%s5470_s7 + $0x5d0] sm:$0xff] }
 0x296   : > { %2597 = vmatmul.f32.vlgmr.msrb.gmra.mxu0 %v2284_v16  ;;  %v2296_v3 = vmax.f32 %v2294_v8, %v2295_v19  ;;  %v2308_v49 = vmax.f32 %v2306_v4, %v2307_v51  ;;  %v2315_v21 = vmax.f32 %v2313_v11, %v2314_v47  ;;  %v2484_v36 = vld [vmem:[%s5470_s7 + $0x440] sm:$0xff]  ;;  %v2517_v6 = vld [vmem:[%s5470_s7 + $0x548] sm:$0xff]  ;;  %v2483_v4 = vld [vmem:[%s5470_s7 + $0x438] sm:$0xff] }
 0x297   : > { %2617 = vmatmul.f32.vlgmr.msrb.gmra.mxu1 %v2291_v45  ;;  %2702 = vmatpush.msra.mxu2 %v2490_v63  ;;  %v2302_v29 = vrot.slane %v2301_v53, 2  ;;  %v2247_v23 = vld.sshfl [vmem:[#allocation1] sm:$0xff pattern:$0x73625140]  ;;  %v2533_v43 = vld [vmem:[%s5470_s7 + $0x5c8] sm:$0xff]  ;;  %v2499_v16 = vld [vmem:[%s5470_s7 + $0x4b8] sm:$0xff] }
 0x298   : > { %2722 = vmatpush.msra.mxu3 %v2506_v18  ;;  %2741 = vmatpush.msrb.mxu0 %v2523_v56  ;;  %v2297_v17 = vrot.slane %v2296_v3, 1  ;;  %v2309_v39 = vrot.slane %v2308_v49, 2  ;;  %v2316_v32 = vrot.slane %v2315_v21, 2  ;;  %v2248_v48 = vld.sshfl [vmem:[#allocation1 + $0x8] sm:$0xff pattern:$0x73625140] }
 0x299   : > { %2761 = vmatpush.msrb.mxu1 %v2539_v10  ;;  %2703 = vmatpush.msra.mxu2 %v2489_v27  ;;  %v2303_v2 = vmax.f32 %v2301_v53, %v2302_v29  ;;  %v2320_v54 = vsel %vm718_vm4, %v2247_v23, -inf  ;;  %v2327_v22 = vsel %vm718_vm4, %v2248_v48, -inf  ;;  %v2500_v8 = vld [vmem:[%s5470_s7 + $0x4c0] sm:$0xff]  ;;  %v2482_v47 = vld [vmem:[%s5470_s7 + $0x430] sm:$0xff]  ;;  %v2515_v56 = vld [vmem:[%s5470_s7 + $0x538] sm:$0xff] }
 0x29a   : > { %2723 = vmatpush.msra.mxu3 %v2505_v35  ;;  %2742 = vmatpush.msrb.mxu0 %v2522_v0  ;;  %v2298_v14 = vmax.f32 %v2296_v3, %v2297_v17  ;;  %v2310_v60 = vmax.f32 %v2308_v49, %v2309_v39  ;;  %v2317_v37 = vmax.f32 %v2315_v21, %v2316_v32  ;;  %v2250_v55 = vld.sshfl [vmem:[#allocation1 + $0x20] sm:$0xff pattern:$0x73625140]  ;;  %v2251_v41 = vld.sshfl [vmem:[#allocation1 + $0x28] sm:$0xff pattern:$0x73625140] }
 0x29b   : > { %2762 = vmatpush.msrb.mxu1 %v2538_v40  ;;  %2704 = vmatpush.msra.mxu2 %v2488_v20  ;;  %v2304_v1 = vrot.slane %v2303_v2, 1  ;;  %v2334_v28 = vsel %vm718_vm4, %v2250_v55, -inf  ;;  %v2321_v38 = vrot.slane %v2320_v54, 4  ;;  %v2341_v13 = vsel %vm718_vm4, %v2251_v41, -inf  ;;  %v2516_v63 = vld [vmem:[%s5470_s7 + $0x540] sm:$0xff]  ;;  %v2498_v18 = vld [vmem:[%s5470_s7 + $0x4b0] sm:$0xff] }
 0x29c   : > { %2724 = vmatpush.msra.mxu3 %v2504_v61  ;;  %2743 = vmatpush.msrb.mxu0 %v2521_v12  ;;  %v2311_v62 = vrot.slane %v2310_v60, 1  ;;  %v2318_v30 = vrot.slane %v2317_v37, 1  ;;  %v2328_v34 = vrot.slane %v2327_v22, 4  ;;  %v2335_v58 = vrot.slane %v2334_v28, 4  ;;  %v2532_v51 = vld [vmem:[%s5470_s7 + $0x5c0] sm:$0xff]  ;;  %v2531_v10 = vld [vmem:[%s5470_s7 + $0x5b8] sm:$0xff] }
 0x29d   : > { %2763 = vmatpush.msrb.mxu1 %v2537_v9  ;;  %2637 = vmatmul.f32.vlgmr.msrb.gmra.mxu2 %v2298_v14  ;;  %v2305_v24 = vmax.f32 %v2303_v2, %v2304_v1  ;;  %v2342_v11 = vrot.slane %v2341_v13, 4  ;;  %v2322_v19 = vmax.f32 %v2320_v54, %v2321_v38  ;;  %v2481_v27 = vld [vmem:[%s5470_s7 + $0x428] sm:$0xff]  ;;  %v2514_v21 = vld [vmem:[%s5470_s7 + $0x530] sm:$0xff]  ;;  %v2480_v29 = vld [vmem:[%s5470_s7 + $0x420] sm:$0xff] }
 0x29e   : > { %2705 = vmatpush.msra.mxu2 %v2487_v26  ;;  %2725 = vmatpush.msra.mxu3 %v2503_v52  ;;  %v2312_v7 = vmax.f32 %v2310_v60, %v2311_v62  ;;  %v2319_v31 = vmax.f32 %v2317_v37, %v2318_v30  ;;  %v2329_v45 = vmax.f32 %v2327_v22, %v2328_v34  ;;  %v2497_v49 = vld [vmem:[%s5470_s7 + $0x4a8] sm:$0xff]  ;;  %v2530_v0 = vld [vmem:[%s5470_s7 + $0x5b0] sm:$0xff]  ;;  %v2496_v20 = vld [vmem:[%s5470_s7 + $0x4a0] sm:$0xff] }
 0x29f   : > { %2657 = vmatmul.f32.vlgmr.msrb.gmra.mxu3 %v2305_v24  ;;  %2744 = vmatpush.msrb.mxu0 %v2520_v46  ;;  %v2336_v53 = vmax.f32 %v2334_v28, %v2335_v58  ;;  %v2343_v3 = vmax.f32 %v2341_v13, %v2342_v11  ;;  %v2323_v35 = vrot.slane %v2322_v19, 2  ;;  %v2513_v17 = vld [vmem:[%s5470_s7 + $0x528] sm:$0xff]  ;;  %v2479_v61 = vld [vmem:[%s5470_s7 + $0x418] sm:$0xff]  ;;  %v2512_v9 = vld [vmem:[%s5470_s7 + $0x520] sm:$0xff] }
 0x2a0   : > { %2764 = vmatpush.msrb.mxu1 %v2536_v25  ;;  %2677 = vmatmul.f32.vlgmr.msra.gmra.mxu0 %v2312_v7  ;;  %v2330_v40 = vrot.slane %v2329_v45, 2  ;;  %v2529_v32 = vld [vmem:[%s5470_s7 + $0x5a8] sm:$0xff]  ;;  %v2495_v2 = vld [vmem:[%s5470_s7 + $0x498] sm:$0xff]  ;;  %v2528_v60 = vld [vmem:[%s5470_s7 + $0x5a0] sm:$0xff] }
 0x2a1   : > { %2697 = vmatmul.f32.vlgmr.msra.gmra.mxu1 %v2319_v31  ;;  %2706 = vmatpush.msra.mxu2 %v2486_v5  ;;  %v2337_v39 = vrot.slane %v2336_v53, 2  ;;  %v2344_v12 = vrot.slane %v2343_v3, 2  ;;  %v2324_v14 = vmax.f32 %v2322_v19, %v2323_v35  ;;  %v2478_v37 = vld [vmem:[%s5470_s7 + $0x410] sm:$0xff]  ;;  %v2511_v52 = vld [vmem:[%s5470_s7 + $0x518] sm:$0xff]  ;;  %v2477_v62 = vld [vmem:[%s5470_s7 + $0x408] sm:$0xff] }
 0x2a2   : > { %2726 = vmatpush.msra.mxu3 %v2502_v57  ;;  %2745 = vmatpush.msrb.mxu0 %v2519_v50  ;;  %v2331_v1 = vmax.f32 %v2329_v45, %v2330_v40  ;;  %v2494_v26 = vld [vmem:[%s5470_s7 + $0x490] sm:$0xff]  ;;  %v2527_v46 = vld [vmem:[%s5470_s7 + $0x598] sm:$0xff]  ;;  %v2493_v48 = vld [vmem:[%s5470_s7 + $0x488] sm:$0xff] }
 0x2a3   : > { %2765 = vmatpush.msrb.mxu1 %v2535_v42  ;;  %2707 = vmatpush.msra.mxu2 %v2485_v33  ;;  %v2338_v23 = vmax.f32 %v2336_v53, %v2337_v39  ;;  %v2345_v30 = vmax.f32 %v2343_v3, %v2344_v12  ;;  %v2510_v24 = vld [vmem:[%s5470_s7 + $0x510] sm:$0xff]  ;;  %v2325_v25 = vrot.slane %v2324_v14, 1  ;;  %v2476_v7 = vld [vmem:[%s5470_s7 + $0x400] sm:$0xff]  ;;  %v2509_v54 = vld [vmem:[%s5470_s7 + $0x508] sm:$0xff] }
 0x2a4   : > { %2727 = vmatpush.msra.mxu3 %v2501_v15  ;;  %2746 = vmatpush.msrb.mxu0 %v2518_v59  ;;  %v2526_v55 = vld [vmem:[%s5470_s7 + $0x590] sm:$0xff]  ;;  %v2332_v31 = vrot.slane %v2331_v1, 1  ;;  %v2492_v5 = vld [vmem:[%s5470_s7 + $0x480] sm:$0xff]  ;;  %v2525_v57 = vld [vmem:[%s5470_s7 + $0x588] sm:$0xff] }
 0x2a5   : > { %2766 = vmatpush.msrb.mxu1 %v2534_v44  ;;  %2708 = vmatpush.msra.mxu2 %v2484_v36  ;;  %v2339_v41 = vrot.slane %v2338_v23, 1  ;;  %v2346_v50 = vrot.slane %v2345_v30, 1  ;;  %v2326_v22 = vmax.f32 %v2324_v14, %v2325_v25  ;;  %v2508_v42 = vld [vmem:[%s5470_s7 + $0x500] sm:$0xff]  ;;  %v2797_v38 = vld [vmem:[%s5472_s9 + $0x78] sm:$0xff]  ;;  %v2796_v13 = vld [vmem:[%s5472_s9 + $0x70] sm:$0xff] }
 0x2a6   : > { %2728 = vmatpush.msra.mxu3 %v2500_v8  ;;  %2747 = vmatpush.msrb.mxu0 %v2517_v6  ;;  %v2333_v33 = vmax.f32 %v2331_v1, %v2332_v31  ;;  %v2524_v28 = vld [vmem:[%s5470_s7 + $0x580] sm:$0xff]  ;;  %v2795_v44 = vld [vmem:[%s5472_s9 + $0x68] sm:$0xff]  ;;  %v2793_v34 = vld [vmem:[%s5472_s9 + $0x58] sm:$0xff] }
 0x2a7   : > { %2767 = vmatpush.msrb.mxu1 %v2533_v43  ;;  %2709 = vmatpush.msra.mxu2 %v2483_v4  ;;  %v2340_v15 = vmax.f32 %v2338_v23, %v2339_v41  ;;  %v2347_v59 = vmax.f32 %v2345_v30, %v2346_v50  ;;  %v2794_v36 = vld [vmem:[%s5472_s9 + $0x60] sm:$0xff]  ;;  %v2792_v8 = vld [vmem:[%s5472_s9 + $0x50] sm:$0xff]  ;;  %v2791_v6 = vld [vmem:[%s5472_s9 + $0x48] sm:$0xff] }
 0x2a8   : > { %2729 = vmatpush.msra.mxu3 %v2499_v16  ;;  %2748 = vmatpush.msrb.mxu0 %v2516_v63  ;;  %v2790_v58 = vld [vmem:[%s5472_s9 + $0x40] sm:$0xff]  ;;  %v2789_v43 = vld [vmem:[%s5472_s9 + $0x38] sm:$0xff]  ;;  %v2788_v4 = vld [vmem:[%s5472_s9 + $0x30] sm:$0xff] }
 0x2a9   : > { %2768 = vmatpush.msrb.mxu1 %v2532_v51  ;;  %2710 = vmatpush.msra.mxu2 %v2482_v47  ;;  %v2540_v11 = vld [vmem:[%s5471_s8] sm:$0x1]  ;;  %v2787_v47 = vld [vmem:[%s5472_s9 + $0x28] sm:$0xff]  ;;  %v2785_v53 = vld [vmem:[%s5472_s9 + $0x18] sm:$0xff] }
 0x2aa   : > { %2730 = vmatpush.msra.mxu3 %v2498_v18  ;;  %2749 = vmatpush.msrb.mxu0 %v2515_v56  ;;  %v2786_v45 = vld [vmem:[%s5472_s9 + $0x20] sm:$0xff] }
 0x2ab   : > { %2769 = vmatpush.msrb.mxu1 %v2531_v10  ;;  %2711 = vmatpush.msra.mxu2 %v2481_v27  ;;  %v2784_v10 = vld [vmem:[%s5472_s9 + $0x10] sm:$0xff]  ;;  %v2782_v35 = vld [vmem:[%s5472_s9] sm:$0xff] }
 0x2ac   : > { %2731 = vmatpush.msra.mxu3 %v2497_v49  ;;  %2750 = vmatpush.msrb.mxu0 %v2514_v21  ;;  %v2783_v49 = vld [vmem:[%s5472_s9 + $0x8] sm:$0xff] }
 0x2ad   : > { %2770 = vmatpush.msrb.mxu1 %v2530_v0  ;;  %2712 = vmatpush.msra.mxu2 %v2480_v29 }
 0x2ae   : > { %2732 = vmatpush.msra.mxu3 %v2496_v20  ;;  %2751 = vmatpush.msrb.mxu0 %v2513_v17 }
 0x2af   : > { %2771 = vmatpush.msrb.mxu1 %v2529_v32  ;;  %2713 = vmatpush.msra.mxu2 %v2479_v61 }
 0x2b0   : > { %2733 = vmatpush.msra.mxu3 %v2495_v2  ;;  %2752 = vmatpush.msrb.mxu0 %v2512_v9 }
 0x2b1   : > { %2772 = vmatpush.msrb.mxu1 %v2528_v60  ;;  %2714 = vmatpush.msra.mxu2 %v2478_v37 }
 0x2b2   : > { %2734 = vmatpush.msra.mxu3 %v2494_v26  ;;  %2753 = vmatpush.msrb.mxu0 %v2511_v52  ;;  %v2798_v52 = vld [vmem:[%s5473_s10] sm:$0x1] }
 0x2b3   : > { %2773 = vmatpush.msrb.mxu1 %v2527_v46  ;;  %2715 = vmatpush.msra.mxu2 %v2477_v62 }
 0x2b4   : > { %2735 = vmatpush.msra.mxu3 %v2493_v48  ;;  %2754 = vmatpush.msrb.mxu0 %v2510_v24 }
 0x2b5   : > { %2774 = vmatpush.msrb.mxu1 %v2526_v55  ;;  %2716 = vmatpush.msra.mxu2 %v2476_v7 }
 0x2b6   : > { %2736 = vmatpush.msra.mxu3 %v2492_v5  ;;  %2755 = vmatpush.msrb.mxu0 %v2509_v54 }
 0x2b7   : > { %2775 = vmatpush.msrb.mxu1 %v2525_v57  ;;  %2717 = vmatmul.f32.vlgmr.msra.gmra.mxu2 %v2326_v22 }
 0x2b8   : > { %2737 = vmatmul.f32.vlgmr.msra.gmra.mxu3 %v2333_v33  ;;  %2756 = vmatpush.msrb.mxu0 %v2508_v42 }
 0x2b9   : > { %2776 = vmatpush.msrb.mxu1 %v2524_v28  ;;  %2757 = vmatmul.f32.vlgmr.msrb.gmra.mxu0 %v2340_v15 }
 0x2ba   : > { %2777 = vmatmul.f32.vlgmr.msrb.gmra.mxu1 %v2347_v59  ;;  %2799 = vmatpush.msrb.mxu2 %v2797_v38 }
 0x2bc   : > { %2800 = vmatpush.msrb.mxu2 %v2796_v13 }
 0x2be   : > { %2801 = vmatpush.msrb.mxu2 %v2795_v44 }
 0x2c0   : > { %2802 = vmatpush.msrb.mxu2 %v2794_v36 }
 0x2c2   : > { %2803 = vmatpush.msrb.mxu2 %v2793_v34 }
 0x2c4   : > { %2804 = vmatpush.msrb.mxu2 %v2792_v8 }
 0x2c6   : > { %2805 = vmatpush.msrb.mxu2 %v2791_v6 }
 0x2c8   : > { %2806 = vmatpush.msrb.mxu2 %v2790_v58 }
 0x2ca   : > { %2807 = vmatpush.msrb.mxu2 %v2789_v43 }
 0x2cc   : > { %2808 = vmatpush.msrb.mxu2 %v2788_v4 }
 0x2ce   : > { %2809 = vmatpush.msrb.mxu2 %v2787_v47 }
 0x2d0   : > { %2810 = vmatpush.msrb.mxu2 %v2786_v45 }
 0x2d2   : > { %2811 = vmatpush.msrb.mxu2 %v2785_v53 }
 0x2d4   : > { %2812 = vmatpush.msrb.mxu2 %v2784_v10 }
 0x2d6   : > { %2813 = vmatpush.msrb.mxu2 %v2783_v49 }
 0x2d8   : > { %2814 = vmatpush.msrb.mxu2 %v2782_v35 }
 0x313   : > { %v2598_v18 = vpop.f32.mrf.mxu0 }
 0x314   : > { %v2618_v27 = vpop.f32.mrf.mxu1 }
 0x317   : > { %v2558_v16 = vpop.f32.mrf.mxu2  ;;  %v2578_v19 = vpop.f32.mrf.mxu3 }
 0x318   : > { %v2559_v63 = vadd.f32 %v2558_v16, %v2540_v11 }
 0x31a   : > { %v2579_v51 = vadd.f32 %v2578_v19, %v2559_v63 }
 0x31c   : > { %v2599_v56 = vadd.f32 %v2598_v18, %v2579_v51 }
 0x31d   : > { %v2678_v20 = vpop.f32.mrf.mxu0 }
 0x31e   : > { %v2619_v3 = vadd.f32 %v2618_v27, %v2599_v56  ;;  %v2698_v39 = vpop.f32.mrf.mxu1 }
 0x320   : > { %v2638_v21 = vpop.f32.mrf.mxu2 }
 0x321   : > { %v2639_v0 = vadd.f32 %v2638_v21, %v2619_v3 }
 0x322   : > { %v2658_v29 = vpop.f32.mrf.mxu3 }
 0x323   : > { %v2659_v40 = vadd.f32 %v2658_v29, %v2639_v0 }
 0x325   : > { %v2679_v17 = vadd.f32 %v2678_v20, %v2659_v40 }
 0x327   : > { %v2699_v32 = vadd.f32 %v2698_v39, %v2679_v17 }
 0x336   : > { %v2758_v14 = vpop.f32.mrf.mxu0 }
 0x337   : > { %v2778_v37 = vpop.f32.mrf.mxu1 }
 0x33a   : > { %v2718_v61 = vpop.f32.mrf.mxu2 }
 0x33b   : > { %v2719_v12 = vadd.f32 %v2718_v61, %v2699_v32  ;;  %v2738_v2 = vpop.f32.mrf.mxu3 }
 0x33d   : > { %v2739_v9 = vadd.f32 %v2738_v2, %v2719_v12 }
 0x33f   : > { %v2759_v60 = vadd.f32 %v2758_v14, %v2739_v9 }
 0x341   : > { %v2779_v1 = vadd.f32 %v2778_v37, %v2759_v60 }
 0x343   : > { %v2781_v26 = vmax.f32 %v2779_v1, 0.0 }
 0x345   : > { %2815 = vmatmul.f32.vlgmr.msrb.gmra.mxu2 %v2781_v26 }
 0x3c8   : > { %v2816_v23 = vpop.f32.mrf.mxu2 }
 0x3c9   : > { %v2817_v46 = vadd.f32 %v2816_v23, %v2798_v52 }
 0x3cb   : > { %2819 = vst [vmem:[%s378_s13] sm:$0x1] %v2817_v46 }
 0x3cc   : > { %2968 = shalt.err (!%p2965_p3)
}
 0x3cd   : > { %2897 = dma.vmem_to_hbm [thread:$0]  (%p3104_p5), %s2832_s14, 16, %s2834_s15, %s2821_s16  }
 0x3ce PF: > { %p2903_p4 = scmp.ge.s32.totalorder %s3003_s20, 2  ;;  %s2845_s22 = sand.u32 1, %s2991_s17  }
 0x3cf   : > { %s2846_s29 = scalar_lea.sflag [#allocation3], %s2845_s22 }
 0x3d0   : > { %p2900_p7 = pnand %p2903_p4, %p3108_p6 }
 0x3d2   : > { %p2901_p8 = pneg %p2900_p7 }
 0x3d4   : > { %2986 = dma.done.wait (%p2901_p8), %s2846_s29, 16  }
 0x3d5   : > { %2988 = vsyncadd (%p2901_p8), %s2846_s29, 4294967280  ;;  %p21_p9 = scmp.ge.s32.totalorder %s3091_s23, 4   ;;  %s5481_s17 = smov %s2995_s18 }
 0x3d6   : > { %s5482_s18 = smov %s2999_s19  ;;  %s5483_s19 = smov %s3102_s26 }
 0x3d7   : > { %s5484_s20 = smov %s3091_s23  ;;  %23 = sbr.rel (!%p21_p9) target bundleno = 6 (0x6), region = 101 }
 0x3dc   :  { %2851 = vsyncpa [#allocation3], 1 }
 0x3dd   :  { %2853 = vsyncpa [#allocation3 + $0x1], 1 }

</bundles_post_ra>
